<compile_context>
chip_gen: v6e
topology: v6e:2x2x1
jax: 0.10.0
libtpu: 0.0.40
codegen_flags: <defaults>
</compile_context>

<pallas_src>
import functools
import math

import jax
import jax.numpy as jnp
from jax.experimental import pallas as pl
from jax.experimental.pallas import tpu as pltpu

# Explicit scoped-VMEM budget: above v5e's 16 MiB default, below v7x's 64 MiB
# per-TensorCore physical budget with headroom. Actual footprint here is ~3 MiB.
_VMEM_LIMIT = 48 * 1024 * 1024
_NEG_INF = float(jnp.finfo(jnp.float32).min)     # causal mask (PyTorch fidelity)
_DOC_MASK = -1e30                                # large finite: stacking with the
                                                 # causal mask can never hit -inf


# ---------------------------------------------------------------------------
# Fused kernel: RMSNorm + QKV + attention + output projection + residual.
# One grid step per batch element.
# ---------------------------------------------------------------------------
def _t5_self_attn_kernel(x_ref, lnw_ref, wq_ref, wk_ref, wv_ref, wo_ref,
                         bias_ref, doc_col_ref, doc_row_ref,
                         o_ref,
                         q_sc, k_sc, v_sc, ctx_sc,
                         *, eps, n_heads, d_kv):
    # --- T5 RMS LayerNorm (f32 statistics) ---------------------------------
    x = x_ref[0].astype(jnp.float32)                          # (S, Dm)
    var = jnp.mean(x * x, axis=-1, keepdims=True)             # XLU reduce
    normed = x * jax.lax.rsqrt(var + eps)                     # EUP rsqrt
    normed = (normed * lnw_ref[...].astype(jnp.float32)).astype(jnp.bfloat16)

    # --- fused Q/K/V projections (bf16 MXU operands, f32 accumulate) -------
    q_sc[...] = jnp.dot(normed, wq_ref[...],
                        preferred_element_type=jnp.float32).astype(jnp.bfloat16)
    k_sc[...] = jnp.dot(normed, wk_ref[...],
                        preferred_element_type=jnp.float32).astype(jnp.bfloat16)
    v_sc[...] = jnp.dot(normed, wv_ref[...],
                        preferred_element_type=jnp.float32).astype(jnp.bfloat16)

    # --- doc mask built in-kernel (same-document attention only) -----------
    same_doc = doc_col_ref[0] == doc_row_ref[0]               # (S,1)==(1,S)->(S,S)
    doc_mask = jnp.where(same_doc, jnp.float32(0.0), jnp.float32(_DOC_MASK))

    # --- per-head attention; ctx written into (S, H*Dk) scratch ------------
    for h in range(n_heads):                                  # static unroll
        lo = h * d_kv
        q = q_sc[:, lo:lo + d_kv]                             # (S, Dk) bf16
        k = k_sc[:, lo:lo + d_kv]
        v = v_sc[:, lo:lo + d_kv]
        # T5 attention: NO 1/sqrt(d) scaling of the scores.
        s = jax.lax.dot_general(q, k, (((1,), (1,)), ((), ())),
                                preferred_element_type=jnp.float32)  # (S, S)
        s = s + bias_ref[h] + doc_mask                        # pos + causal + doc
        m = jnp.max(s, axis=-1, keepdims=True)                # XLU
        p = jnp.exp(s - m)                                    # EUP
        l = jnp.sum(p, axis=-1, keepdims=True)
        ctx = jnp.dot(p.astype(jnp.bfloat16), v,
                      preferred_element_type=jnp.float32)     # (S, Dk)
        # Normalize after PV: S*Dk multiplies instead of S*S.
        ctx = ctx * pl.reciprocal(l, approx=True)             # EUP, ~free slot
        ctx_sc[:, lo:lo + d_kv] = ctx.astype(jnp.bfloat16)

    # --- single 256-deep output projection + residual add ------------------
    out = jnp.dot(ctx_sc[...], wo_ref[...],
                  preferred_element_type=jnp.float32)         # (S, Dm)
    o_ref[0] = (x_ref[0].astype(jnp.float32) + out).astype(o_ref.dtype)


# ---------------------------------------------------------------------------
# Bias construction (wrapper-side jnp; faithful to the PyTorch reference).
# ---------------------------------------------------------------------------
def _relative_position_bucket(relative_position, num_buckets, max_distance):
    rel = -jnp.minimum(relative_position, 0)          # decoder/causal style
    max_exact = num_buckets // 2
    is_small = rel < max_exact
    rel_f = jnp.maximum(rel, max_exact).astype(jnp.float32)
    rel_if_large = max_exact + (
        jnp.log(rel_f / max_exact) / math.log(max_distance / max_exact)
        * (num_buckets - max_exact)).astype(jnp.int32)
    rel_if_large = jnp.minimum(rel_if_large, num_buckets - 1)
    return jnp.where(is_small, rel, rel_if_large)


def _compute_position_bias(rel_emb, q_len, k_len, num_buckets, max_distance):
    q_pos = jnp.arange(k_len - q_len, k_len, dtype=jnp.int32)[:, None]
    k_pos = jnp.arange(k_len, dtype=jnp.int32)[None, :]
    buckets = _relative_position_bucket(k_pos - q_pos, num_buckets, max_distance)
    values = jnp.take(rel_emb, buckets, axis=0)               # (q, k, H)
    bias = jnp.transpose(values, (2, 0, 1))[None].astype(jnp.float32)
    causal = jnp.tril(jnp.ones((q_len, k_len), jnp.float32))
    causal = ((1.0 - causal) * _NEG_INF)[None, None]          # (1, 1, q, k)
    return bias + causal                                       # (1, H, q, k)


def _doc_mask(doc_ids):   # only used by the pure-jnp reference in __main__
    same = (doc_ids[:, :, None] == doc_ids[:, None, :]).astype(jnp.float32)
    return ((1.0 - same) * _NEG_INF)[:, None]                  # (B, 1, S, S)


# ---------------------------------------------------------------------------
# Layer forward (mirrors T5LayerSelfAttention.forward, eval mode, no caches).
# ---------------------------------------------------------------------------
def t5_layer_self_attention(hidden_states, doc_ids, params, *,
                            n_heads, d_kv, num_buckets=32, max_distance=128,
                            layer_norm_eps=1e-6):
    """Returns (hidden_states + attn_output, position_bias)."""
    batch, seq, d_model = hidden_states.shape
    inner = n_heads * d_kv

    # Relative-position bias + causal mask (tiny, batch-invariant, jnp).
    position_bias = _compute_position_bias(params["rel_bias"], seq, seq,
                                           num_buckets, max_distance)  # (1,H,S,S)
    bias_hss = position_bias[0]                                        # (H,S,S) f32

    # torch Linear weights are (out, in); MXU wants (in, out), bf16 operands.
    wq_t = params["wq"].T.astype(jnp.bfloat16)
    wk_t = params["wk"].T.astype(jnp.bfloat16)
    wv_t = params["wv"].T.astype(jnp.bfloat16)
    wo_t = params["wo"].T.astype(jnp.bfloat16)
    ln_w = params["ln_weight"].reshape(1, d_model)

    doc_i32 = doc_ids.astype(jnp.int32)
    doc_col = doc_i32.reshape(batch, seq, 1)
    doc_row = doc_i32.reshape(batch, 1, seq)

    kernel = functools.partial(_t5_self_attn_kernel, eps=layer_norm_eps,
                               n_heads=n_heads, d_kv=d_kv)

    out = pl.pallas_call(
        kernel,
        out_shape=jax.ShapeDtypeStruct((batch, seq, d_model),
                                       hidden_states.dtype),
        grid_spec=pltpu.PrefetchScalarGridSpec(
            num_scalar_prefetch=0,
            grid=(batch,),
            in_specs=[
                pl.BlockSpec((1, seq, d_model), lambda b: (b, 0, 0)),    # x
                pl.BlockSpec((1, d_model), lambda b: (0, 0)),            # ln w
                pl.BlockSpec((d_model, inner), lambda b: (0, 0)),        # wq
                pl.BlockSpec((d_model, inner), lambda b: (0, 0)),        # wk
                pl.BlockSpec((d_model, inner), lambda b: (0, 0)),        # wv
                pl.BlockSpec((inner, d_model), lambda b: (0, 0)),        # wo
                pl.BlockSpec((n_heads, seq, seq), lambda b: (0, 0, 0)),  # bias
                pl.BlockSpec((1, seq, 1), lambda b: (b, 0, 0)),          # doc col
                pl.BlockSpec((1, 1, seq), lambda b: (b, 0, 0)),          # doc row
            ],
            # Lane-dense output: last dim is d_model (multiple of 128).
            out_specs=pl.BlockSpec((1, seq, d_model), lambda b: (b, 0, 0)),
            scratch_shapes=[
                pltpu.VMEM((seq, inner), jnp.bfloat16),   # q
                pltpu.VMEM((seq, inner), jnp.bfloat16),   # k
                pltpu.VMEM((seq, inner), jnp.bfloat16),   # v
                pltpu.VMEM((seq, inner), jnp.bfloat16),   # ctx (pre-output-proj)
            ],
        ),
        compiler_params=pltpu.CompilerParams(
            dimension_semantics=("parallel",),
            vmem_limit_bytes=_VMEM_LIMIT),
    )(hidden_states, ln_w, wq_t, wk_t, wv_t, wo_t, bias_hss, doc_col, doc_row)
    return out, position_bias


if __name__ == "__main__":
    key = jax.random.PRNGKey(0)
    B, S, H, Dk, Dm = 2, 128, 4, 64, 256
    inner = H * Dk
    num_buckets, max_distance = 32, 128

    ks = jax.random.split(key, 7)
    hidden = jax.random.normal(ks[0], (B, S, Dm), jnp.float32)
    params = {
        "ln_weight": 1.0 + 0.1 * jax.random.normal(ks[1], (Dm,), jnp.float32),
        "wq": 0.02 * jax.random.normal(ks[2], (inner, Dm), jnp.float32),
        "wk": 0.02 * jax.random.normal(ks[3], (inner, Dm), jnp.float32),
        "wv": 0.02 * jax.random.normal(ks[4], (inner, Dm), jnp.float32),
        "wo": 0.02 * jax.random.normal(ks[5], (Dm, inner), jnp.float32),
        "rel_bias": 0.1 * jax.random.normal(ks[6], (num_buckets, H), jnp.float32),
    }
    # Two documents per batch row: first half doc 0, second half doc 1.
    doc_ids = jnp.concatenate(
        [jnp.zeros((B, S // 2), jnp.int32), jnp.ones((B, S // 2), jnp.int32)],
        axis=1)

    out, pos_bias = t5_layer_self_attention(
        hidden, doc_ids, params, n_heads=H, d_kv=Dk,
        num_buckets=num_buckets, max_distance=max_distance)
    out = jax.block_until_ready(out)

    # --- pure-jnp (f32) reference for verification ---------------------------
    def reference(x):
        var = jnp.mean(x.astype(jnp.float32) ** 2, axis=-1, keepdims=True)
        normed = (x * jax.lax.rsqrt(var + 1e-6)) * params["ln_weight"]

        def proj(w):
            y = normed.reshape(B * S, Dm) @ w.T
            return y.reshape(B, S, H, Dk).transpose(0, 2, 1, 3)

        q, k, v = proj(params["wq"]), proj(params["wk"]), proj(params["wv"])
        full_bias = (_compute_position_bias(params["rel_bias"], S, S,
                                            num_buckets, max_distance)
                     + _doc_mask(doc_ids))
        scores = jnp.einsum("bhqd,bhkd->bhqk", q, k) + full_bias
        attn = jax.nn.softmax(scores, axis=-1)
        ctx = jnp.einsum("bhqk,bhkd->bhqd", attn, v)
        ctx = ctx.transpose(0, 2, 1, 3).reshape(B, S, inner)
        return x + ctx @ params["wo"].T

    ref = reference(hidden)
    assert out.shape == (B, S, Dm) and out.dtype == jnp.float32
    assert pos_bias.shape == (1, H, S, S)
    max_err = float(jnp.max(jnp.abs(out - ref)))
    assert max_err < 5e-2, f"max abs error {max_err}"
    print("KERNEL_OK")
</pallas_src>

<mosaic_0001>
module attributes {stable_mosaic.version = 11 : i64} {
  func.func @_t5_self_attn_kernel(%arg0: i32, %arg1: memref<1x128x256xf32, #tpu.memory_space<vmem>>, %arg2: memref<1x256xf32, #tpu.memory_space<vmem>>, %arg3: memref<256x256xbf16, #tpu.memory_space<vmem>>, %arg4: memref<256x256xbf16, #tpu.memory_space<vmem>>, %arg5: memref<256x256xbf16, #tpu.memory_space<vmem>>, %arg6: memref<256x256xbf16, #tpu.memory_space<vmem>>, %arg7: memref<4x128x128xf32, #tpu.memory_space<vmem>>, %arg8: memref<1x128x1xi32, #tpu.memory_space<vmem>>, %arg9: memref<1x1x128xi32, #tpu.memory_space<vmem>>, %arg10: memref<1x128x256xf32, #tpu.memory_space<vmem>>, %arg11: memref<128x256xbf16, #tpu.memory_space<vmem>>, %arg12: memref<128x256xbf16, #tpu.memory_space<vmem>>, %arg13: memref<128x256xbf16, #tpu.memory_space<vmem>>, %arg14: memref<128x256xbf16, #tpu.memory_space<vmem>>) attributes {dimension_semantics = [#tpu.dimension_semantics<parallel>], iteration_bounds = array<i64: 2>, scalar_prefetch = 0 : i64, scratch_operands = 4 : i64, tpu.core_type = #tpu.core_type<tc>, window_params = [{transform_indices = @transform_0, window_bounds = array<i64: 1, 128, 256>}, {pipeline_mode = #tpu.pipeline_mode<synchronous>, transform_indices = @transform_1, window_bounds = array<i64: 1, 256>}, {pipeline_mode = #tpu.pipeline_mode<synchronous>, transform_indices = @transform_2, window_bounds = array<i64: 256, 256>}, {pipeline_mode = #tpu.pipeline_mode<synchronous>, transform_indices = @transform_3, window_bounds = array<i64: 256, 256>}, {pipeline_mode = #tpu.pipeline_mode<synchronous>, transform_indices = @transform_4, window_bounds = array<i64: 256, 256>}, {pipeline_mode = #tpu.pipeline_mode<synchronous>, transform_indices = @transform_5, window_bounds = array<i64: 256, 256>}, {pipeline_mode = #tpu.pipeline_mode<synchronous>, transform_indices = @transform_6, window_bounds = array<i64: 4, 128, 128>}, {transform_indices = @transform_7, window_bounds = array<i64: 1, 128, 1>}, {transform_indices = @transform_8, window_bounds = array<i64: 1, 1, 128>}, {transform_indices = @transform_9, window_bounds = array<i64: 1, 128, 256>}]} {
    %c0 = arith.constant 0 : index
    %c0_0 = arith.constant 0 : index
    %c0_1 = arith.constant 0 : index
    %0 = vector.load %arg1[%c0, %c0_0, %c0_1] : memref<1x128x256xf32, #tpu.memory_space<vmem>>, vector<1x128x256xf32>
    %1 = vector.shape_cast %0 : vector<1x128x256xf32> to vector<128x256xf32>
    %2 = arith.mulf %1, %1 : vector<128x256xf32>
    %cst = arith.constant dense<0.000000e+00> : vector<128xf32>
    %3 = vector.multi_reduction <add>, %2, %cst [1] : vector<128x256xf32> to vector<128xf32>
    %4 = vector.shape_cast %3 : vector<128xf32> to vector<128x1xf32>
    %cst_2 = arith.constant 2.560000e+02 : f32
    %5 = vector.broadcast %cst_2 : f32 to vector<128x1xf32>
    %6 = arith.divf %4, %5 : vector<128x1xf32>
    %cst_3 = arith.constant 9.99999997E-7 : f32
    %7 = vector.broadcast %cst_3 : f32 to vector<128x1xf32>
    %8 = arith.addf %6, %7 : vector<128x1xf32>
    %9 = math.rsqrt %8 : vector<128x1xf32>
    %10 = vector.broadcast %9 : vector<128x1xf32> to vector<128x256xf32>
    %11 = arith.mulf %1, %10 : vector<128x256xf32>
    %c0_4 = arith.constant 0 : index
    %c0_5 = arith.constant 0 : index
    %12 = vector.load %arg2[%c0_4, %c0_5] : memref<1x256xf32, #tpu.memory_space<vmem>>, vector<1x256xf32>
    %13 = vector.broadcast %12 : vector<1x256xf32> to vector<128x256xf32>
    %14 = arith.mulf %11, %13 : vector<128x256xf32>
    %15 = arith.truncf %14 : vector<128x256xf32> to vector<128x256xbf16>
    %c0_6 = arith.constant 0 : index
    %c0_7 = arith.constant 0 : index
    %16 = vector.load %arg3[%c0_6, %c0_7] : memref<256x256xbf16, #tpu.memory_space<vmem>>, vector<256x256xbf16>
    %cst_8 = arith.constant dense<0.000000e+00> : vector<128x256xf32>
    %17 = tpu.matmul %15, %16, %cst_8 {dimension_numbers = #tpu.dot_dimension_numbers<[1], [0], [0], [1], [0, 0, 1, 1], [], []>} : vector<128x256xbf16>, vector<256x256xbf16>, vector<128x256xf32> -> vector<128x256xf32>
    %18 = arith.truncf %17 : vector<128x256xf32> to vector<128x256xbf16>
    %c0_9 = arith.constant 0 : index
    %c0_10 = arith.constant 0 : index
    %19 = vector.load %arg11[%c0_9, %c0_10] : memref<128x256xbf16, #tpu.memory_space<vmem>>, vector<128x256xbf16>
    tpu.vector_store %arg11[%c0_9, %c0_10], %18 {strides = array<i32>} : memref<128x256xbf16, #tpu.memory_space<vmem>>, vector<128x256xbf16>,
    %c0_11 = arith.constant 0 : index
    %c0_12 = arith.constant 0 : index
    %20 = vector.load %arg4[%c0_11, %c0_12] : memref<256x256xbf16, #tpu.memory_space<vmem>>, vector<256x256xbf16>
    %cst_13 = arith.constant dense<0.000000e+00> : vector<128x256xf32>
    %21 = tpu.matmul %15, %20, %cst_13 {dimension_numbers = #tpu.dot_dimension_numbers<[1], [0], [0], [1], [0, 0, 1, 1], [], []>} : vector<128x256xbf16>, vector<256x256xbf16>, vector<128x256xf32> -> vector<128x256xf32>
    %22 = arith.truncf %21 : vector<128x256xf32> to vector<128x256xbf16>
    %c0_14 = arith.constant 0 : index
    %c0_15 = arith.constant 0 : index
    %23 = vector.load %arg12[%c0_14, %c0_15] : memref<128x256xbf16, #tpu.memory_space<vmem>>, vector<128x256xbf16>
    tpu.vector_store %arg12[%c0_14, %c0_15], %22 {strides = array<i32>} : memref<128x256xbf16, #tpu.memory_space<vmem>>, vector<128x256xbf16>,
    %c0_16 = arith.constant 0 : index
    %c0_17 = arith.constant 0 : index
    %24 = vector.load %arg5[%c0_16, %c0_17] : memref<256x256xbf16, #tpu.memory_space<vmem>>, vector<256x256xbf16>
    %cst_18 = arith.constant dense<0.000000e+00> : vector<128x256xf32>
    %25 = tpu.matmul %15, %24, %cst_18 {dimension_numbers = #tpu.dot_dimension_numbers<[1], [0], [0], [1], [0, 0, 1, 1], [], []>} : vector<128x256xbf16>, vector<256x256xbf16>, vector<128x256xf32> -> vector<128x256xf32>
    %26 = arith.truncf %25 : vector<128x256xf32> to vector<128x256xbf16>
    %c0_19 = arith.constant 0 : index
    %c0_20 = arith.constant 0 : index
    %27 = vector.load %arg13[%c0_19, %c0_20] : memref<128x256xbf16, #tpu.memory_space<vmem>>, vector<128x256xbf16>
    tpu.vector_store %arg13[%c0_19, %c0_20], %26 {strides = array<i32>} : memref<128x256xbf16, #tpu.memory_space<vmem>>, vector<128x256xbf16>,
    %c0_21 = arith.constant 0 : index
    %c0_22 = arith.constant 0 : index
    %c0_23 = arith.constant 0 : index
    %28 = vector.load %arg8[%c0_21, %c0_22, %c0_23] : memref<1x128x1xi32, #tpu.memory_space<vmem>>, vector<1x128x1xi32>
    %29 = vector.shape_cast %28 : vector<1x128x1xi32> to vector<128x1xi32>
    %c0_24 = arith.constant 0 : index
    %c0_25 = arith.constant 0 : index
    %c0_26 = arith.constant 0 : index
    %30 = vector.load %arg9[%c0_24, %c0_25, %c0_26] : memref<1x1x128xi32, #tpu.memory_space<vmem>>, vector<1x1x128xi32>
    %31 = vector.shape_cast %30 : vector<1x1x128xi32> to vector<1x128xi32>
    %32 = vector.broadcast %29 : vector<128x1xi32> to vector<128x128xi32>
    %33 = vector.broadcast %31 : vector<1x128xi32> to vector<128x128xi32>
    %34 = arith.cmpi eq, %32, %33 : vector<128x128xi32>
    %cst_27 = arith.constant 0.000000e+00 : f32
    %cst_28 = arith.constant -1.000000e+30 : f32
    %35 = vector.broadcast %cst_27 : f32 to vector<128x128xf32>
    %36 = vector.broadcast %cst_28 : f32 to vector<128x128xf32>
    %37 = arith.select %34, %35, %36 : vector<128x128xi1>, vector<128x128xf32>
    %c0_29 = arith.constant 0 : index
    %c0_30 = arith.constant 0 : index
    %38 = vector.load %arg11[%c0_29, %c0_30] : memref<128x256xbf16, #tpu.memory_space<vmem>>, vector<128x64xbf16>
    %c0_31 = arith.constant 0 : index
    %c0_32 = arith.constant 0 : index
    %39 = vector.load %arg12[%c0_31, %c0_32] : memref<128x256xbf16, #tpu.memory_space<vmem>>, vector<128x64xbf16>
    %c0_33 = arith.constant 0 : index
    %c0_34 = arith.constant 0 : index
    %40 = vector.load %arg13[%c0_33, %c0_34] : memref<128x256xbf16, #tpu.memory_space<vmem>>, vector<128x64xbf16>
    %cst_35 = arith.constant dense<0.000000e+00> : vector<128x128xf32>
    %41 = tpu.matmul %38, %39, %cst_35 {dimension_numbers = #tpu.dot_dimension_numbers<[1], [1], [0], [0], [0, 0, 1, 0], [], []>} : vector<128x64xbf16>, vector<128x64xbf16>, vector<128x128xf32> -> vector<128x128xf32>
    %c0_36 = arith.constant 0 : index
    %c0_37 = arith.constant 0 : index
    %c0_38 = arith.constant 0 : index
    %42 = vector.load %arg7[%c0_36, %c0_37, %c0_38] : memref<4x128x128xf32, #tpu.memory_space<vmem>>, vector<1x128x128xf32>
    %43 = vector.shape_cast %42 : vector<1x128x128xf32> to vector<128x128xf32>
    %44 = arith.addf %41, %43 : vector<128x128xf32>
    %45 = arith.addf %44, %37 : vector<128x128xf32>
    %cst_39 = arith.constant dense<0xFF800000> : vector<128xf32>
    %46 = vector.multi_reduction <maximumf>, %45, %cst_39 [1] : vector<128x128xf32> to vector<128xf32>
    %47 = vector.shape_cast %46 : vector<128xf32> to vector<128x1xf32>
    %48 = vector.broadcast %47 : vector<128x1xf32> to vector<128x128xf32>
    %49 = arith.subf %45, %48 : vector<128x128xf32>
    %50 = math.exp %49 : vector<128x128xf32>
    %cst_40 = arith.constant dense<0.000000e+00> : vector<128xf32>
    %51 = vector.multi_reduction <add>, %50, %cst_40 [1] : vector<128x128xf32> to vector<128xf32>
    %52 = vector.shape_cast %51 : vector<128xf32> to vector<128x1xf32>
    %53 = arith.truncf %50 : vector<128x128xf32> to vector<128x128xbf16>
    %cst_41 = arith.constant dense<0.000000e+00> : vector<128x64xf32>
    %54 = tpu.matmul %53, %40, %cst_41 {dimension_numbers = #tpu.dot_dimension_numbers<[1], [0], [0], [1], [0, 0, 1, 1], [], []>} : vector<128x128xbf16>, vector<128x64xbf16>, vector<128x64xf32> -> vector<128x64xf32>
    %55 = tpu.reciprocal %52 {approx = true} : vector<128x1xf32> -> vector<128x1xf32>
    %56 = vector.broadcast %55 : vector<128x1xf32> to vector<128x64xf32>
    %57 = arith.mulf %54, %56 : vector<128x64xf32>
    %58 = arith.truncf %57 : vector<128x64xf32> to vector<128x64xbf16>
    %c0_42 = arith.constant 0 : index
    %c0_43 = arith.constant 0 : index
    %59 = vector.load %arg14[%c0_42, %c0_43] : memref<128x256xbf16, #tpu.memory_space<vmem>>, vector<128x64xbf16>
    tpu.vector_store %arg14[%c0_42, %c0_43], %58 {strides = array<i32>} : memref<128x256xbf16, #tpu.memory_space<vmem>>, vector<128x64xbf16>,
    %c0_44 = arith.constant 0 : index
    %c64 = arith.constant 64 : index
    %60 = vector.load %arg11[%c0_44, %c64] : memref<128x256xbf16, #tpu.memory_space<vmem>>, vector<128x64xbf16>
    %c0_45 = arith.constant 0 : index
    %c64_46 = arith.constant 64 : index
    %61 = vector.load %arg12[%c0_45, %c64_46] : memref<128x256xbf16, #tpu.memory_space<vmem>>, vector<128x64xbf16>
    %c0_47 = arith.constant 0 : index
    %c64_48 = arith.constant 64 : index
    %62 = vector.load %arg13[%c0_47, %c64_48] : memref<128x256xbf16, #tpu.memory_space<vmem>>, vector<128x64xbf16>
    %cst_49 = arith.constant dense<0.000000e+00> : vector<128x128xf32>
    %63 = tpu.matmul %60, %61, %cst_49 {dimension_numbers = #tpu.dot_dimension_numbers<[1], [1], [0], [0], [0, 0, 1, 0], [], []>} : vector<128x64xbf16>, vector<128x64xbf16>, vector<128x128xf32> -> vector<128x128xf32>
    %c1 = arith.constant 1 : index
    %c0_50 = arith.constant 0 : index
    %c0_51 = arith.constant 0 : index
    %64 = vector.load %arg7[%c1, %c0_50, %c0_51] : memref<4x128x128xf32, #tpu.memory_space<vmem>>, vector<1x128x128xf32>
    %65 = vector.shape_cast %64 : vector<1x128x128xf32> to vector<128x128xf32>
    %66 = arith.addf %63, %65 : vector<128x128xf32>
    %67 = arith.addf %66, %37 : vector<128x128xf32>
    %cst_52 = arith.constant dense<0xFF800000> : vector<128xf32>
    %68 = vector.multi_reduction <maximumf>, %67, %cst_52 [1] : vector<128x128xf32> to vector<128xf32>
    %69 = vector.shape_cast %68 : vector<128xf32> to vector<128x1xf32>
    %70 = vector.broadcast %69 : vector<128x1xf32> to vector<128x128xf32>
    %71 = arith.subf %67, %70 : vector<128x128xf32>
    %72 = math.exp %71 : vector<128x128xf32>
    %cst_53 = arith.constant dense<0.000000e+00> : vector<128xf32>
    %73 = vector.multi_reduction <add>, %72, %cst_53 [1] : vector<128x128xf32> to vector<128xf32>
    %74 = vector.shape_cast %73 : vector<128xf32> to vector<128x1xf32>
    %75 = arith.truncf %72 : vector<128x128xf32> to vector<128x128xbf16>
    %cst_54 = arith.constant dense<0.000000e+00> : vector<128x64xf32>
    %76 = tpu.matmul %75, %62, %cst_54 {dimension_numbers = #tpu.dot_dimension_numbers<[1], [0], [0], [1], [0, 0, 1, 1], [], []>} : vector<128x128xbf16>, vector<128x64xbf16>, vector<128x64xf32> -> vector<128x64xf32>
    %77 = tpu.reciprocal %74 {approx = true} : vector<128x1xf32> -> vector<128x1xf32>
    %78 = vector.broadcast %77 : vector<128x1xf32> to vector<128x64xf32>
    %79 = arith.mulf %76, %78 : vector<128x64xf32>
    %80 = arith.truncf %79 : vector<128x64xf32> to vector<128x64xbf16>
    %c0_55 = arith.constant 0 : index
    %c64_56 = arith.constant 64 : index
    %81 = vector.load %arg14[%c0_55, %c64_56] : memref<128x256xbf16, #tpu.memory_space<vmem>>, vector<128x64xbf16>
    tpu.vector_store %arg14[%c0_55, %c64_56], %80 {strides = array<i32>} : memref<128x256xbf16, #tpu.memory_space<vmem>>, vector<128x64xbf16>,
    %c0_57 = arith.constant 0 : index
    %c128 = arith.constant 128 : index
    %82 = vector.load %arg11[%c0_57, %c128] : memref<128x256xbf16, #tpu.memory_space<vmem>>, vector<128x64xbf16>
    %c0_58 = arith.constant 0 : index
    %c128_59 = arith.constant 128 : index
    %83 = vector.load %arg12[%c0_58, %c128_59] : memref<128x256xbf16, #tpu.memory_space<vmem>>, vector<128x64xbf16>
    %c0_60 = arith.constant 0 : index
    %c128_61 = arith.constant 128 : index
    %84 = vector.load %arg13[%c0_60, %c128_61] : memref<128x256xbf16, #tpu.memory_space<vmem>>, vector<128x64xbf16>
    %cst_62 = arith.constant dense<0.000000e+00> : vector<128x128xf32>
    %85 = tpu.matmul %82, %83, %cst_62 {dimension_numbers = #tpu.dot_dimension_numbers<[1], [1], [0], [0], [0, 0, 1, 0], [], []>} : vector<128x64xbf16>, vector<128x64xbf16>, vector<128x128xf32> -> vector<128x128xf32>
    %c2 = arith.constant 2 : index
    %c0_63 = arith.constant 0 : index
    %c0_64 = arith.constant 0 : index
    %86 = vector.load %arg7[%c2, %c0_63, %c0_64] : memref<4x128x128xf32, #tpu.memory_space<vmem>>, vector<1x128x128xf32>
    %87 = vector.shape_cast %86 : vector<1x128x128xf32> to vector<128x128xf32>
    %88 = arith.addf %85, %87 : vector<128x128xf32>
    %89 = arith.addf %88, %37 : vector<128x128xf32>
    %cst_65 = arith.constant dense<0xFF800000> : vector<128xf32>
    %90 = vector.multi_reduction <maximumf>, %89, %cst_65 [1] : vector<128x128xf32> to vector<128xf32>
    %91 = vector.shape_cast %90 : vector<128xf32> to vector<128x1xf32>
    %92 = vector.broadcast %91 : vector<128x1xf32> to vector<128x128xf32>
    %93 = arith.subf %89, %92 : vector<128x128xf32>
    %94 = math.exp %93 : vector<128x128xf32>
    %cst_66 = arith.constant dense<0.000000e+00> : vector<128xf32>
    %95 = vector.multi_reduction <add>, %94, %cst_66 [1] : vector<128x128xf32> to vector<128xf32>
    %96 = vector.shape_cast %95 : vector<128xf32> to vector<128x1xf32>
    %97 = arith.truncf %94 : vector<128x128xf32> to vector<128x128xbf16>
    %cst_67 = arith.constant dense<0.000000e+00> : vector<128x64xf32>
    %98 = tpu.matmul %97, %84, %cst_67 {dimension_numbers = #tpu.dot_dimension_numbers<[1], [0], [0], [1], [0, 0, 1, 1], [], []>} : vector<128x128xbf16>, vector<128x64xbf16>, vector<128x64xf32> -> vector<128x64xf32>
    %99 = tpu.reciprocal %96 {approx = true} : vector<128x1xf32> -> vector<128x1xf32>
    %100 = vector.broadcast %99 : vector<128x1xf32> to vector<128x64xf32>
    %101 = arith.mulf %98, %100 : vector<128x64xf32>
    %102 = arith.truncf %101 : vector<128x64xf32> to vector<128x64xbf16>
    %c0_68 = arith.constant 0 : index
    %c128_69 = arith.constant 128 : index
    %103 = vector.load %arg14[%c0_68, %c128_69] : memref<128x256xbf16, #tpu.memory_space<vmem>>, vector<128x64xbf16>
    tpu.vector_store %arg14[%c0_68, %c128_69], %102 {strides = array<i32>} : memref<128x256xbf16, #tpu.memory_space<vmem>>, vector<128x64xbf16>,
    %c0_70 = arith.constant 0 : index
    %c192 = arith.constant 192 : index
    %104 = vector.load %arg11[%c0_70, %c192] : memref<128x256xbf16, #tpu.memory_space<vmem>>, vector<128x64xbf16>
    %c0_71 = arith.constant 0 : index
    %c192_72 = arith.constant 192 : index
    %105 = vector.load %arg12[%c0_71, %c192_72] : memref<128x256xbf16, #tpu.memory_space<vmem>>, vector<128x64xbf16>
    %c0_73 = arith.constant 0 : index
    %c192_74 = arith.constant 192 : index
    %106 = vector.load %arg13[%c0_73, %c192_74] : memref<128x256xbf16, #tpu.memory_space<vmem>>, vector<128x64xbf16>
    %cst_75 = arith.constant dense<0.000000e+00> : vector<128x128xf32>
    %107 = tpu.matmul %104, %105, %cst_75 {dimension_numbers = #tpu.dot_dimension_numbers<[1], [1], [0], [0], [0, 0, 1, 0], [], []>} : vector<128x64xbf16>, vector<128x64xbf16>, vector<128x128xf32> -> vector<128x128xf32>
    %c3 = arith.constant 3 : index
    %c0_76 = arith.constant 0 : index
    %c0_77 = arith.constant 0 : index
    %108 = vector.load %arg7[%c3, %c0_76, %c0_77] : memref<4x128x128xf32, #tpu.memory_space<vmem>>, vector<1x128x128xf32>
    %109 = vector.shape_cast %108 : vector<1x128x128xf32> to vector<128x128xf32>
    %110 = arith.addf %107, %109 : vector<128x128xf32>
    %111 = arith.addf %110, %37 : vector<128x128xf32>
    %cst_78 = arith.constant dense<0xFF800000> : vector<128xf32>
    %112 = vector.multi_reduction <maximumf>, %111, %cst_78 [1] : vector<128x128xf32> to vector<128xf32>
    %113 = vector.shape_cast %112 : vector<128xf32> to vector<128x1xf32>
    %114 = vector.broadcast %113 : vector<128x1xf32> to vector<128x128xf32>
    %115 = arith.subf %111, %114 : vector<128x128xf32>
    %116 = math.exp %115 : vector<128x128xf32>
    %cst_79 = arith.constant dense<0.000000e+00> : vector<128xf32>
    %117 = vector.multi_reduction <add>, %116, %cst_79 [1] : vector<128x128xf32> to vector<128xf32>
    %118 = vector.shape_cast %117 : vector<128xf32> to vector<128x1xf32>
    %119 = arith.truncf %116 : vector<128x128xf32> to vector<128x128xbf16>
    %cst_80 = arith.constant dense<0.000000e+00> : vector<128x64xf32>
    %120 = tpu.matmul %119, %106, %cst_80 {dimension_numbers = #tpu.dot_dimension_numbers<[1], [0], [0], [1], [0, 0, 1, 1], [], []>} : vector<128x128xbf16>, vector<128x64xbf16>, vector<128x64xf32> -> vector<128x64xf32>
    %121 = tpu.reciprocal %118 {approx = true} : vector<128x1xf32> -> vector<128x1xf32>
    %122 = vector.broadcast %121 : vector<128x1xf32> to vector<128x64xf32>
    %123 = arith.mulf %120, %122 : vector<128x64xf32>
    %124 = arith.truncf %123 : vector<128x64xf32> to vector<128x64xbf16>
    %c0_81 = arith.constant 0 : index
    %c192_82 = arith.constant 192 : index
    %125 = vector.load %arg14[%c0_81, %c192_82] : memref<128x256xbf16, #tpu.memory_space<vmem>>, vector<128x64xbf16>
    tpu.vector_store %arg14[%c0_81, %c192_82], %124 {strides = array<i32>} : memref<128x256xbf16, #tpu.memory_space<vmem>>, vector<128x64xbf16>,
    %c0_83 = arith.constant 0 : index
    %c0_84 = arith.constant 0 : index
    %126 = vector.load %arg14[%c0_83, %c0_84] : memref<128x256xbf16, #tpu.memory_space<vmem>>, vector<128x256xbf16>
    %c0_85 = arith.constant 0 : index
    %c0_86 = arith.constant 0 : index
    %127 = vector.load %arg6[%c0_85, %c0_86] : memref<256x256xbf16, #tpu.memory_space<vmem>>, vector<256x256xbf16>
    %cst_87 = arith.constant dense<0.000000e+00> : vector<128x256xf32>
    %128 = tpu.matmul %126, %127, %cst_87 {dimension_numbers = #tpu.dot_dimension_numbers<[1], [0], [0], [1], [0, 0, 1, 1], [], []>} : vector<128x256xbf16>, vector<256x256xbf16>, vector<128x256xf32> -> vector<128x256xf32>
    %c0_88 = arith.constant 0 : index
    %c0_89 = arith.constant 0 : index
    %c0_90 = arith.constant 0 : index
    %129 = vector.load %arg1[%c0_88, %c0_89, %c0_90] : memref<1x128x256xf32, #tpu.memory_space<vmem>>, vector<1x128x256xf32>
    %130 = vector.shape_cast %129 : vector<1x128x256xf32> to vector<128x256xf32>
    %131 = arith.addf %130, %128 : vector<128x256xf32>
    %c0_91 = arith.constant 0 : index
    %c0_92 = arith.constant 0 : index
    %c0_93 = arith.constant 0 : index
    %132 = vector.load %arg10[%c0_91, %c0_92, %c0_93] : memref<1x128x256xf32, #tpu.memory_space<vmem>>, vector<1x128x256xf32>
    %133 = vector.shape_cast %132 : vector<1x128x256xf32> to vector<128x256xf32>
    %134 = vector.shape_cast %131 : vector<128x256xf32> to vector<1x128x256xf32>
    tpu.vector_store %arg10[%c0_91, %c0_92, %c0_93], %134 {strides = array<i32>} : memref<1x128x256xf32, #tpu.memory_space<vmem>>, vector<1x128x256xf32>,
    return
  }
  func.func @transform_0(%arg0: i32) -> (i32, i32, i32) {
    %c0_i32 = arith.constant 0 : i32
    %c0_i32_0 = arith.constant 0 : i32
    %c0_i32_1 = arith.constant 0 : i32
    return %arg0, %c0_i32, %c0_i32_0 : i32, i32, i32
  }
  func.func @transform_1(%arg0: i32) -> (i32, i32) {
    %c0_i32 = arith.constant 0 : i32
    %c0_i32_0 = arith.constant 0 : i32
    %c0_i32_1 = arith.constant 0 : i32
    return %c0_i32, %c0_i32_0 : i32, i32
  }
  func.func @transform_2(%arg0: i32) -> (i32, i32) {
    %c0_i32 = arith.constant 0 : i32
    %c0_i32_0 = arith.constant 0 : i32
    %c0_i32_1 = arith.constant 0 : i32
    return %c0_i32, %c0_i32_0 : i32, i32
  }
  func.func @transform_3(%arg0: i32) -> (i32, i32) {
    %c0_i32 = arith.constant 0 : i32
    %c0_i32_0 = arith.constant 0 : i32
    %c0_i32_1 = arith.constant 0 : i32
    return %c0_i32, %c0_i32_0 : i32, i32
  }
  func.func @transform_4(%arg0: i32) -> (i32, i32) {
    %c0_i32 = arith.constant 0 : i32
    %c0_i32_0 = arith.constant 0 : i32
    %c0_i32_1 = arith.constant 0 : i32
    return %c0_i32, %c0_i32_0 : i32, i32
  }
  func.func @transform_5(%arg0: i32) -> (i32, i32) {
    %c0_i32 = arith.constant 0 : i32
    %c0_i32_0 = arith.constant 0 : i32
    %c0_i32_1 = arith.constant 0 : i32
    return %c0_i32, %c0_i32_0 : i32, i32
  }
  func.func @transform_6(%arg0: i32) -> (i32, i32, i32) {
    %c0_i32 = arith.constant 0 : i32
    %c0_i32_0 = arith.constant 0 : i32
    %c0_i32_1 = arith.constant 0 : i32
    %c0_i32_2 = arith.constant 0 : i32
    return %c0_i32, %c0_i32_0, %c0_i32_1 : i32, i32, i32
  }
  func.func @transform_7(%arg0: i32) -> (i32, i32, i32) {
    %c0_i32 = arith.constant 0 : i32
    %c0_i32_0 = arith.constant 0 : i32
    %c0_i32_1 = arith.constant 0 : i32
    return %arg0, %c0_i32, %c0_i32_0 : i32, i32, i32
  }
  func.func @transform_8(%arg0: i32) -> (i32, i32, i32) {
    %c0_i32 = arith.constant 0 : i32
    %c0_i32_0 = arith.constant 0 : i32
    %c0_i32_1 = arith.constant 0 : i32
    return %arg0, %c0_i32, %c0_i32_0 : i32, i32, i32
  }
  func.func @transform_9(%arg0: i32) -> (i32, i32, i32) {
    %c0_i32 = arith.constant 0 : i32
    %c0_i32_0 = arith.constant 0 : i32
    %c0_i32_1 = arith.constant 0 : i32
    return %arg0, %c0_i32, %c0_i32_0 : i32, i32, i32
  }
}

</mosaic_0001>

<bundles_post_ra>
// kernel: tpu_custom_call.1
= control target key start
LH: loop header
LB: loop body
LE: loop exit
PB: predicated region body
PF: predicated region fallthrough
CT: control target
= control target key end

     0   :  { %s9257_s0 = inlined_call_operand.hbm [shape: f32[2,128,256], index: 0, kind: input, shape index: {}]   ;;  %s9258_s1 = inlined_call_operand.vmem [shape: f32[1,256], index: 1, kind: input, shape index: {}]   ;;  %s9259_s2 = inlined_call_operand.vmem [shape: bf16[256,256], index: 2, kind: input, shape index: {}]   ;;  %s9260_s3 = inlined_call_operand.hbm [shape: bf16[256,256], index: 3, kind: input, shape index: {}]   ;;  %s9261_s4 = inlined_call_operand.hbm [shape: bf16[256,256], index: 4, kind: input, shape index: {}]   ;;  %s9262_s5 = inlined_call_operand.hbm [shape: bf16[256,256], index: 5, kind: input, shape index: {}]   ;;  %s9263_s6 = inlined_call_operand.hbm [shape: f32[4,128,128], index: 6, kind: input, shape index: {}]   ;;  %s9264_s7 = inlined_call_operand.vmem [shape: s32[2,128,1], index: 7, kind: input, shape index: {}]   ;;  %s9265_s8 = inlined_call_operand.vmem [shape: s32[2,1,128], index: 8, kind: input, shape index: {}]   ;;  %s9266_s9 = inlined_call_operand.hbm [shape: f32[2,128,256], index: 9, kind: output, shape index: {}]  }
   0x1   :  { %9292 = sst [smem:[#allocation49_spill]] %s9260_s3 }
   0x2   :  { %9293 = sst [smem:[#allocation50_spill]] %s9261_s4 }
   0x3   :  { %9294 = sst [smem:[#allocation51_spill]] %s9262_s5 }
   0x4   :  { %14 = vsyncpa [#allocation7], 0 }
   0x5   :  { %16 = vsyncpa [#allocation7 + $0x1], 0 }
   0x6   :  { %17 = vsyncpa [#allocation10], 0 }
   0x7   :  { %18 = vsyncpa [#allocation13], 0 }
   0x8   :  { %19 = vsyncpa [#allocation8], 0 }
   0x9   :  { %21 = vsyncpa [#allocation8 + $0x1], 0  ;;  %s7492_s30 = smov 0   ;;  %s7494_s10 = smov 0  }
   0xa   :  { %s7496_s11 = smov 0   ;;  %s7498_s12 = smov 0  }
   0xb LB: > { %s7513_s13 = sadd.s32 4294967295, %s7425_s12   ;;  %s5586_s14 = sadd.s32 4294967294, %s7425_s12   ;;  %s7425_s12 = sphi %s7498_s12, %s9390_s12   ;;  %s7421_s11 = sphi %s7496_s11, %s9389_s11   ;;  %s7417_s10 = sphi %s7494_s10, %s9388_s10   ;;  %s7413_s30 = sphi %s7492_s30, %s9387_s30  }
   0xc   : > { %p47_p0 = scmp.ne.s32.totalorder %s7417_s10, %s7413_s30  ;;  %p9267_p1 = scmp.eq.s32.totalorder %s7513_s13, 0 }
   0xd   : > { %p249_p2 = scmp.eq.s32.totalorder %s7513_s13, 1  ;;  %p255_p3 = scmp.eq.s32.totalorder %s5586_s14, 1 }
   0xe   : > { %p7522_p4 = por %p9267_p1, %p47_p0  ;;  %p5587_p5 = scmp.ge.s32.totalorder %s7425_s12, 1 }
   0xf   : > { %p7527_p6 = por %p255_p3, %p47_p0  ;;  %p262_p7 = scmp.lt.s32.totalorder %s7425_s12, 3 }
  0x10   : > { %s9295_s15 = scalar_select %p7522_p4, 1, 0 }
  0x11   : > { %s9296_s16 = scalar_select %p7527_p6, 1, 0 }
  0x12   : > { %p7532_p8 = pnand %p5587_p5, %p262_p7  ;;  %s7427_s18 = smov [#allocation9]  }
  0x13   : > { %s280_s19 = sshll.u32 %s7427_s18, 4  ;;  %s7428_s21 = smov [#allocation12]   ;;  %s281_s19 = int_to_ptr.vmem [resolvable:$true] %s280_s19 }
  0x14   : > { %s9297_s17 = scalar_select %p7532_p8, 1, 0 }
  0x15   : > { %p6546_p9 = pneg %p7532_p8  ;;  %s306_s22 = sshll.u32 %s7428_s21, 4  ;;  %s307_s22 = int_to_ptr.vmem [resolvable:$true] %s306_s22 }
  0x16   : > { %s7429_s23 = smov [#allocation11]   ;;  %s7232_s25 = scalar_lea.vmem %s281_s19, 4096 }
  0x17   : > { %p7541_p11 = pnand %p6546_p9, %p9267_p1  ;;  %s293_s24 = sshll.u32 %s7429_s23, 4  ;;  %s294_s24 = int_to_ptr.vmem [resolvable:$true] %s293_s24 }
  0x18   : > { %p7233_p13 = scmp.ne.s32.totalorder %s281_s19, %s7232_s25  ;;  %p7240_p5 = scmp.lt.s32.totalorder %s281_s19, %s281_s19 }
  0x19   : > { %p7223_p12 = pneg %p7541_p11  ;;  %p7241_p7 = scmp.lt.s32.totalorder %s7232_s25, %s7232_s25 }
  0x1b   : > { %p7235_p0 = pnand %p7233_p13, %p7223_p12  ;;  %p7242_p9 = por %p7241_p7, %p7240_p5 }
  0x1d   : > { %p7236_p3 = pneg %p7235_p0 }
  0x1f   : > { %p7243_p10 = pnand %p7242_p9, %p7236_p3 }
  0x21   : > { %7246 = shalt.err (!%p7243_p10)
}
  0x22   : > { %s7430_s26 = smov 128   ;;  %s7431_s27 = smov 8  }
  0x23   : > { %s9299_s3 = sld [smem:[#allocation49_spill]]  ;;  %s7258_s14 = scalar_lea.vmem %s307_s22, 4096 }
  0x24   : > { %p7259_p13 = scmp.ne.s32.totalorder %s307_s22, %s7258_s14  ;;  %p7266_p3 = scmp.lt.s32.totalorder %s307_s22, %s307_s22 }
  0x25   : > { %p7267_p10 = scmp.lt.s32.totalorder %s7258_s14, %s7258_s14 }
  0x26   : > { %p7261_p0 = pnand %p7259_p13, %p7223_p12 }
  0x27   : > { %p7268_p7 = por %p7267_p10, %p7266_p3 }
  0x28   : > { %p7262_p5 = pneg %p7261_p0 }
  0x29   : > { %6549 = dma.hbm_to_vmem [thread:$0]  (!%p7541_p11), %s9299_s3, 4096, %s281_s19, [#allocation10], %s7430_s26, %s7430_s26, %s7431_s27  }
  0x2a   : > { %p7269_p9 = pnand %p7268_p7, %p7262_p5 }
  0x2c   : > { %7272 = shalt.err (!%p7269_p9)
}
  0x2d   : > { %s9300_s5 = sld [smem:[#allocation51_spill]]  ;;  %s7284_s19 = scalar_lea.vmem %s294_s24, 4096 }
  0x2e   : > { %p7285_p1 = scmp.ne.s32.totalorder %s294_s24, %s7284_s19  ;;  %p7292_p3 = scmp.lt.s32.totalorder %s294_s24, %s294_s24 }
  0x2f   : > { %p7293_p5 = scmp.lt.s32.totalorder %s7284_s19, %s7284_s19 }
  0x30   : > { %p7287_p13 = pnand %p7285_p1, %p7223_p12 }
  0x31   : > { %p7294_p10 = por %p7293_p5, %p7292_p3 }
  0x32   : > { %p7288_p0 = pneg %p7287_p13 }
  0x33   : > { %6555 = dma.hbm_to_vmem [thread:$0]  (!%p7541_p11), %s9300_s5, 4096, %s307_s22, [#allocation13], %s7430_s26, %s7430_s26, %s7431_s27  }
  0x34   : > { %p7295_p7 = pnand %p7294_p10, %p7288_p0 }
  0x36   : > { %7298 = shalt.err (!%p7295_p7)
}
  0x37   : > { %s9301_s4 = sld [smem:[#allocation50_spill]]  ;;  %s7432_s22 = smov [#allocation14]  }
  0x38   : > { %s319_s28 = sshll.u32 %s7432_s22, 4  ;;  %s320_s28 = int_to_ptr.vmem [resolvable:$true] %s319_s28 }
  0x39   : > { %s7310_s29 = scalar_lea.vmem %s320_s28, 8192  ;;  %p7318_p0 = scmp.lt.s32.totalorder %s320_s28, %s320_s28 }
  0x3a   : > { %p7311_p1 = scmp.ne.s32.totalorder %s320_s28, %s7310_s29  ;;  %p7319_p3 = scmp.lt.s32.totalorder %s7310_s29, %s7310_s29 }
  0x3c   : > { %p7313_p9 = pnand %p7311_p1, %p7223_p12  ;;  %p7320_p5 = por %p7319_p3, %p7318_p0 }
  0x3d   : > { %6552 = dma.hbm_to_vmem [thread:$0]  (!%p7541_p11), %s9301_s4, 4096, %s294_s24, [#allocation10], %s7430_s26, %s7430_s26, %s7431_s27  }
  0x3e   : > { %p7314_p13 = pneg %p7313_p9 }
  0x40   : > { %p7321_p10 = pnand %p7320_p5, %p7314_p13 }
  0x42   : > { %7324 = shalt.err (!%p7321_p10)
}
  0x43   : > { %6558 = dma.hbm_to_vmem [thread:$0]  (!%p7541_p11), %s9263_s6, 8192, %s320_s28, [#allocation13], %s7430_s26, %s7430_s26, %s7431_s27  }
  0x44   : > { %s7592_s18 = sadd.s32 1, %s7425_s12   ;;  %s34_s20 = sadd.s32 1, %s7421_s11 }
  0x45   : > { %s31_s21 = ssub.s32 %s7425_s12, %s7592_s18  ;;  %p41_p12 = scmp.ne.s32.totalorder %s7421_s11, %s7417_s10 }
  0x46   : > { %p32_p7 = scmp.eq.s32.totalorder %s31_s21, 0  ;;  %p42_p1 = scmp.eq.s32.totalorder %s7425_s12, 0 }
  0x47   : > { %p7602_p9 = por %p249_p2, %p41_p12  ;;  %p6571_p13 = scmp.lt.s32.totalorder %s7425_s12, 2 }
  0x48   : > { %s7608_s23 = scalar_select %p32_p7, %s7421_s11, %s34_s20  }
  0x49   : > { %s9302_s19 = scalar_select %p7602_p9, 1, 0 }
  0x4a   : > { %p43_p0 = por %p42_p1, %p41_p12  ;;  %s333_s25 = sand.u32 1, %s7421_s11  }
  0x4b   : > { %s5593_s22 = sshll.u32 %s333_s25, 8  ;;  %s5995_s26 = sshll.u32 %s7425_s12, 12 }
  0x4c   : > { %s7615_s29 = scalar_lea.hbm %s9257_s0, %s5995_s26  ;;  %s337_s24 = scalar_lea.vmem [#allocation6], %s5593_s22 }
  0x4d   : > { %s344_s14 = sshll.u32 %s337_s24, 4  ;;  %p7619_p2 = pnand %p6571_p13, %p43_p0  ;;  %s7617_s14 = int_to_ptr.vmem [resolvable:$true] %s344_s14 }
  0x4e   : > { %s7623_s20 = scalar_lea.sflag [#allocation7], %s333_s25  ;;  %s7325_s3 = scalar_lea.hbm %s7615_s29, 4096 }
  0x4f   : > { %p7326_p11 = scmp.ne.s32.totalorder %s7615_s29, %s7325_s3  ;;  %p7327_p3 = pneg %p7619_p2 }
  0x50   : > { %s7330_s22 = scalar_lea.hbm %s9257_s0, 8192  ;;  %p7331_p12 = scmp.lt.s32.totalorder %s7615_s29, %s9257_s0 }
  0x51   : > { %p7328_p5 = pnand %p7327_p3, %p7326_p11  ;;  %p7332_p7 = scmp.lt.s32.totalorder %s7330_s22, %s7325_s3 }
  0x53   : > { %p7329_p10 = pneg %p7328_p5  ;;  %p7333_p1 = por %p7332_p7, %p7331_p12 }
  0x55   : > { %p7334_p13 = pnand %p7333_p1, %p7329_p10 }
  0x57   : > { %7337 = shalt.err (!%p7334_p13)
}
  0x58   : > { %s7338_s25 = scalar_lea.vmem %s7617_s14, 4096  ;;  %s7433_s4 = smov [#allocation6]  }
  0x59   : > { %p7339_p0 = scmp.ne.s32.totalorder %s7617_s14, %s7338_s25  ;;  %s7343_s5 = sshll.u32 %s7433_s4, 4  ;;  %s7344_s5 = int_to_ptr.vmem [resolvable:$false] %s7343_s5 }
  0x5a   : > { %s7345_s26 = scalar_lea.vmem %s7344_s5, 8192  ;;  %p7346_p5 = scmp.lt.s32.totalorder %s7617_s14, %s7344_s5 }
  0x5b   : > { %p7341_p6 = pnand %p7339_p0, %p7327_p3  ;;  %p7347_p9 = scmp.lt.s32.totalorder %s7345_s26, %s7338_s25 }
  0x5d   : > { %p7342_p11 = pneg %p7341_p6  ;;  %p7348_p4 = por %p7347_p9, %p7346_p5 }
  0x5f   : > { %p7349_p8 = pnand %p7348_p4, %p7342_p11 }
  0x61   : > { %7352 = shalt.err (!%p7349_p8)
}
  0x62   : > { %s7434_s3 = smov 256   ;;  %s7435_s27 = smov 16  }
  0x63   : > { %6562 = dma.hbm_to_vmem [thread:$0]  (!%p7619_p2), %s7615_s29, 4096, %s7617_s14, %s7623_s20, %s7434_s3, %s7434_s3, %s7435_s27  }
  0x64   : > { %p9304_p3 = scmp.ne.s32.totalorder %s9297_s17, 0 }
  0x66   : > { %370 = sbr.rel (%p9304_p3) target bundleno = 2357 (0x935), region = 56 }
  0x6b   : > { %s7647_s4 = sand.u32 1, %s7417_s10   ;;  %p9305_p4 = scmp.ne.s32.totalorder %s9295_s15, 0 }
  0x6c   : > { %s5597_s5 = sshll.u32 %s7647_s4, 8  ;;  %s373_s22 = scalar_lea.sflag [#allocation7], %s7647_s4 }
  0x6d   : > { %s7653_s28 = scalar_lea.vmem [#allocation6], %s5597_s5 }
  0x6e   : > { %7396 = dma.done.wait (%p9305_p4), %s373_s22, 4096  }
  0x6f   : > { %7398 = vsyncadd (%p9305_p4), %s373_s22, 4294963200  ;;  %p9306_p6 = scmp.eq.s32.totalorder %s7513_s13, 0 }
  0x71   : > { %7400 = dma.done.wait (%p9306_p6), [#allocation10], 8192   ;;  %p9307_p8 = pmov %p9306_p6 }
  0x72   : > { %p9308_p9 = pmov %p9306_p6 }
  0x73   : > { %7402 = vsyncadd (%p9307_p8), [#allocation10], 4294959104 }
  0x74   : > { %7404 = dma.done.wait (%p9308_p9), [#allocation13], 12288   ;;  %p9309_p2 = pmov %p9306_p6 }
  0x75   : > { %v7668_v0 = vld [vmem:[%s7653_s28] sm:$0xff]  ;;  %v7671_v1 = vld [vmem:[%s7653_s28 + $0x8] sm:$0xff]  ;;  %v7686_v7 = vld [vmem:[%s7653_s28 + $0x10] sm:$0xff]  ;;  %vm2193_vm0 = vcmask 523264   ;;  %s7437_s24 = smov 64   ;;  %p435_p10 = scmp.lt.s32.totalorder %s7513_s13, 1 }
  0x76   : > { %7406 = vsyncadd (%p9309_p2), [#allocation13], 4294955008  ;;  %v7674_v2 = vld [vmem:[%s7653_s28 + $0x20] sm:$0xff]  ;;  %v476_v3 = vmul.f32 %v7668_v0, %v7668_v0  ;;  %v477_v4 = vmul.f32 %v7671_v1, %v7671_v1  ;;  %v7681_v5 = vld [vmem:[%s7653_s28 + $0x28] sm:$0xff]  ;;  %v478_v10 = vmul.f32 %v7686_v7, %v7686_v7  ;;  %s9144_s14 = scalar_lea.vmem [#allocation15], %s5597_s5  ;;  %s6109_s5 = sshll.u32 %s7513_s13, 12 }
  0x77   : > { %v480_v6 = vmul.f32 %v7674_v2, %v7674_v2  ;;  %v7689_v8 = vld [vmem:[%s7653_s28 + $0x18] sm:$0xff]  ;;  %v481_v9 = vmul.f32 %v7681_v5, %v7681_v5  ;;  %v7698_v12 = vld [vmem:[%s7653_s28 + $0x30] sm:$0xff]  ;;  %v7714_v19 = vld [vmem:[%s7653_s28 + $0x40] sm:$0xff]  ;;  %s8067_s25 = scalar_select %p435_p10, %s7513_s13, 1 }
  0x78   : > { %v479_v11 = vmul.f32 %v7689_v8, %v7689_v8  ;;  %v7701_v13 = vld [vmem:[%s7653_s28 + $0x38] sm:$0xff]  ;;  %v7704_v14 = vld [vmem:[%s7653_s28 + $0x50] sm:$0xff]  ;;  %v508_v15 = vadd.f32 %v477_v4, %v476_v3  ;;  %v482_v16 = vmul.f32 %v7698_v12, %v7698_v12  ;;  %v7717_v20 = vld [vmem:[%s7653_s28 + $0x48] sm:$0xff]  ;;  %v484_v23 = vmul.f32 %v7714_v19, %v7714_v19  ;;  %s5454_s21 = sshll.u32 %s9144_s14, 4  ;;  %s5441_s13 = scalar_lea.sflag [#allocation8], %s7647_s4  ;;  %s9212_s21 = int_to_ptr.vmem [resolvable:$true] %s5454_s21 }
  0x79   : > { %v483_v17 = vmul.f32 %v7701_v13, %v7701_v13  ;;  %v7711_v18 = vld [vmem:[%s7653_s28 + $0x58] sm:$0xff]  ;;  %v514_v21 = vadd.f32 %v481_v9, %v480_v6  ;;  %v485_v24 = vmul.f32 %v7717_v20, %v7717_v20  ;;  %v486_v26 = vmul.f32 %v7704_v14, %v7704_v14  ;;  %v7728_v28 = vld [vmem:[%s7653_s28 + $0x60] sm:$0xff]  ;;  %v7731_v29 = vld [vmem:[%s7653_s28 + $0x68] sm:$0xff]  ;;  %s5996_s26 = sshll.u32 %s8067_s25, 7  ;;  %s442_s29 = scalar_lea.vmem %s9265_s8, %s8067_s25 }
  0x7a   : > { %509 = vadd.xlane.f32.xlu0 %v508_v15  ;;  %v511_v22 = vadd.f32 %v479_v11, %v478_v10  ;;  %v487_v27 = vmul.f32 %v7711_v18, %v7711_v18  ;;  %v7734_v30 = vld [vmem:[%s7653_s28 + $0x70] sm:$0xff]  ;;  %v7737_v31 = vld [vmem:[%s7653_s28 + $0x78] sm:$0xff]  ;;  %v488_v33 = vmul.f32 %v7728_v28, %v7728_v28  ;;  %v489_v34 = vmul.f32 %v7731_v29, %v7731_v29  ;;  %v7754_v40 = vld [vmem:[%s7653_s28 + $0x80] sm:$0xff]  ;;  %s8079_s22 = scalar_lea.vmem %s9264_s7, %s5996_s26  ;;  %s9210_s25 = scalar_lea.hbm %s9266_s9, %s6109_s5 }
  0x7b   : > { %515 = vadd.xlane.f32.xlu1 %v514_v21  ;;  %v517_v25 = vadd.f32 %v483_v17, %v482_v16  ;;  %v520_v32 = vadd.f32 %v485_v24, %v484_v23  ;;  %v7744_v35 = vld [vmem:[%s7653_s28 + $0x90] sm:$0xff]  ;;  %v7747_v36 = vld [vmem:[%s7653_s28 + $0x98] sm:$0xff]  ;;  %v490_v38 = vmul.f32 %v7734_v30, %v7734_v30  ;;  %v491_v39 = vmul.f32 %v7737_v31, %v7737_v31  ;;  %v7757_v41 = vld [vmem:[%s7653_s28 + $0x88] sm:$0xff]  ;;  %s7353_s26 = scalar_lea.vmem %s9212_s21, 4096  ;;  %p9384_p7 = scmp.ne.s32.totalorder %s9302_s19, 0 }
  0x7c   : > { %v523_v37 = vadd.f32 %v487_v27, %v486_v26  ;;  %v6624_v42 = vld [vmem:[%s9259_s2 + $0x74] ss:$8 sps:$4 sm:$0xff]   ;;  %v7763_v43 = vld [vmem:[%s7653_s28 + $0xa0] sm:$0xff]  ;;  %v7766_v44 = vld [vmem:[%s7653_s28 + $0xa8] sm:$0xff]  ;;  %v526_v47 = vadd.f32 %v489_v34, %v488_v33  ;;  %v492_v48 = vmul.f32 %v7754_v40, %v7754_v40  ;;  %v493_v49 = vmul.f32 %v7757_v41, %v7757_v41  ;;  %p7354_p12 = scmp.ne.s32.totalorder %s9212_s21, %s7353_s26 }
  0x7d   : > { %v6626_v45 = vld [vmem:[#allocation11 + $0x74] ss:$8 sps:$4 sm:$0xff]   ;;  %v6628_v46 = vld [vmem:[%s9259_s2 + $0x70] ss:$8 sps:$4 sm:$0xff]   ;;  %889 = vmatprep.subr.bf16.mxu1 %v6624_v42  ;;  %v529_v53 = vadd.f32 %v491_v39, %v490_v38  ;;  %v494_v54 = vmul.f32 %v7744_v35, %v7744_v35  ;;  %v495_v55 = vmul.f32 %v7747_v36, %v7747_v36  ;;  %v6630_v56 = vld [vmem:[%s9259_s2 + $0x64] ss:$8 sps:$4 sm:$0xff]   ;;  %v496_v63 = vmul.f32 %v7763_v43, %v7763_v43 }
  0x7e   : > { %512 = vadd.xlane.f32.xlu0 %v511_v22  ;;  %v7776_v50 = vld [vmem:[%s7653_s28 + $0xb0] sm:$0xff]  ;;  %v7779_v51 = vld [vmem:[%s7653_s28 + $0xb8] sm:$0xff]  ;;  %1723 = vmatprep.subr.bf16.mxu0 %v6626_v45  ;;  %v6632_v57 = vld [vmem:[#allocation11 + $0x64] ss:$8 sps:$4 sm:$0xff]   ;;  %v532_v62 = vadd.f32 %v493_v49, %v492_v48  ;;  %v497_v3 = vmul.f32 %v7766_v44, %v7766_v44  ;;  %p7355_p1 = pnand %p7354_p12, %p9384_p7 }
  0x7f   : > { %518 = vadd.xlane.f32.xlu1 %v517_v25  ;;  %v6629_v52 = vld [vmem:[#allocation11 + $0x70] ss:$8 sps:$4 sm:$0xff]   ;;  %890 = vmatpush1.bf16.msra.mxu1 %v6628_v46  ;;  %v6634_v58 = vld [vmem:[%s9259_s2 + $0x60] ss:$8 sps:$4 sm:$0xff]   ;;  %v6636_v61 = vld [vmem:[%s9259_s2 + $0x54] ss:$8 sps:$4 sm:$0xff]   ;;  %v535_v10 = vadd.f32 %v495_v55, %v494_v54  ;;  %v498_v11 = vmul.f32 %v7776_v50, %v7776_v50  ;;  %v499_v15 = vmul.f32 %v7779_v51, %v7779_v51 }
  0x80   : > { %1724 = vmatpush1.bf16.msra.mxu0 %v6629_v52  ;;  %v6635_v59 = vld [vmem:[#allocation11 + $0x60] ss:$8 sps:$4 sm:$0xff]   ;;  %891 = vmatprep.subr.bf16.mxu1 %v6630_v56  ;;  %v7802_v4 = vld [vmem:[%s7653_s28 + $0xd0] sm:$0xff]  ;;  %v7805_v6 = vld [vmem:[%s7653_s28 + $0xd8] sm:$0xff]  ;;  %v538_v24 = vadd.f32 %v497_v3, %v496_v63  ;;  %p7356_p13 = pneg %p7355_p1 }
  0x81   : > { %v7792_v60 = vld [vmem:[%s7653_s28 + $0xc0] sm:$0xff]  ;;  %1725 = vmatprep.subr.bf16.mxu0 %v6632_v57  ;;  %v6638_v9 = vld [vmem:[#allocation11 + $0x54] ss:$8 sps:$4 sm:$0xff]   ;;  %v7812_v16 = vld [vmem:[%s7653_s28 + $0xc8] sm:$0xff]  ;;  %v541_v34 = vadd.f32 %v499_v15, %v498_v11  ;;  %v503_v38 = vmul.f32 %v7805_v6, %v7805_v6 }
  0x82   : > { %521 = vadd.xlane.f32.xlu0 %v520_v32  ;;  %v6640_v17 = vld [vmem:[%s9259_s2 + $0x50] ss:$8 sps:$4 sm:$0xff]   ;;  %v6642_v22 = vld [vmem:[%s9259_s2 + $0x44] ss:$8 sps:$4 sm:$0xff]   ;;  %v500_v25 = vmul.f32 %v7792_v60, %v7792_v60  ;;  %v501_v26 = vmul.f32 %v7812_v16, %v7812_v16  ;;  %v6646_v42 = vld [vmem:[%s9259_s2 + $0x40] ss:$8 sps:$4 sm:$0xff]  }
  0x83   : > { %524 = vadd.xlane.f32.xlu1 %v523_v37  ;;  %892 = vmatpush1.bf16.msra.mxu1 %v6634_v58  ;;  %v6641_v21 = vld [vmem:[#allocation11 + $0x50] ss:$8 sps:$4 sm:$0xff]   ;;  %v6644_v23 = vld [vmem:[#allocation11 + $0x44] ss:$8 sps:$4 sm:$0xff]   ;;  %v502_v37 = vmul.f32 %v7802_v4, %v7802_v4  ;;  %v6647_v45 = vld [vmem:[#allocation11 + $0x40] ss:$8 sps:$4 sm:$0xff]  }
  0x84   : > { %1726 = vmatpush1.bf16.msra.mxu0 %v6635_v59  ;;  %893 = vmatprep.subr.bf16.mxu1 %v6636_v61  ;;  %v7825_v27 = vld [vmem:[%s7653_s28 + $0xf0] sm:$0xff]  ;;  %v7828_v32 = vld [vmem:[%s7653_s28 + $0xf8] sm:$0xff]  ;;  %v7831_v33 = vld [vmem:[%s7653_s28 + $0xe0] sm:$0xff]  ;;  %v544_v48 = vadd.f32 %v501_v26, %v500_v25 }
  0x85   : > { %1727 = vmatprep.subr.bf16.mxu0 %v6638_v9  ;;  %v7838_v39 = vld [vmem:[%s7653_s28 + $0xe8] sm:$0xff]  ;;  %v6648_v46 = vld [vmem:[%s9259_s2 + $0x34] ss:$8 sps:$4 sm:$0xff]   ;;  %v504_v49 = vmul.f32 %v7831_v33, %v7831_v33  ;;  %v506_v54 = vmul.f32 %v7825_v27, %v7825_v27  ;;  %v507_v55 = vmul.f32 %v7828_v32, %v7828_v32  ;;  %v6652_v56 = vld [vmem:[%s9259_s2 + $0x30] ss:$8 sps:$4 sm:$0xff]  }
  0x86   : > { %527 = vadd.xlane.f32.xlu0 %v526_v47  ;;  %v6650_v47 = vld [vmem:[#allocation11 + $0x34] ss:$8 sps:$4 sm:$0xff]   ;;  %v505_v52 = vmul.f32 %v7838_v39, %v7838_v39  ;;  %v6653_v57 = vld [vmem:[#allocation11 + $0x30] ss:$8 sps:$4 sm:$0xff]   ;;  %v6654_v58 = vld [vmem:[%s9259_s2 + $0x24] ss:$8 sps:$4 sm:$0xff]  }
  0x87   : > { %530 = vadd.xlane.f32.xlu1 %v529_v53  ;;  %894 = vmatpush1.bf16.msra.mxu1 %v6640_v17  ;;  %v547_v53 = vadd.f32 %v503_v38, %v502_v37  ;;  %v6656_v59 = vld [vmem:[#allocation11 + $0x24] ss:$8 sps:$4 sm:$0xff]   ;;  %v6658_v63 = vld [vmem:[%s9259_s2 + $0x20] ss:$8 sps:$4 sm:$0xff]   ;;  %v6660_v9 = vld [vmem:[%s9259_s2 + $0x14] ss:$8 sps:$4 sm:$0xff]  }
  0x88   : > { %1728 = vmatpush1.bf16.msra.mxu0 %v6641_v21  ;;  %895 = vmatprep.subr.bf16.mxu1 %v6642_v22  ;;  %v550_v61 = vadd.f32 %v505_v52, %v504_v49  ;;  %v6659_v3 = vld [vmem:[#allocation11 + $0x20] ss:$8 sps:$4 sm:$0xff]   ;;  %v6664_v11 = vld [vmem:[%s9259_s2 + $0x10] ss:$8 sps:$4 sm:$0xff]   ;;  %v6666_v17 = vld [vmem:[%s9259_s2 + $0x4] ss:$8 sps:$4 sm:$0xff]  }
  0x89   : > { %1729 = vmatprep.subr.bf16.mxu0 %v6644_v23  ;;  %v6665_v15 = vld [vmem:[#allocation11 + $0x10] ss:$8 sps:$4 sm:$0xff]   ;;  %v6668_v21 = vld [vmem:[#allocation11 + $0x4] ss:$8 sps:$4 sm:$0xff]   ;;  %v6670_v22 = vld [vmem:[%s9259_s2] ss:$8 sps:$4 sm:$0xff]  }
  0x8a   : > { %533 = vadd.xlane.f32.xlu0 %v532_v62  ;;  %v553_v62 = vadd.f32 %v507_v55, %v506_v54  ;;  %v6671_v23 = vld [vmem:[#allocation11] ss:$8 sps:$4 sm:$0xff]   ;;  %v6674_v25 = vld [vmem:[#allocation11 + $0xf4] ss:$8 sps:$4 sm:$0xff]   ;;  %v6676_v26 = vld [vmem:[%s9259_s2 + $0xf0] ss:$8 sps:$4 sm:$0xff]  }
  0x8b   : > { %536 = vadd.xlane.f32.xlu1 %v535_v10  ;;  %896 = vmatpush1.bf16.msra.mxu1 %v6646_v42  ;;  %v6662_v10 = vld [vmem:[#allocation11 + $0x14] ss:$8 sps:$4 sm:$0xff]   ;;  %v6678_v37 = vld [vmem:[%s9259_s2 + $0xe4] ss:$8 sps:$4 sm:$0xff]   ;;  %v6682_v42 = vld [vmem:[%s9259_s2 + $0xe0] ss:$8 sps:$4 sm:$0xff]  }
  0x8c   : > { %1730 = vmatpush1.bf16.msra.mxu0 %v6647_v45  ;;  %897 = vmatprep.subr.bf16.mxu1 %v6648_v46  ;;  %v6680_v38 = vld [vmem:[#allocation11 + $0xe4] ss:$8 sps:$4 sm:$0xff]   ;;  %v6683_v45 = vld [vmem:[#allocation11 + $0xe0] ss:$8 sps:$4 sm:$0xff]   ;;  %v6684_v46 = vld [vmem:[%s9259_s2 + $0xd4] ss:$8 sps:$4 sm:$0xff]  }
  0x8d   : > { %1731 = vmatprep.subr.bf16.mxu0 %v6650_v47  ;;  %v6686_v47 = vld [vmem:[#allocation11 + $0xd4] ss:$8 sps:$4 sm:$0xff]   ;;  %v6689_v49 = vld [vmem:[#allocation11 + $0xd0] ss:$8 sps:$4 sm:$0xff]   ;;  %v6690_v52 = vld [vmem:[%s9259_s2 + $0xc4] ss:$8 sps:$4 sm:$0xff]  }
  0x8e   : > { %539 = vadd.xlane.f32.xlu0 %v538_v24  ;;  %v6672_v24 = vld [vmem:[%s9259_s2 + $0xf4] ss:$8 sps:$4 sm:$0xff]   ;;  %v6694_v54 = vld [vmem:[%s9259_s2 + $0xc0] ss:$8 sps:$4 sm:$0xff]  }
  0x8f   : > { %542 = vadd.xlane.f32.xlu1 %v541_v34  ;;  %898 = vmatpush1.bf16.msra.mxu1 %v6652_v56  ;;  %v6677_v34 = vld [vmem:[#allocation11 + $0xf0] ss:$8 sps:$4 sm:$0xff]   ;;  %v6695_v55 = vld [vmem:[#allocation11 + $0xc0] ss:$8 sps:$4 sm:$0xff]   ;;  %v6696_v56 = vld [vmem:[%s9259_s2 + $0xb4] ss:$8 sps:$4 sm:$0xff]  }
  0x90   : > { %1732 = vmatpush1.bf16.msra.mxu0 %v6653_v57  ;;  %899 = vmatprep.subr.bf16.mxu1 %v6654_v58  ;;  %v6698_v57 = vld [vmem:[#allocation11 + $0xb4] ss:$8 sps:$4 sm:$0xff]   ;;  %v6700_v58 = vld [vmem:[%s9259_s2 + $0xb0] ss:$8 sps:$4 sm:$0xff]  }
  0x91   : > { %1733 = vmatprep.subr.bf16.mxu0 %v6656_v59  ;;  %v6701_v59 = vld [vmem:[#allocation11 + $0xb0] ss:$8 sps:$4 sm:$0xff]  }
  0x92   : > { %545 = vadd.xlane.f32.xlu0 %v544_v48  ;;  %v6688_v48 = vld [vmem:[%s9259_s2 + $0xd0] ss:$8 sps:$4 sm:$0xff]  }
  0x93   : > { %548 = vadd.xlane.f32.xlu1 %v547_v53  ;;  %900 = vmatpush1.bf16.msra.mxu1 %v6658_v63  ;;  %v6692_v53 = vld [vmem:[#allocation11 + $0xc4] ss:$8 sps:$4 sm:$0xff]   ;;  %v6706_v63 = vld [vmem:[%s9259_s2 + $0xa0] ss:$8 sps:$4 sm:$0xff]  }
  0x94   : > { %1734 = vmatpush1.bf16.msra.mxu0 %v6659_v3  ;;  %901 = vmatprep.subr.bf16.mxu1 %v6660_v9  ;;  %v6707_v3 = vld [vmem:[#allocation11 + $0xa0] ss:$8 sps:$4 sm:$0xff]   ;;  %v6708_v9 = vld [vmem:[%s9259_s2 + $0x94] ss:$8 sps:$4 sm:$0xff]  }
  0x95   : > { %1735 = vmatprep.subr.bf16.mxu0 %v6662_v10  ;;  %v6710_v10 = vld [vmem:[#allocation11 + $0x94] ss:$8 sps:$4 sm:$0xff]  }
  0x96   : > { %551 = vadd.xlane.f32.xlu0 %v550_v61  ;;  %v6702_v61 = vld [vmem:[%s9259_s2 + $0xa4] ss:$8 sps:$4 sm:$0xff]  }
  0x97   : > { %554 = vadd.xlane.f32.xlu1 %v553_v62  ;;  %902 = vmatpush1.bf16.msra.mxu1 %v6664_v11  ;;  %v6704_v62 = vld [vmem:[#allocation11 + $0xa4] ss:$8 sps:$4 sm:$0xff]   ;;  %v6712_v11 = vld [vmem:[%s9259_s2 + $0x90] ss:$8 sps:$4 sm:$0xff]  }
  0x98   : > { %1736 = vmatpush1.bf16.msra.mxu0 %v6665_v15  ;;  %903 = vmatprep.subr.bf16.mxu1 %v6666_v17  ;;  %v6713_v15 = vld [vmem:[#allocation11 + $0x90] ss:$8 sps:$4 sm:$0xff]   ;;  %v6714_v17 = vld [vmem:[%s9259_s2 + $0x84] ss:$8 sps:$4 sm:$0xff]  }
  0x99   : > { %1737 = vmatprep.subr.bf16.mxu0 %v6668_v21  ;;  %v6716_v21 = vld [vmem:[#allocation11 + $0x84] ss:$8 sps:$4 sm:$0xff]  }
  0x9b   : > { %904 = vmatpush1.bf16.msra.mxu1 %v6670_v22  ;;  %v6718_v22 = vld [vmem:[%s9259_s2 + $0x80] ss:$8 sps:$4 sm:$0xff]  }
  0x9c   : > { %1738 = vmatpush1.bf16.msra.mxu0 %v6671_v23  ;;  %905 = vmatprep.subr.bf16.mxu1 %v6672_v24  ;;  %v6719_v23 = vld [vmem:[#allocation11 + $0x80] ss:$8 sps:$4 sm:$0xff]   ;;  %v6722_v24 = vld [vmem:[#allocation9 + $0x74] ss:$8 sps:$4 sm:$0xff]  }
  0x9d   : > { %1739 = vmatprep.subr.bf16.mxu0 %v6674_v25 }
  0x9f   : > { %906 = vmatpush2.bf16.msra.mxu1 %v6676_v26 }
  0xa0   : > { %1740 = vmatpush2.bf16.msra.mxu0 %v6677_v34  ;;  %907 = vmatprep.subr.bf16.mxu1 %v6678_v37 }
  0xa1   : > { %1741 = vmatprep.subr.bf16.mxu0 %v6680_v38 }
  0xa3   : > { %908 = vmatpush2.bf16.msra.mxu1 %v6682_v42 }
  0xa4   : > { %1742 = vmatpush2.bf16.msra.mxu0 %v6683_v45  ;;  %909 = vmatprep.subr.bf16.mxu1 %v6684_v46 }
  0xa5   : > { %1743 = vmatprep.subr.bf16.mxu0 %v6686_v47 }
  0xa7   : > { %910 = vmatpush2.bf16.msra.mxu1 %v6688_v48 }
  0xa8   : > { %1744 = vmatpush2.bf16.msra.mxu0 %v6689_v49  ;;  %911 = vmatprep.subr.bf16.mxu1 %v6690_v52  ;;  %v639_v52 = vlaneseq }
  0xa9   : > { %1745 = vmatprep.subr.bf16.mxu0 %v6692_v53 }
  0xab   : > { %912 = vmatpush2.bf16.msra.mxu1 %v6694_v54 }
  0xac   : > { %1746 = vmatpush2.bf16.msra.mxu0 %v6695_v55  ;;  %913 = vmatprep.subr.bf16.mxu1 %v6696_v56 }
  0xad   : > { %1747 = vmatprep.subr.bf16.mxu0 %v6698_v57 }
  0xaf   : > { %914 = vmatpush2.bf16.msra.mxu1 %v6700_v58 }
  0xb0   : > { %1748 = vmatpush2.bf16.msra.mxu0 %v6701_v59  ;;  %915 = vmatprep.subr.bf16.mxu1 %v6702_v61  ;;  %v640_v59 = vshrl.u32 %v639_v52, 7 }
  0xb1   : > { %1749 = vmatprep.subr.bf16.mxu0 %v6704_v62 }
  0xb3   : > { %916 = vmatpush2.bf16.msra.mxu1 %v6706_v63 }
  0xb4   : > { %1750 = vmatpush2.bf16.msra.mxu0 %v6707_v3  ;;  %917 = vmatprep.subr.bf16.mxu1 %v6708_v9 }
  0xb5   : > { %1751 = vmatprep.subr.bf16.mxu0 %v6710_v10 }
  0xb7   : > { %918 = vmatpush2.bf16.msra.mxu1 %v6712_v11  ;;  %v645_v11 = vsub.s32 1, %v640_v59 }
  0xb8   : > { %1752 = vmatpush2.bf16.msra.mxu0 %v6713_v15  ;;  %919 = vmatprep.subr.bf16.mxu1 %v6714_v17  ;;  %v637_v17 = vld [vmem:[%s9258_s1] sm:$0x3] }
  0xb9   : > { %1753 = vmatprep.subr.bf16.mxu0 %v6716_v21  ;;  %v641_v21 = vsub.s32 0, %v640_v59 }
  0xbb   : > { %920 = vmatpush2.bf16.msra.mxu1 %v6718_v22 }
  0xbc   : > { %1754 = vmatpush2.bf16.msra.mxu0 %v6719_v23  ;;  %1306 = vmatprep.subr.bf16.mxu1 %v6722_v24 }
 0x103   : > { %v510_v25 = vpop.xlane.xlu0 %509 }
 0x104   : > { %v557_v26 = vmul.f32 0.00390625, %v510_v25  ;;  %v516_v34 = vpop.xlane.xlu1 %515 }
 0x105   : > { %v559_v37 = vmul.f32 0.00390625, %v516_v34 }
 0x106   : > { %v573_v38 = vadd.f32 1e-06, %v557_v26 }
 0x107   : > { %v575_v42 = vadd.f32 1e-06, %v559_v37  ;;  %v513_v45 = vpop.xlane.xlu0 %512  ;;  %v7926_v37 = vrot.slane %v637_v17, %v645_v11 }
 0x108   : > { %6933 = vrsqrt.f32 %v573_v38  ;;  %v558_v46 = vmul.f32 0.00390625, %v513_v45  ;;  %v519_v47 = vpop.xlane.xlu1 %518  ;;  %v7930_v45 = vrot.slane %v637_v17, %v641_v21 }
 0x109   : > { %6935 = vrsqrt.f32 %v575_v42  ;;  %v560_v48 = vmul.f32 0.00390625, %v519_v47 }
 0x10a   : > { %v574_v49 = vadd.f32 1e-06, %v558_v46 }
 0x10b   : > { %v576_v53 = vadd.f32 1e-06, %v560_v48  ;;  %v522_v54 = vpop.xlane.xlu0 %521 }
 0x10c   : > { %6937 = vrsqrt.f32 %v574_v49  ;;  %v525_v55 = vpop.xlane.xlu1 %524  ;;  %v561_v56 = vmul.f32 0.00390625, %v522_v54 }
 0x10d   : > { %6939 = vrsqrt.f32 %v576_v53  ;;  %v562_v57 = vmul.f32 0.00390625, %v525_v55 }
 0x10e   : > { %v577_v58 = vadd.f32 1e-06, %v561_v56 }
 0x10f   : > { %v578_v61 = vadd.f32 1e-06, %v562_v57  ;;  %v528_v62 = vpop.xlane.xlu0 %527 }
 0x110   : > { %6941 = vrsqrt.f32 %v577_v58  ;;  %v531_v63 = vpop.xlane.xlu1 %530  ;;  %v563_v3 = vmul.f32 0.00390625, %v528_v62 }
 0x111   : > { %6943 = vrsqrt.f32 %v578_v61  ;;  %v564_v9 = vmul.f32 0.00390625, %v531_v63 }
 0x112   : > { %v579_v10 = vadd.f32 1e-06, %v563_v3 }
 0x113   : > { %v580_v15 = vadd.f32 1e-06, %v564_v9  ;;  %v534_v22 = vpop.xlane.xlu0 %533  ;;  %v6720_v9 = vld [vmem:[#allocation9 + $0x70] ss:$8 sps:$4 sm:$0xff]  }
 0x114   : > { %v537_v23 = vpop.xlane.xlu1 %536  ;;  %v565_v24 = vmul.f32 0.00390625, %v534_v22  ;;  %6945 = vrsqrt.f32 %v579_v10 }
 0x115   : > { %v6934_v25 = vpop.eup %6933  ;;  %v566_v26 = vmul.f32 0.00390625, %v537_v23  ;;  %6947 = vrsqrt.f32 %v580_v15  ;;  %v6725_v15 = vld [vmem:[#allocation9 + $0x64] ss:$8 sps:$4 sm:$0xff]  }
 0x116   : > { %v6936_v34 = vpop.eup %6935  ;;  %v606_v38 = vmul.f32 %v6934_v25, %v7671_v1  ;;  %v605_v42 = vmul.f32 %v6934_v25, %v7668_v0  ;;  %v581_v47 = vadd.f32 1e-06, %v565_v24 }
 0x117   : > { %v610_v46 = vmul.f32 %v6936_v34, %v7681_v5  ;;  %v582_v49 = vadd.f32 1e-06, %v566_v26  ;;  %v540_v52 = vpop.xlane.xlu0 %539  ;;  %v609_v17 = vmul.f32 %v6936_v34, %v7674_v2 }
 0x118   : > { %v650_v56 = vmul.f32 %v7926_v37, %v606_v38  ;;  %v649_v57 = vmul.f32 %v7930_v45, %v605_v42  ;;  %v543_v58 = vpop.xlane.xlu1 %542  ;;  %6949 = vrsqrt.f32 %v581_v47  ;;  %v567_v61 = vmul.f32 0.00390625, %v540_v52 }
 0x119   : > { %v6938_v48 = vpop.eup %6937  ;;  %v654_v0 = vmul.f32 %v7926_v37, %v610_v46  ;;  %6951 = vrsqrt.f32 %v582_v49  ;;  %v653_v38 = vmul.f32 %v7930_v45, %v609_v17  ;;  %v6728_v46 = vld [vmem:[#allocation9 + $0x54] ss:$8 sps:$4 sm:$0xff]  }
 0x11a   : > { %v6940_v53 = vpop.eup %6939  ;;  %v608_v54 = vmul.f32 %v6938_v48, %v7689_v8  ;;  %v607_v55 = vmul.f32 %v6938_v48, %v7686_v7  ;;  %v583_v23 = vadd.f32 1e-06, %v567_v61 }
 0x11b   : > { %v612_v1 = vmul.f32 %v6940_v53, %v7701_v13  ;;  %v568_v13 = vmul.f32 0.00390625, %v543_v58  ;;  %v611_v21 = vmul.f32 %v6940_v53, %v7698_v12  ;;  %v546_v26 = vpop.xlane.xlu0 %545  ;;  %v6726_v53 = vld [vmem:[#allocation9 + $0x50] ss:$8 sps:$4 sm:$0xff]  }
 0x11c   : > { %v652_v5 = vmul.f32 %v7926_v37, %v608_v54  ;;  %v651_v59 = vmul.f32 %v7930_v45, %v607_v55  ;;  %6953 = vrsqrt.f32 %v583_v23  ;;  %v569_v52 = vmul.f32 0.00390625, %v546_v26 }
 0x11d   : > { %v6942_v62 = vpop.eup %6941  ;;  %v656_v8 = vmul.f32 %v7926_v37, %v612_v1  ;;  %v584_v25 = vadd.f32 1e-06, %v568_v13  ;;  %v655_v42 = vmul.f32 %v7930_v45, %v611_v21  ;;  %v6731_v1 = vld [vmem:[#allocation9 + $0x44] ss:$8 sps:$4 sm:$0xff]   ;;  %v6732_v21 = vld [vmem:[#allocation9 + $0x30] ss:$8 sps:$4 sm:$0xff]  }
 0x11e   : > { %v6944_v7 = vpop.eup %6943  ;;  %v7942_v63 = vpack.c.bf16 %v652_v5, %v650_v56  ;;  %v7944_v3 = vpack.c.bf16 %v651_v59, %v649_v57  ;;  %v614_v10 = vmul.f32 %v6942_v62, %v7717_v20  ;;  %v6723_v20 = vld [vmem:[#allocation9 + $0x60] ss:$8 sps:$4 sm:$0xff]   ;;  %v613_v47 = vmul.f32 %v6942_v62, %v7714_v19 }
 0x11f   : > { %v7947_v11 = vpack.c.bf16 %v656_v8, %v654_v0  ;;  %v616_v22 = vmul.f32 %v6944_v7, %v7711_v18  ;;  %v549_v18 = vpop.xlane.xlu1 %548  ;;  %v615_v48 = vmul.f32 %v6944_v7, %v7704_v14  ;;  %6955 = vrsqrt.f32 %v584_v25  ;;  %v552_v59 = vpop.xlane.xlu0 %551  ;;  %v6734_v7 = vld [vmem:[#allocation9 + $0x34] ss:$8 sps:$4 sm:$0xff]   ;;  %v6737_v25 = vld [vmem:[#allocation9 + $0x24] ss:$8 sps:$4 sm:$0xff]  }
 0x120   : > { %921 = vmatprep.mubr.bf16.mxu1 %v7942_v63  ;;  %1755 = vmatprep.mubr.bf16.mxu0 %v7942_v63  ;;  %v658_v2 = vmul.f32 %v7926_v37, %v614_v10  ;;  %v570_v49 = vmul.f32 0.00390625, %v549_v18  ;;  %v7968_v57 = vpack.c.bf16 %v655_v42, %v653_v38  ;;  %v657_v14 = vmul.f32 %v7930_v45, %v613_v47  ;;  %v6738_v47 = vld [vmem:[#allocation9 + $0x10] ss:$8 sps:$4 sm:$0xff]  }
 0x121   : > { %922 = vmatmul.mubr.bf16.vlgmr.msra.gmra.mxu1 %v7944_v3  ;;  %1756 = vmatmul.mubr.bf16.vlgmr.msra.gmra.mxu0 %v7944_v3  ;;  %v6946_v24 = vpop.eup %6945  ;;  %v660_v12 = vmul.f32 %v7926_v37, %v616_v22  ;;  %v659_v19 = vmul.f32 %v7930_v45, %v615_v48  ;;  %v571_v13 = vmul.f32 0.00390625, %v552_v59 }
 0x122   : > { %1307 = vmatpush1.bf16.msra.mxu1 %v6720_v9  ;;  %931 = vmatprep.mubr.bf16.mxu1 %v7947_v11  ;;  %v6948_v34 = vpop.eup %6947  ;;  %v618_v55 = vmul.f32 %v6946_v24, %v7731_v29  ;;  %v586_v58 = vadd.f32 1e-06, %v570_v49  ;;  %v6729_v29 = vld [vmem:[#allocation9 + $0x40] ss:$8 sps:$4 sm:$0xff]  }
 0x123   : > { %1765 = vmatprep.mubr.bf16.mxu0 %v7947_v11  ;;  %1308 = vmatprep.subr.bf16.mxu1 %v6725_v15  ;;  %v7964_v54 = vpack.c.bf16 %v660_v12, %v658_v2  ;;  %v620_v56 = vmul.f32 %v6948_v34, %v7737_v31  ;;  %v555_v5 = vpop.xlane.xlu1 %554  ;;  %v585_v31 = vadd.f32 1e-06, %v569_v52  ;;  %v7978_v10 = vpack.c.bf16 %v659_v19, %v657_v14  ;;  %v6735_v12 = vld [vmem:[#allocation9 + $0x20] ss:$8 sps:$4 sm:$0xff]  }
 0x124   : > { %v662_v62 = vmul.f32 %v7926_v37, %v618_v55  ;;  %v572_v9 = vmul.f32 0.00390625, %v555_v5  ;;  %6957 = vrsqrt.f32 %v586_v58  ;;  %v617_v15 = vmul.f32 %v6946_v24, %v7728_v28  ;;  %v6744_v5 = vld [vmem:[#allocation9 + $0xf0] ss:$8 sps:$4 sm:$0xff]  }
 0x125   : > { %v6950_v0 = vpop.eup %6949  ;;  %v664_v8 = vmul.f32 %v7926_v37, %v620_v56  ;;  %v619_v17 = vmul.f32 %v6948_v34, %v7734_v30  ;;  %6959 = vrsqrt.f32 %v585_v31  ;;  %v587_v18 = vadd.f32 1e-06, %v571_v13  ;;  %v6740_v34 = vld [vmem:[#allocation9 + $0x14] ss:$8 sps:$4 sm:$0xff]   ;;  %v6741_v56 = vld [vmem:[#allocation9] ss:$8 sps:$4 sm:$0xff]  }
 0x126   : > { %1309 = vmatpush1.bf16.msra.mxu1 %v6723_v20  ;;  %v6952_v61 = vpop.eup %6951  ;;  %v622_v23 = vmul.f32 %v6950_v0, %v7757_v41  ;;  %v661_v28 = vmul.f32 %v7930_v45, %v617_v15  ;;  %v588_v24 = vadd.f32 1e-06, %v572_v9  ;;  %v621_v42 = vmul.f32 %v6950_v0, %v7754_v40  ;;  %v6746_v0 = vld [vmem:[#allocation9 + $0xf4] ss:$8 sps:$4 sm:$0xff]   ;;  %v6749_v31 = vld [vmem:[#allocation9 + $0xe4] ss:$8 sps:$4 sm:$0xff]  }
 0x127   : > { %1310 = vmatprep.subr.bf16.mxu1 %v6728_v46  ;;  %v7982_v22 = vpack.c.bf16 %v664_v8, %v662_v62  ;;  %v624_v20 = vmul.f32 %v6952_v61, %v7747_v36  ;;  %v663_v30 = vmul.f32 %v7930_v45, %v619_v17  ;;  %v623_v46 = vmul.f32 %v6952_v61, %v7744_v35  ;;  %v6752_v9 = vld [vmem:[#allocation9 + $0xd4] ss:$8 sps:$4 sm:$0xff]  }
 0x128   : > { %v666_v41 = vmul.f32 %v7926_v37, %v622_v23  ;;  %6961 = vrsqrt.f32 %v588_v24  ;;  %v665_v55 = vmul.f32 %v7930_v45, %v621_v42  ;;  %v6753_v24 = vld [vmem:[#allocation9 + $0xc0] ss:$8 sps:$4 sm:$0xff]  }
 0x129   : > { %932 = vmatmul.mubr.bf16.gmra.mxu1 %v7968_v57  ;;  %1766 = vmatmul.mubr.bf16.gmra.mxu0 %v7968_v57  ;;  %v6954_v2 = vpop.eup %6953  ;;  %v668_v36 = vmul.f32 %v7926_v37, %v624_v20  ;;  %v7994_v38 = vpack.c.bf16 %v663_v30, %v661_v28  ;;  %6963 = vrsqrt.f32 %v587_v18  ;;  %v667_v40 = vmul.f32 %v7930_v45, %v623_v46  ;;  %v6764_v46 = vld [vmem:[#allocation9 + $0x94] ss:$8 sps:$4 sm:$0xff]  }
 0x12a   : > { %1311 = vmatpush1.bf16.msra.mxu1 %v6726_v53  ;;  %941 = vmatprep.mubr.bf16.mxu1 %v7964_v54  ;;  %v626_v49 = vmul.f32 %v6954_v2, %v7766_v44  ;;  %v6743_v53 = vld [vmem:[#allocation9 + $0x4] ss:$8 sps:$4 sm:$0xff]   ;;  %v625_v19 = vmul.f32 %v6954_v2, %v7763_v43 }
 0x12b   : > { %1312 = vmatprep.subr.bf16.mxu1 %v6731_v1  ;;  %1775 = vmatprep.mubr.bf16.mxu0 %v7964_v54  ;;  %v7998_v48 = vpack.c.bf16 %v668_v36, %v666_v41  ;;  %v8010_v14 = vpack.c.bf16 %v667_v40, %v665_v55  ;;  %v6755_v2 = vld [vmem:[#allocation9 + $0xc4] ss:$8 sps:$4 sm:$0xff]   ;;  %v6756_v41 = vld [vmem:[#allocation9 + $0xb0] ss:$8 sps:$4 sm:$0xff]  }
 0x12c   : > { %v6956_v26 = vpop.eup %6955  ;;  %v670_v1 = vmul.f32 %v7926_v37, %v626_v49  ;;  %v669_v62 = vmul.f32 %v7930_v45, %v625_v19  ;;  %v6765_v49 = vld [vmem:[#allocation9 + $0x80] ss:$8 sps:$4 sm:$0xff]  }
 0x12d   : > { %v628_v52 = vmul.f32 %v6956_v26, %v7779_v51  ;;  %v627_v58 = vmul.f32 %v6956_v26, %v7776_v50  ;;  %v6747_v50 = vld [vmem:[#allocation9 + $0xe0] ss:$8 sps:$4 sm:$0xff]   ;;  %v6761_v26 = vld [vmem:[#allocation9 + $0xa4] ss:$8 sps:$4 sm:$0xff]  }
 0x12e   : > { %1313 = vmatpush1.bf16.msra.mxu1 %v6729_v29 }
 0x12f   : > { %1314 = vmatprep.subr.bf16.mxu1 %v6734_v7  ;;  %v672_v44 = vmul.f32 %v7926_v37, %v628_v52  ;;  %v671_v43 = vmul.f32 %v7930_v45, %v627_v58 }
 0x131   : > { %942 = vmatmul.mubr.bf16.gmra.mxu1 %v7978_v10  ;;  %1776 = vmatmul.mubr.bf16.gmra.mxu0 %v7978_v10  ;;  %v6958_v35 = vpop.eup %6957  ;;  %v8014_v59 = vpack.c.bf16 %v672_v44, %v670_v1  ;;  %v691_v13 = vpack.c.bf16 %v671_v43, %v669_v62 }
 0x132   : > { %1315 = vmatpush1.bf16.msra.mxu1 %v6732_v21  ;;  %951 = vmatprep.mubr.bf16.mxu1 %v7982_v22  ;;  %v6960_v51 = vpop.eup %6959  ;;  %v632_v29 = vmul.f32 %v6958_v35, %v7805_v6  ;;  %v631_v17 = vmul.f32 %v6958_v35, %v7802_v4  ;;  %v6750_v21 = vld [vmem:[#allocation9 + $0xd0] ss:$8 sps:$4 sm:$0xff]  }
 0x133   : > { %1316 = vmatprep.subr.bf16.mxu1 %v6737_v25  ;;  %1785 = vmatprep.mubr.bf16.mxu0 %v7982_v22  ;;  %v630_v61 = vmul.f32 %v6960_v51, %v7812_v16  ;;  %v629_v15 = vmul.f32 %v6960_v51, %v7792_v60 }
 0x134   : > { %v676_v16 = vmul.f32 %v7926_v37, %v632_v29  ;;  %v675_v30 = vmul.f32 %v7930_v45, %v631_v17 }
 0x135   : > { %v6962_v8 = vpop.eup %6961  ;;  %v674_v7 = vmul.f32 %v7926_v37, %v630_v61  ;;  %v673_v28 = vmul.f32 %v7930_v45, %v629_v15 }
 0x136   : > { %1317 = vmatpush1.bf16.msra.mxu1 %v6735_v12  ;;  %v6964_v6 = vpop.eup %6963  ;;  %v636_v25 = vmul.f32 %v6962_v8, %v7828_v32  ;;  %v635_v18 = vmul.f32 %v6962_v8, %v7825_v27  ;;  %v6762_v27 = vld [vmem:[#allocation9 + $0x90] ss:$8 sps:$4 sm:$0xff]  }
 0x137   : > { %1318 = vmatprep.subr.bf16.mxu1 %v6740_v34  ;;  %v694_v23 = vpack.c.bf16 %v676_v16, %v674_v7  ;;  %v634_v20 = vmul.f32 %v6964_v6, %v7838_v39  ;;  %v6758_v39 = vld [vmem:[#allocation9 + $0xb4] ss:$8 sps:$4 sm:$0xff]   ;;  %v693_v12 = vpack.c.bf16 %v675_v30, %v673_v28  ;;  %v633_v32 = vmul.f32 %v6964_v6, %v7831_v33 }
 0x138   : > { %v680_v4 = vmul.f32 %v7926_v37, %v636_v25  ;;  %v679_v42 = vmul.f32 %v7930_v45, %v635_v18 }
 0x139   : > { %952 = vmatmul.mubr.bf16.gmra.mxu1 %v7994_v38  ;;  %1786 = vmatmul.mubr.bf16.gmra.mxu0 %v7994_v38  ;;  %v678_v60 = vmul.f32 %v7926_v37, %v634_v20  ;;  %v677_v34 = vmul.f32 %v7930_v45, %v633_v32  ;;  %v6759_v37 = vld [vmem:[#allocation9 + $0xa0] ss:$8 sps:$4 sm:$0xff]  }
 0x13a   : > { %1319 = vmatpush1.bf16.msra.mxu1 %v6738_v47  ;;  %961 = vmatprep.mubr.bf16.mxu1 %v7998_v48  ;;  %v6767_v47 = vld [vmem:[#allocation9 + $0x84] ss:$8 sps:$4 sm:$0xff]  }
 0x13b   : > { %1320 = vmatprep.subr.bf16.mxu1 %v6743_v53  ;;  %1795 = vmatprep.mubr.bf16.mxu0 %v7998_v48  ;;  %v696_v36 = vpack.c.bf16 %v680_v4, %v678_v60  ;;  %v695_v33 = vpack.c.bf16 %v679_v42, %v677_v34 }
 0x13e   : > { %1321 = vmatpush1.bf16.msra.mxu1 %v6741_v56 }
 0x13f   : > { %1322 = vmatprep.subr.bf16.mxu1 %v6746_v0 }
 0x141   : > { %962 = vmatmul.mubr.bf16.gmra.mxu1 %v8010_v14  ;;  %1796 = vmatmul.mubr.bf16.gmra.mxu0 %v8010_v14 }
 0x142   : > { %1323 = vmatpush2.bf16.msra.mxu1 %v6744_v5  ;;  %971 = vmatprep.mubr.bf16.mxu1 %v8014_v59 }
 0x143   : > { %1324 = vmatprep.subr.bf16.mxu1 %v6749_v31  ;;  %1805 = vmatprep.mubr.bf16.mxu0 %v8014_v59 }
 0x146   : > { %1325 = vmatpush2.bf16.msra.mxu1 %v6747_v50 }
 0x147   : > { %1326 = vmatprep.subr.bf16.mxu1 %v6752_v9 }
 0x149   : > { %972 = vmatmul.mubr.bf16.gmra.mxu1 %v691_v13  ;;  %1806 = vmatmul.mubr.bf16.gmra.mxu0 %v691_v13 }
 0x14a   : > { %1327 = vmatpush2.bf16.msra.mxu1 %v6750_v21  ;;  %981 = vmatprep.mubr.bf16.mxu1 %v694_v23 }
 0x14b   : > { %1328 = vmatprep.subr.bf16.mxu1 %v6755_v2  ;;  %1815 = vmatprep.mubr.bf16.mxu0 %v694_v23 }
 0x14e   : > { %1329 = vmatpush2.bf16.msra.mxu1 %v6753_v24 }
 0x14f   : > { %1330 = vmatprep.subr.bf16.mxu1 %v6758_v39 }
 0x151   : > { %982 = vmatmul.mubr.bf16.gmra.mxu1 %v693_v12  ;;  %1816 = vmatmul.mubr.bf16.gmra.mxu0 %v693_v12 }
 0x152   : > { %1331 = vmatpush2.bf16.msra.mxu1 %v6756_v41  ;;  %991 = vmatprep.mubr.bf16.mxu1 %v696_v36 }
 0x153   : > { %1332 = vmatprep.subr.bf16.mxu1 %v6761_v26  ;;  %1825 = vmatprep.mubr.bf16.mxu0 %v696_v36 }
 0x156   : > { %1333 = vmatpush2.bf16.msra.mxu1 %v6759_v37 }
 0x157   : > { %1334 = vmatprep.subr.bf16.mxu1 %v6764_v46  ;;  %v7436_v46 = vmov 0  }
 0x158   : > { %6623 = vset.pattern.permute.xlu1 %v7436_v46  ;;  %6622 = vset.pattern.permute.xlu0 %v7436_v46 }
 0x159   : > { %992 = vmatmul.mubr.bf16.gmra.mxu1 %v695_v33  ;;  %1826 = vmatmul.mubr.bf16.gmra.mxu0 %v695_v33 }
 0x15a   : > { %1335 = vmatpush2.bf16.msra.mxu1 %v6762_v27  ;;  %1338 = vmatprep.mubr.bf16.mxu1 %v7942_v63 }
 0x15b   : > { %1336 = vmatprep.subr.bf16.mxu1 %v6767_v47 }
 0x15e   : > { %1337 = vmatpush2.bf16.msra.mxu1 %v6765_v49 }
 0x161   : > { %1339 = vmatmul.mubr.bf16.vlgmr.msra.gmra.mxu1 %v7944_v3 }
 0x162   : > { %1348 = vmatprep.mubr.bf16.mxu1 %v7947_v11 }
 0x169   : > { %1349 = vmatmul.mubr.bf16.gmra.mxu1 %v7968_v57 }
 0x16a   : > { %1358 = vmatprep.mubr.bf16.mxu1 %v7964_v54 }
 0x171   : > { %1359 = vmatmul.mubr.bf16.gmra.mxu1 %v7978_v10 }
 0x172   : > { %1368 = vmatprep.mubr.bf16.mxu1 %v7982_v22 }
 0x179   : > { %1369 = vmatmul.mubr.bf16.gmra.mxu1 %v7994_v38 }
 0x17a   : > { %1378 = vmatprep.mubr.bf16.mxu1 %v7998_v48 }
 0x181   : > { %1379 = vmatmul.mubr.bf16.gmra.mxu1 %v8010_v14 }
 0x182   : > { %1388 = vmatprep.mubr.bf16.mxu1 %v8014_v59 }
 0x189   : > { %1389 = vmatmul.mubr.bf16.gmra.mxu1 %v691_v13 }
 0x18a   : > { %1398 = vmatprep.mubr.bf16.mxu1 %v694_v23 }
 0x191   : > { %1399 = vmatmul.mubr.bf16.gmra.mxu1 %v693_v12 }
 0x192   : > { %1408 = vmatprep.mubr.bf16.mxu1 %v696_v36 }
 0x199   : > { %1409 = vmatmul.mubr.bf16.gmra.mxu1 %v695_v33 }
 0x1e1   : > { %v923_v45 = vpop.f32.mrf.mxu1  ;;  %v1757_v63 = vpop.f32.mrf.mxu0 }
 0x1e3   : > { %v925_v3 = vpop.f32.mrf.mxu1  ;;  %v1759_v11 = vpop.f32.mrf.mxu0 }
 0x1e4   : > { %v5997_v54 = vpack.c.bf16 %v925_v3, %v923_v45  ;;  %v6029_v57 = vpack.c.bf16 %v1759_v11, %v1757_v63 }
 0x1e5   : > { %v927_v10 = vpop.f32.mrf.mxu1  ;;  %v1761_v22 = vpop.f32.mrf.mxu0 }
 0x1e6   : > { %1098 = vst [vmem:[#allocation2] sm:$0xff] %v5997_v54  ;;  %1932 = vst [vmem:[#allocation4] sm:$0xff] %v6029_v57 }
 0x1e7   : > { %v929_v38 = vpop.f32.mrf.mxu1  ;;  %v1763_v48 = vpop.f32.mrf.mxu0 }
 0x1e8   : > { %v5998_v52 = vpack.c.bf16 %v929_v38, %v927_v10  ;;  %v6030_v53 = vpack.c.bf16 %v1763_v48, %v1761_v22 }
 0x1e9   : > { %v933_v55 = vpop.f32.mrf.mxu1  ;;  %v1767_v40 = vpop.f32.mrf.mxu0 }
 0x1ea   : > { %1099 = vst [vmem:[#allocation2 + $0x8] sm:$0xff] %v5998_v52  ;;  %1933 = vst [vmem:[#allocation4 + $0x8] sm:$0xff] %v6030_v53 }
 0x1eb   : > { %v935_v35 = vpop.f32.mrf.mxu1  ;;  %v1769_v56 = vpop.f32.mrf.mxu0 }
 0x1ec   : > { %v5999_v1 = vpack.c.bf16 %v935_v35, %v933_v55  ;;  %v6031_v44 = vpack.c.bf16 %v1769_v56, %v1767_v40 }
 0x1ed   : > { %v937_v51 = vpop.f32.mrf.mxu1  ;;  %v1771_v0 = vpop.f32.mrf.mxu0 }
 0x1ee   : > { %1100 = vst [vmem:[#allocation2 + $0x10] sm:$0xff] %v5999_v1  ;;  %1934 = vst [vmem:[#allocation4 + $0x10] sm:$0xff] %v6031_v44 }
 0x1ef   : > { %v939_v14 = vpop.f32.mrf.mxu1  ;;  %v1773_v19 = vpop.f32.mrf.mxu0 }
 0x1f0   : > { %v6000_v58 = vpack.c.bf16 %v939_v14, %v937_v51  ;;  %v6032_v5 = vpack.c.bf16 %v1773_v19, %v1771_v0 }
 0x1f1   : > { %v943_v59 = vpop.f32.mrf.mxu1  ;;  %v1777_v61 = vpop.f32.mrf.mxu0  ;;  %v6768_v29 = vld [vmem:[#allocation2] ss:$8 sps:$4 sm:$0xff]  }
 0x1f2   : > { %1101 = vst [vmem:[#allocation2 + $0x18] sm:$0xff] %v6000_v58  ;;  %1935 = vst [vmem:[#allocation4 + $0x18] sm:$0xff] %v6032_v5  ;;  %6254 = vmatprep.mubr.msk.bf16.mxu1 %vm2193_vm0, %v6768_v29 }
 0x1f3   : > { %v945_v31 = vpop.f32.mrf.mxu1  ;;  %v1779_v62 = vpop.f32.mrf.mxu0 }
 0x1f4   : > { %v6001_v43 = vpack.c.bf16 %v945_v31, %v943_v59  ;;  %v6033_v8 = vpack.c.bf16 %v1779_v62, %v1777_v61 }
 0x1f5   : > { %v947_v50 = vpop.f32.mrf.mxu1  ;;  %v1781_v7 = vpop.f32.mrf.mxu0 }
 0x1f6   : > { %1102 = vst [vmem:[#allocation2 + $0x20] sm:$0xff] %v6001_v43  ;;  %1936 = vst [vmem:[#allocation4 + $0x20] sm:$0xff] %v6033_v8 }
 0x1f7   : > { %v949_v16 = vpop.f32.mrf.mxu1  ;;  %v1783_v6 = vpop.f32.mrf.mxu0 }
 0x1f8   : > { %v6002_v9 = vpack.c.bf16 %v949_v16, %v947_v50  ;;  %v6034_v13 = vpack.c.bf16 %v1783_v6, %v1781_v7 }
 0x1f9   : > { %v953_v15 = vpop.f32.mrf.mxu1  ;;  %v1787_v17 = vpop.f32.mrf.mxu0 }
 0x1fa   : > { %1103 = vst [vmem:[#allocation2 + $0x28] sm:$0xff] %v6002_v9  ;;  %1937 = vst [vmem:[#allocation4 + $0x28] sm:$0xff] %v6034_v13 }
 0x1fb   : > { %v955_v21 = vpop.f32.mrf.mxu1  ;;  %v1789_v23 = vpop.f32.mrf.mxu0 }
 0x1fc   : > { %v6003_v20 = vpack.c.bf16 %v955_v21, %v953_v15  ;;  %v6035_v25 = vpack.c.bf16 %v1789_v23, %v1787_v17 }
 0x1fd   : > { %v957_v2 = vpop.f32.mrf.mxu1  ;;  %v1791_v28 = vpop.f32.mrf.mxu0 }
 0x1fe   : > { %1104 = vst [vmem:[#allocation2 + $0x30] sm:$0xff] %v6003_v20  ;;  %1938 = vst [vmem:[#allocation4 + $0x30] sm:$0xff] %v6035_v25 }
 0x1ff   : > { %v959_v30 = vpop.f32.mrf.mxu1  ;;  %v1793_v24 = vpop.f32.mrf.mxu0 }
 0x200   : > { %v6004_v60 = vpack.c.bf16 %v959_v30, %v957_v2  ;;  %v6036_v4 = vpack.c.bf16 %v1793_v24, %v1791_v28 }
 0x201   : > { %v963_v39 = vpop.f32.mrf.mxu1  ;;  %v1797_v12 = vpop.f32.mrf.mxu0 }
 0x202   : > { %1105 = vst [vmem:[#allocation2 + $0x38] sm:$0xff] %v6004_v60  ;;  %1939 = vst [vmem:[#allocation4 + $0x38] sm:$0xff] %v6036_v4 }
 0x203   : > { %v965_v32 = vpop.f32.mrf.mxu1  ;;  %v1799_v18 = vpop.f32.mrf.mxu0 }
 0x204   : > { %v6005_v41 = vpack.c.bf16 %v965_v32, %v963_v39  ;;  %v6037_v36 = vpack.c.bf16 %v1799_v18, %v1797_v12 }
 0x205   : > { %v967_v26 = vpop.f32.mrf.mxu1  ;;  %v1801_v34 = vpop.f32.mrf.mxu0 }
 0x206   : > { %1106 = vst [vmem:[#allocation2 + $0x40] sm:$0xff] %v6005_v41  ;;  %1940 = vst [vmem:[#allocation4 + $0x40] sm:$0xff] %v6037_v36 }
 0x207   : > { %v969_v42 = vpop.f32.mrf.mxu1  ;;  %v1803_v37 = vpop.f32.mrf.mxu0 }
 0x208   : > { %v6006_v33 = vpack.c.bf16 %v969_v42, %v967_v26  ;;  %v6038_v27 = vpack.c.bf16 %v1803_v37, %v1801_v34 }
 0x209   : > { %v973_v47 = vpop.f32.mrf.mxu1  ;;  %v1807_v49 = vpop.f32.mrf.mxu0 }
 0x20a   : > { %1107 = vst [vmem:[#allocation2 + $0x48] sm:$0xff] %v6006_v33  ;;  %1941 = vst [vmem:[#allocation4 + $0x48] sm:$0xff] %v6038_v27 }
 0x20b   : > { %v975_v45 = vpop.f32.mrf.mxu1  ;;  %v1809_v63 = vpop.f32.mrf.mxu0 }
 0x20c   : > { %v6007_v3 = vpack.c.bf16 %v975_v45, %v973_v47  ;;  %v6039_v11 = vpack.c.bf16 %v1809_v63, %v1807_v49 }
 0x20d   : > { %v977_v54 = vpop.f32.mrf.mxu1  ;;  %v1811_v57 = vpop.f32.mrf.mxu0 }
 0x20e   : > { %1108 = vst [vmem:[#allocation2 + $0x50] sm:$0xff] %v6007_v3  ;;  %1942 = vst [vmem:[#allocation4 + $0x50] sm:$0xff] %v6039_v11 }
 0x20f   : > { %v979_v10 = vpop.f32.mrf.mxu1  ;;  %v1813_v22 = vpop.f32.mrf.mxu0 }
 0x210   : > { %v6008_v38 = vpack.c.bf16 %v979_v10, %v977_v54  ;;  %v6040_v48 = vpack.c.bf16 %v1813_v22, %v1811_v57 }
 0x211   : > { %v983_v52 = vpop.f32.mrf.mxu1  ;;  %v1817_v53 = vpop.f32.mrf.mxu0 }
 0x212   : > { %1109 = vst [vmem:[#allocation2 + $0x58] sm:$0xff] %v6008_v38  ;;  %1943 = vst [vmem:[#allocation4 + $0x58] sm:$0xff] %v6040_v48 }
 0x213   : > { %v985_v55 = vpop.f32.mrf.mxu1  ;;  %v1819_v40 = vpop.f32.mrf.mxu0 }
 0x214   : > { %v6009_v35 = vpack.c.bf16 %v985_v55, %v983_v52  ;;  %v6041_v56 = vpack.c.bf16 %v1819_v40, %v1817_v53 }
 0x215   : > { %v987_v1 = vpop.f32.mrf.mxu1  ;;  %v1821_v44 = vpop.f32.mrf.mxu0 }
 0x216   : > { %1110 = vst [vmem:[#allocation2 + $0x60] sm:$0xff] %v6009_v35  ;;  %1944 = vst [vmem:[#allocation4 + $0x60] sm:$0xff] %v6041_v56 }
 0x217   : > { %v989_v51 = vpop.f32.mrf.mxu1  ;;  %v1823_v0 = vpop.f32.mrf.mxu0 }
 0x218   : > { %v6010_v14 = vpack.c.bf16 %v989_v51, %v987_v1  ;;  %v6042_v19 = vpack.c.bf16 %v1823_v0, %v1821_v44 }
 0x219   : > { %v993_v58 = vpop.f32.mrf.mxu1  ;;  %v1827_v5 = vpop.f32.mrf.mxu0 }
 0x21a   : > { %1111 = vst [vmem:[#allocation2 + $0x68] sm:$0xff] %v6010_v14  ;;  %1945 = vst [vmem:[#allocation4 + $0x68] sm:$0xff] %v6042_v19 }
 0x21b   : > { %v995_v59 = vpop.f32.mrf.mxu1  ;;  %v1829_v61 = vpop.f32.mrf.mxu0 }
 0x21c   : > { %v6011_v29 = vpack.c.bf16 %v995_v59, %v993_v58  ;;  %v6043_v31 = vpack.c.bf16 %v1829_v61, %v1827_v5 }
 0x21d   : > { %v997_v62 = vpop.f32.mrf.mxu1  ;;  %v1831_v43 = vpop.f32.mrf.mxu0 }
 0x21e   : > { %1112 = vst [vmem:[#allocation2 + $0x70] sm:$0xff] %v6011_v29  ;;  %1946 = vst [vmem:[#allocation4 + $0x70] sm:$0xff] %v6043_v31 }
 0x21f   : > { %v999_v8 = vpop.f32.mrf.mxu1  ;;  %v1833_v50 = vpop.f32.mrf.mxu0 }
 0x220   : > { %v6012_v7 = vpack.c.bf16 %v999_v8, %v997_v62  ;;  %v6044_v16 = vpack.c.bf16 %v1833_v50, %v1831_v43  ;;  %v6780_v50 = vld [vmem:[#allocation2 + $0x10] ss:$8 sps:$4 sm:$0xff]  }
 0x221   : > { %v1340_v6 = vpop.f32.mrf.mxu1 }
 0x222   : > { %1113 = vst [vmem:[#allocation2 + $0x78] sm:$0xff] %v6012_v7  ;;  %1947 = vst [vmem:[#allocation4 + $0x78] sm:$0xff] %v6044_v16  ;;  %v6781_v7 = vld [vmem:[#allocation2] ss:$8 sps:$4 sm:$0xff]   ;;  %v6782_v16 = vld [vmem:[#allocation2 + $0x30] ss:$8 sps:$4 sm:$0xff]  }
 0x223   : > { %v1342_v9 = vpop.f32.mrf.mxu1 }
 0x224   : > { %v6013_v13 = vpack.c.bf16 %v1342_v9, %v1340_v6  ;;  %v6783_v6 = vld [vmem:[#allocation2 + $0x20] ss:$8 sps:$4 sm:$0xff]  }
 0x225   : > { %v1344_v15 = vpop.f32.mrf.mxu1 }
 0x226   : > { %1515 = vst [vmem:[#allocation3] sm:$0xff] %v6013_v13 }
 0x227   : > { %v1346_v17 = vpop.f32.mrf.mxu1 }
 0x228   : > { %v6014_v21 = vpack.c.bf16 %v1346_v17, %v1344_v15  ;;  %v6785_v15 = vld [vmem:[#allocation2 + $0x50] ss:$8 sps:$4 sm:$0xff]   ;;  %v6786_v17 = vld [vmem:[#allocation2 + $0x40] ss:$8 sps:$4 sm:$0xff]  }
 0x229   : > { %v1350_v23 = vpop.f32.mrf.mxu1 }
 0x22a   : > { %1516 = vst [vmem:[#allocation3 + $0x8] sm:$0xff] %v6014_v21  ;;  %v6787_v21 = vld [vmem:[#allocation2 + $0x60] ss:$8 sps:$4 sm:$0xff]  }
 0x22b   : > { %v1352_v20 = vpop.f32.mrf.mxu1 }
 0x22c   : > { %v6015_v25 = vpack.c.bf16 %v1352_v20, %v1350_v23  ;;  %v6788_v23 = vld [vmem:[#allocation2 + $0x70] ss:$8 sps:$4 sm:$0xff]  }
 0x22d   : > { %v1354_v2 = vpop.f32.mrf.mxu1 }
 0x22e   : > { %1517 = vst [vmem:[#allocation3 + $0x10] sm:$0xff] %v6015_v25 }
 0x22f   : > { %v1356_v28 = vpop.f32.mrf.mxu1 }
 0x230   : > { %v6016_v30 = vpack.c.bf16 %v1356_v28, %v1354_v2  ;;  %v1948_v2 = vld [vmem:[%s8079_s22] sm:$0xff]  ;;  %v1949_v28 = vld [vmem:[%s8079_s22 + $0x8] sm:$0xff] }
 0x231   : > { %v1360_v24 = vpop.f32.mrf.mxu1  ;;  %v6777_v31 = vld [vmem:[#allocation3] ss:$8 sps:$4 sm:$0xff]  }
 0x232   : > { %1518 = vst [vmem:[#allocation3 + $0x18] sm:$0xff] %v6016_v30  ;;  %v1951_v30 = vld [vmem:[%s8079_s22 + $0x18] sm:$0xff] }
 0x233   : > { %v1362_v60 = vpop.f32.mrf.mxu1 }
 0x234   : > { %v6017_v4 = vpack.c.bf16 %v1362_v60, %v1360_v24  ;;  %v1950_v24 = vld [vmem:[%s8079_s22 + $0x10] sm:$0xff] }
 0x235   : > { %v1364_v39 = vpop.f32.mrf.mxu1 }
 0x236   : > { %1519 = vst [vmem:[#allocation3 + $0x20] sm:$0xff] %v6017_v4 }
 0x237   : > { %v1366_v12 = vpop.f32.mrf.mxu1 }
 0x238   : > { %v6018_v32 = vpack.c.bf16 %v1366_v12, %v1364_v39  ;;  %v1953_v39 = vld [vmem:[%s8079_s22 + $0x28] sm:$0xff]  ;;  %v1952_v12 = vld [vmem:[%s8079_s22 + $0x20] sm:$0xff] }
 0x239   : > { %v1370_v18 = vpop.f32.mrf.mxu1  ;;  %v6778_v62 = vld [vmem:[#allocation3 + $0x10] ss:$8 sps:$4 sm:$0xff]  }
 0x23a   : > { %1520 = vst [vmem:[#allocation3 + $0x28] sm:$0xff] %v6018_v32  ;;  %v1955_v32 = vld [vmem:[%s8079_s22 + $0x38] sm:$0xff] }
 0x23b   : > { %v1372_v41 = vpop.f32.mrf.mxu1 }
 0x23c   : > { %v6019_v36 = vpack.c.bf16 %v1372_v41, %v1370_v18  ;;  %v1954_v18 = vld [vmem:[%s8079_s22 + $0x30] sm:$0xff] }
 0x23d   : > { %v1374_v26 = vpop.f32.mrf.mxu1 }
 0x23e   : > { %1521 = vst [vmem:[#allocation3 + $0x30] sm:$0xff] %v6019_v36  ;;  %v6791_v36 = vld [vmem:[#allocation3 + $0x10] ss:$8 sps:$4 sm:$0xff]  }
 0x23f   : > { %v1376_v34 = vpop.f32.mrf.mxu1 }
 0x240   : > { %v6020_v42 = vpack.c.bf16 %v1376_v34, %v1374_v26  ;;  %v1957_v26 = vld [vmem:[%s8079_s22 + $0x48] sm:$0xff]  ;;  %v1956_v34 = vld [vmem:[%s8079_s22 + $0x40] sm:$0xff] }
 0x241   : > { %v1380_v37 = vpop.f32.mrf.mxu1  ;;  %v6775_v61 = vld [vmem:[#allocation3 + $0x20] ss:$8 sps:$4 sm:$0xff]  }
 0x242   : > { %1522 = vst [vmem:[#allocation3 + $0x38] sm:$0xff] %v6020_v42  ;;  %v6790_v4 = vld [vmem:[#allocation3 + $0x20] ss:$8 sps:$4 sm:$0xff]   ;;  %v1959_v42 = vld [vmem:[%s8079_s22 + $0x58] sm:$0xff] }
 0x243   : > { %v1382_v46 = vpop.f32.mrf.mxu1  ;;  %v2225_v41 = vsel %vm2193_vm0, %v6790_v4, 0 }
 0x244   : > { %v6021_v33 = vpack.c.bf16 %v1382_v46, %v1380_v37  ;;  %v1958_v37 = vld [vmem:[%s8079_s22 + $0x50] sm:$0xff]  ;;  %v2222_v46 = vsel %vm2193_vm0, %v6791_v36, 0 }
 0x245   : > { %v1384_v27 = vpop.f32.mrf.mxu1 }
 0x246   : > { %1523 = vst [vmem:[#allocation3 + $0x40] sm:$0xff] %v6021_v33  ;;  %v6792_v33 = vld [vmem:[#allocation3] ss:$8 sps:$4 sm:$0xff]  }
 0x247   : > { %v1386_v47 = vpop.f32.mrf.mxu1 }
 0x248   : > { %v6022_v49 = vpack.c.bf16 %v1386_v47, %v1384_v27  ;;  %v1961_v27 = vld [vmem:[%s8079_s22 + $0x68] sm:$0xff]  ;;  %v1960_v47 = vld [vmem:[%s8079_s22 + $0x60] sm:$0xff] }
 0x249   : > { %v1390_v45 = vpop.f32.mrf.mxu1  ;;  %v6776_v29 = vld [vmem:[#allocation3 + $0x30] ss:$8 sps:$4 sm:$0xff]  }
 0x24a   : > { %1524 = vst [vmem:[#allocation3 + $0x48] sm:$0xff] %v6022_v49  ;;  %v6789_v25 = vld [vmem:[#allocation3 + $0x30] ss:$8 sps:$4 sm:$0xff]  }
 0x24b   : > { %v1392_v63 = vpop.f32.mrf.mxu1  ;;  %v2228_v60 = vsel %vm2193_vm0, %v6789_v25, 0  ;;  %v1963_v49 = vld [vmem:[%s8079_s22 + $0x78] sm:$0xff] }
 0x24c   : > { %v6023_v3 = vpack.c.bf16 %v1392_v63, %v1390_v45  ;;  %v1962_v45 = vld [vmem:[%s8079_s22 + $0x70] sm:$0xff]  ;;  %v2219_v63 = vsel %vm2193_vm0, %v6792_v33, 0 }
 0x24d   : > { %v1394_v11 = vpop.f32.mrf.mxu1 }
 0x24e   : > { %1525 = vst [vmem:[#allocation3 + $0x50] sm:$0xff] %v6023_v3  ;;  %v6793_v3 = vld [vmem:[#allocation4 + $0x70] ss:$8 sps:$4 sm:$0xff]  }
 0x24f   : > { %v1396_v54 = vpop.f32.mrf.mxu1 }
 0x250   : > { %v6024_v57 = vpack.c.bf16 %v1396_v54, %v1394_v11  ;;  %v6794_v11 = vld [vmem:[#allocation4 + $0x60] ss:$8 sps:$4 sm:$0xff]   ;;  %v6795_v54 = vld [vmem:[#allocation4 + $0x70] ss:$8 sps:$4 sm:$0xff]  }
 0x251   : > { %v1400_v10 = vpop.f32.mrf.mxu1  ;;  %v6771_v14 = vld [vmem:[#allocation3 + $0x40] ss:$8 sps:$4 sm:$0xff]  }
 0x252   : > { %1526 = vst [vmem:[#allocation3 + $0x58] sm:$0xff] %v6024_v57  ;;  %v6784_v13 = vld [vmem:[#allocation3 + $0x40] ss:$8 sps:$4 sm:$0xff]   ;;  %v6796_v57 = vld [vmem:[#allocation4 + $0x30] ss:$8 sps:$4 sm:$0xff]  }
 0x253   : > { %v1402_v22 = vpop.f32.mrf.mxu1  ;;  %v2231_v20 = vsel %vm2193_vm0, %v6784_v13, 0 }
 0x254   : > { %v6025_v38 = vpack.c.bf16 %v1402_v22, %v1400_v10  ;;  %v6798_v10 = vld [vmem:[#allocation4 + $0x50] ss:$8 sps:$4 sm:$0xff]  }
 0x255   : > { %v1404_v48 = vpop.f32.mrf.mxu1  ;;  %v6797_v22 = vld [vmem:[#allocation2 + $0x10] ss:$8 sps:$4 sm:$0xff]  }
 0x256   : > { %1527 = vst [vmem:[#allocation3 + $0x60] sm:$0xff] %v6025_v38  ;;  %v6799_v38 = vld [vmem:[#allocation2 + $0x20] ss:$8 sps:$4 sm:$0xff]  }
 0x257   : > { %v1406_v52 = vpop.f32.mrf.mxu1 }
 0x258   : > { %v6026_v53 = vpack.c.bf16 %v1406_v52, %v1404_v48  ;;  %v6800_v48 = vld [vmem:[#allocation4 + $0x60] ss:$8 sps:$4 sm:$0xff]   ;;  %v6801_v52 = vld [vmem:[#allocation4 + $0x10] ss:$8 sps:$4 sm:$0xff]  }
 0x259   : > { %v1410_v55 = vpop.f32.mrf.mxu1  ;;  %v6770_v0 = vld [vmem:[#allocation3 + $0x50] ss:$8 sps:$4 sm:$0xff]  }
 0x25a   : > { %1528 = vst [vmem:[#allocation3 + $0x68] sm:$0xff] %v6026_v53  ;;  %v6779_v8 = vld [vmem:[#allocation3 + $0x50] ss:$8 sps:$4 sm:$0xff]   ;;  %v6802_v53 = vld [vmem:[#allocation4 + $0x40] ss:$8 sps:$4 sm:$0xff]  }
 0x25b   : > { %v1412_v40 = vpop.f32.mrf.mxu1  ;;  %v2234_v9 = vsel %vm2193_vm0, %v6779_v8, 0 }
 0x25c   : > { %v6027_v35 = vpack.c.bf16 %v1412_v40, %v1410_v55  ;;  %v6803_v55 = vld [vmem:[#allocation4 + $0x50] ss:$8 sps:$4 sm:$0xff]  }
 0x25d   : > { %v1414_v56 = vpop.f32.mrf.mxu1 }
 0x25e   : > { %1529 = vst [vmem:[#allocation3 + $0x70] sm:$0xff] %v6027_v35  ;;  %v6806_v35 = vld [vmem:[#allocation4 + $0x20] ss:$8 sps:$4 sm:$0xff]  }
 0x25f   : > { %v1416_v1 = vpop.f32.mrf.mxu1 }
 0x260   : > { %v6028_v44 = vpack.c.bf16 %v1416_v1, %v1414_v56  ;;  %v6805_v56 = vld [vmem:[#allocation2 + $0x30] ss:$8 sps:$4 sm:$0xff]   ;;  %v6807_v1 = vld [vmem:[#allocation2 + $0x40] ss:$8 sps:$4 sm:$0xff]  }
 0x261   : > { %v6769_v51 = vld [vmem:[#allocation3 + $0x60] ss:$8 sps:$4 sm:$0xff]  }
 0x262   : > { %1530 = vst [vmem:[#allocation3 + $0x78] sm:$0xff] %v6028_v44  ;;  %2906 = vrot.lane.b32.xlu1 %v6769_v51, %s7437_s24  ;;  %v6774_v59 = vld [vmem:[#allocation3 + $0x60] ss:$8 sps:$4 sm:$0xff]  }
 0x263   : > { %v2237_v43 = vsel %vm2193_vm0, %v6774_v59, 0  ;;  %v6808_v44 = vld [vmem:[#allocation4 + $0x40] ss:$8 sps:$4 sm:$0xff]  }
 0x264   : > { %v6809_v51 = vld [vmem:[#allocation4] ss:$8 sps:$4 sm:$0xff]  }
 0x266   : > { %2904 = vrot.lane.b32.xlu1 %v6770_v0, %s7437_s24  ;;  %v6810_v0 = vld [vmem:[#allocation4 + $0x30] ss:$8 sps:$4 sm:$0xff]  }
 0x269   : > { %v6772_v19 = vld [vmem:[#allocation3 + $0x70] ss:$8 sps:$4 sm:$0xff]   ;;  %v6804_v40 = vld [vmem:[#allocation3 + $0x74] ss:$8 sps:$4 sm:$0xff]  }
 0x26a   : > { %v6773_v58 = vld [vmem:[#allocation3 + $0x70] ss:$8 sps:$4 sm:$0xff]   ;;  %2902 = vrot.lane.b32.xlu1 %v6771_v14, %s7437_s24  ;;  %2908 = vrot.lane.b32.xlu0 %v6772_v19, %s7437_s24  ;;  %v6812_v14 = vld [vmem:[#allocation3 + $0x64] ss:$8 sps:$4 sm:$0xff]  }
 0x26b   : > { %6494 = vmatprep.subr.msk.bf16.mxu1 %vm2193_vm0, %v6773_v58  ;;  %v2240_v5 = vsel %vm2193_vm0, %v6773_v58, 0  ;;  %v6811_v19 = vld [vmem:[#allocation2 + $0x50] ss:$8 sps:$4 sm:$0xff]   ;;  %v6813_v58 = vld [vmem:[#allocation2 + $0x60] ss:$8 sps:$4 sm:$0xff]  }
 0x26c   : > { %6239 = vmatpush3.bf16.xpose.msra.mxu1 %v2240_v5  ;;  %v6814_v5 = vld [vmem:[#allocation4 + $0x20] ss:$8 sps:$4 sm:$0xff]  }
 0x26d   : > { %6495 = vmatprep.subr.msk.bf16.mxu1 %vm2193_vm0, %v6774_v59  ;;  %v6815_v59 = vld [vmem:[#allocation4 + $0x10] ss:$8 sps:$4 sm:$0xff]  }
 0x26e   : > { %2898 = vrot.lane.b32.xlu1 %v6775_v61, %s7437_s24  ;;  %2900 = vrot.lane.b32.xlu0 %v6776_v29, %s7437_s24  ;;  %v6816_v61 = vld [vmem:[#allocation2 + $0x70] ss:$8 sps:$4 sm:$0xff]   ;;  %v6817_v29 = vld [vmem:[#allocation4] ss:$8 sps:$4 sm:$0xff]  }
 0x272   : > { %2894 = vrot.lane.b32.xlu1 %v6777_v31, %s7437_s24  ;;  %2896 = vrot.lane.b32.xlu0 %v6778_v62, %s7437_s24 }
 0x274   : > { %6241 = vmatpush3.bf16.xpose.msra.mxu1 %v2237_v43 }
 0x275   : > { %6496 = vmatprep.subr.msk.bf16.mxu1 %vm2193_vm0, %v6779_v8 }
 0x276   : > { %2840 = vrot.lane.b32.xlu1 %v6780_v50, %s7437_s24  ;;  %2838 = vrot.lane.b32.xlu0 %v6781_v7, %s7437_s24 }
 0x27a   : > { %2844 = vrot.lane.b32.xlu1 %v6782_v16, %s7437_s24  ;;  %2842 = vrot.lane.b32.xlu0 %v6783_v6, %s7437_s24 }
 0x27c   : > { %6243 = vmatpush3.bf16.xpose.msra.mxu1 %v2234_v9 }
 0x27d   : > { %6497 = vmatprep.subr.msk.bf16.mxu1 %vm2193_vm0, %v6784_v13 }
 0x27e   : > { %2848 = vrot.lane.b32.xlu1 %v6785_v15, %s7437_s24  ;;  %2846 = vrot.lane.b32.xlu0 %v6786_v17, %s7437_s24 }
 0x282   : > { %2850 = vrot.lane.b32.xlu0 %v6787_v21, %s7437_s24  ;;  %2852 = vrot.lane.b32.xlu1 %v6788_v23, %s7437_s24 }
 0x284   : > { %6245 = vmatpush3.bf16.xpose.msra.mxu1 %v2231_v20 }
 0x285   : > { %6498 = vmatprep.subr.msk.bf16.mxu1 %vm2193_vm0, %v6789_v25 }
 0x286   : > { %1966 = vperm.xlu0 %6622, %v1948_v2   ;;  %1969 = vperm.xlu1 %6623, %v1949_v28  }
 0x28a   : > { %1975 = vperm.xlu0 %6622, %v1951_v30   ;;  %1972 = vperm.xlu1 %6623, %v1950_v24  }
 0x28c   : > { %6247 = vmatpush3.bf16.xpose.msra.mxu1 %v2228_v60 }
 0x28d   : > { %6499 = vmatprep.subr.msk.bf16.mxu1 %vm2193_vm0, %v6790_v4 }
 0x28e   : > { %1981 = vperm.xlu0 %6622, %v1953_v39   ;;  %1978 = vperm.xlu1 %6623, %v1952_v12  }
 0x292   : > { %1987 = vperm.xlu0 %6622, %v1955_v32   ;;  %1984 = vperm.xlu1 %6623, %v1954_v18  }
 0x294   : > { %6249 = vmatpush3.bf16.xpose.msra.mxu1 %v2225_v41 }
 0x295   : > { %6500 = vmatprep.subr.msk.bf16.mxu1 %vm2193_vm0, %v6791_v36  ;;  %v6818_v36 = vld [vmem:[#allocation3 + $0x74] ss:$8 sps:$4 sm:$0xff]  }
 0x296   : > { %1993 = vperm.xlu0 %6622, %v1957_v26   ;;  %1990 = vperm.xlu1 %6623, %v1956_v34  }
 0x29a   : > { %1999 = vperm.xlu0 %6622, %v1959_v42   ;;  %1996 = vperm.xlu1 %6623, %v1958_v37   ;;  %v3688_v37 = vsel %vm2193_vm0, %v6818_v36, 0 }
 0x29c   : > { %6251 = vmatpush3.bf16.xpose.msra.mxu1 %v2222_v46  ;;  %v6819_v46 = vld [vmem:[#allocation3 + $0x64] ss:$8 sps:$4 sm:$0xff]  }
 0x29d   : > { %6501 = vmatprep.subr.msk.bf16.mxu1 %vm2193_vm0, %v6792_v33 }
 0x29e   : > { %2005 = vperm.xlu0 %6622, %v1961_v27   ;;  %2002 = vperm.xlu1 %6623, %v1960_v47   ;;  %v3685_v47 = vsel %vm2193_vm0, %v6819_v46, 0 }
 0x2a2   : > { %2011 = vperm.xlu0 %6622, %v1963_v49   ;;  %2008 = vperm.xlu1 %6623, %v1962_v45   ;;  %v6820_v49 = vld [vmem:[#allocation3 + $0x54] ss:$8 sps:$4 sm:$0xff]  }
 0x2a4   : > { %6253 = vmatpush3.bf16.xpose.msra.mxu1 %v2219_v63  ;;  %v3682_v63 = vsel %vm2193_vm0, %v6820_v49, 0 }
 0x2a5   : > { %6270 = vmatprep.subr.bf16.mxu1 %v6793_v3 }
 0x2a6   : > { %3243 = vrot.lane.b32.xlu0 %v6794_v11, %s7437_s24  ;;  %3245 = vrot.lane.b32.xlu1 %v6795_v54, %s7437_s24  ;;  %v6822_v11 = vld [vmem:[#allocation2 + $0x4] ss:$8 sps:$4 sm:$0xff]  }
 0x2aa   : > { %3237 = vrot.lane.b32.xlu0 %v6796_v57, %s7437_s24  ;;  %3241 = vrot.lane.b32.xlu1 %v6798_v10, %s7437_s24  ;;  %v6823_v57 = vld [vmem:[#allocation3 + $0x34] ss:$8 sps:$4 sm:$0xff]  }
 0x2ab   : > { %6255 = vmatmul.mubr.msk.bf16.vlgmr.msra.gmra.mxu1 %vm2193_vm0, %v6797_v22  ;;  %v3676_v10 = vsel %vm2193_vm0, %v6823_v57, 0  ;;  %v6824_v22 = vld [vmem:[#allocation3 + $0x24] ss:$8 sps:$4 sm:$0xff]  }
 0x2ac   : > { %6258 = vmatprep.mubr.msk.bf16.mxu1 %vm2193_vm0, %v6799_v38  ;;  %6271 = vmatpush3.bf16.msra.mxu1 %v6793_v3  ;;  %v6821_v3 = vld [vmem:[#allocation3 + $0x44] ss:$8 sps:$4 sm:$0xff]   ;;  %v3673_v38 = vsel %vm2193_vm0, %v6824_v22, 0 }
 0x2ad   : > { %6272 = vmatprep.subr.bf16.mxu1 %v6800_v48  ;;  %v3679_v54 = vsel %vm2193_vm0, %v6821_v3, 0 }
 0x2ae   : > { %3233 = vrot.lane.b32.xlu0 %v6801_v52, %s7437_s24  ;;  %3239 = vrot.lane.b32.xlu1 %v6802_v53, %s7437_s24  ;;  %v6826_v53 = vld [vmem:[#allocation3 + $0x4] ss:$8 sps:$4 sm:$0xff]  }
 0x2b0   : > { %6273 = vmatpush3.bf16.msra.mxu1 %v6800_v48  ;;  %v6825_v48 = vld [vmem:[#allocation3 + $0x14] ss:$8 sps:$4 sm:$0xff]  }
 0x2b1   : > { %6274 = vmatprep.subr.bf16.mxu1 %v6803_v55  ;;  %v3670_v52 = vsel %vm2193_vm0, %v6825_v48, 0 }
 0x2b2   : > { %4355 = vrot.lane.b32.xlu0 %v6804_v40, %s7437_s24  ;;  %3235 = vrot.lane.b32.xlu1 %v6806_v35, %s7437_s24  ;;  %v6827_v35 = vld [vmem:[#allocation2 + $0x14] ss:$8 sps:$4 sm:$0xff]  }
 0x2b3   : > { %6259 = vmatmul.mubr.msk.bf16.gmra.mxu1 %vm2193_vm0, %v6805_v56  ;;  %v6828_v56 = vld [vmem:[#allocation2 + $0x24] ss:$8 sps:$4 sm:$0xff]  }
 0x2b4   : > { %6262 = vmatprep.mubr.msk.bf16.mxu1 %vm2193_vm0, %v6807_v1  ;;  %6275 = vmatpush3.bf16.msra.mxu1 %v6803_v55  ;;  %v3667_v55 = vsel %vm2193_vm0, %v6826_v53, 0 }
 0x2b5   : > { %6276 = vmatprep.subr.bf16.mxu1 %v6808_v44 }
 0x2b6   : > { %3231 = vrot.lane.b32.xlu1 %v6809_v51, %s7437_s24  ;;  %v6830_v51 = vld [vmem:[#allocation2 + $0x44] ss:$8 sps:$4 sm:$0xff]  }
 0x2b8   : > { %6277 = vmatpush3.bf16.msra.mxu1 %v6808_v44  ;;  %v6829_v44 = vld [vmem:[#allocation2 + $0x34] ss:$8 sps:$4 sm:$0xff]  }
 0x2b9   : > { %6278 = vmatprep.subr.bf16.mxu1 %v6810_v0 }
 0x2ba   : > { %4353 = vrot.lane.b32.xlu1 %v6812_v14, %s7437_s24 }
 0x2bb   : > { %6263 = vmatmul.mubr.msk.bf16.gmra.mxu1 %vm2193_vm0, %v6811_v19  ;;  %v2099_v19 = vld [vmem:[#allocation14 + $0x10] sm:$0xff] }
 0x2bc   : > { %6266 = vmatprep.mubr.msk.bf16.mxu1 %vm2193_vm0, %v6813_v58  ;;  %6279 = vmatpush3.bf16.msra.mxu1 %v6810_v0  ;;  %v8191_v0 = vld [vmem:[%s442_s29] ss:$0 sm:$0xff]  ;;  %v7438_v58 = vmov -1e+30  }
 0x2bd   : > { %6280 = vmatprep.subr.bf16.mxu1 %v6814_v5 }
 0x2c0   : > { %6281 = vmatpush3.bf16.msra.mxu1 %v6814_v5 }
 0x2c1   : > { %6282 = vmatprep.subr.bf16.mxu1 %v6815_v59 }
 0x2c3   : > { %6267 = vmatmul.mubr.msk.bf16.gmra.mxu1 %vm2193_vm0, %v6816_v61 }
 0x2c4   : > { %6283 = vmatpush3.bf16.msra.mxu1 %v6815_v59 }
 0x2c5   : > { %6284 = vmatprep.subr.bf16.mxu1 %v6817_v29 }
 0x2c8   : > { %6285 = vmatpush3.bf16.msra.mxu1 %v6817_v29  ;;  %v2097_v29 = vld [vmem:[#allocation14] sm:$0xff] }
 0x2d4   : > { %v2907_v31 = vpop.permute.xlu1 %2906 }
 0x2d5   : > { %v2953_v13 = vsel %vm2193_vm0, %v2907_v31, 0 }
 0x2d8   : > { %v2905_v62 = vpop.permute.xlu1 %2904 }
 0x2d9   : > { %v2950_v21 = vsel %vm2193_vm0, %v2905_v62, 0 }
 0x2dc   : > { %v2903_v43 = vpop.permute.xlu1 %2902  ;;  %v2909_v8 = vpop.permute.xlu0 %2908 }
 0x2dd   : > { %6502 = vmatprep.subr.msk.bf16.mxu0 %vm2193_vm0, %v2909_v8  ;;  %v2956_v50 = vsel %vm2193_vm0, %v2909_v8, 0  ;;  %v2947_v20 = vsel %vm2193_vm0, %v2903_v43, 0 }
 0x2de   : > { %6303 = vmatpush3.bf16.xpose.msra.mxu0 %v2956_v50 }
 0x2df   : > { %6503 = vmatprep.subr.msk.bf16.mxu0 %vm2193_vm0, %v2907_v31  ;;  %v6831_v31 = vld [vmem:[#allocation2 + $0x54] ss:$8 sps:$4 sm:$0xff]  }
 0x2e0   : > { %v2899_v7 = vpop.permute.xlu1 %2898  ;;  %v2901_v16 = vpop.permute.xlu0 %2900 }
 0x2e1   : > { %v2944_v28 = vsel %vm2193_vm0, %v2901_v16, 0  ;;  %v2941_v60 = vsel %vm2193_vm0, %v2899_v7, 0 }
 0x2e4   : > { %v2897_v6 = vpop.permute.xlu0 %2896  ;;  %v2895_v9 = vpop.permute.xlu1 %2894 }
 0x2e5   : > { %v2938_v12 = vsel %vm2193_vm0, %v2897_v6, 0  ;;  %v2935_v41 = vsel %vm2193_vm0, %v2895_v9, 0 }
 0x2e6   : > { %6305 = vmatpush3.bf16.xpose.msra.mxu0 %v2953_v13 }
 0x2e7   : > { %6504 = vmatprep.subr.msk.bf16.mxu0 %vm2193_vm0, %v2905_v62 }
 0x2e8   : > { %v2839_v15 = vpop.permute.xlu0 %2838  ;;  %v2841_v17 = vpop.permute.xlu1 %2840 }
 0x2e9   : > { %6318 = vmatprep.mubr.msk.bf16.mxu0 %vm2193_vm0, %v2839_v15  ;;  %v2098_v15 = vld [vmem:[#allocation14 + $0x8] sm:$0xff] }
 0x2ec   : > { %v2845_v23 = vpop.permute.xlu1 %2844  ;;  %v2843_v34 = vpop.permute.xlu0 %2842 }
 0x2ee   : > { %6307 = vmatpush3.bf16.xpose.msra.mxu0 %v2950_v21 }
 0x2ef   : > { %6505 = vmatprep.subr.msk.bf16.mxu0 %vm2193_vm0, %v2903_v43  ;;  %v6832_v43 = vld [vmem:[#allocation2 + $0x64] ss:$8 sps:$4 sm:$0xff]  }
 0x2f0   : > { %v2849_v25 = vpop.permute.xlu1 %2848  ;;  %v2847_v27 = vpop.permute.xlu0 %2846 }
 0x2f4   : > { %v2853_v2 = vpop.permute.xlu1 %2852  ;;  %v2851_v45 = vpop.permute.xlu0 %2850 }
 0x2f6   : > { %6309 = vmatpush3.bf16.xpose.msra.mxu0 %v2947_v20 }
 0x2f7   : > { %6506 = vmatprep.subr.msk.bf16.mxu0 %vm2193_vm0, %v2901_v16 }
 0x2fe   : > { %6311 = vmatpush3.bf16.xpose.msra.mxu0 %v2944_v28 }
 0x2ff   : > { %6507 = vmatprep.subr.msk.bf16.mxu0 %vm2193_vm0, %v2899_v7  ;;  %v2100_v7 = vld [vmem:[#allocation14 + $0x18] sm:$0xff] }
 0x301   : > { %v8137_v30 = vpop.permute.xlu1 %1969  ;;  %v1967_v40 = vpop.permute.xlu0 %1966 }
 0x302   : > { %vm2017_vm2 = vcmp.eq.s32.totalorder %v1967_v40, %v8191_v0  ;;  %vm2018_vm4 = vcmp.eq.s32.totalorder %v8137_v30, %v8191_v0 }
 0x303   : > { %v8205_v8 = vsel %vm2017_vm2, 0.0, %v7438_v58  ;;  %v8230_v30 = vsel %vm2018_vm4, 0.0, %v7438_v58  ;;  %vm2716_vm2 = vcmask 519168  }
 0x305   : > { %v8139_v24 = vpop.permute.xlu1 %1972  ;;  %v1976_v1 = vpop.permute.xlu0 %1975 }
 0x306   : > { %6313 = vmatpush3.bf16.xpose.msra.mxu0 %v2941_v60  ;;  %vm2019_vm1 = vcmp.eq.s32.totalorder %v8139_v24, %v8191_v0  ;;  %vm2020_vm3 = vcmp.eq.s32.totalorder %v1976_v1, %v8191_v0 }
 0x307   : > { %6508 = vmatprep.subr.msk.bf16.mxu0 %vm2193_vm0, %v2897_v6  ;;  %v8201_v5 = vsel %vm2019_vm1, 0.0, %v7438_v58 }
 0x309   : > { %v8143_v4 = vpop.permute.xlu1 %1978  ;;  %v8193_v14 = vpop.permute.xlu0 %1981 }
 0x30a   : > { %vm2021_vm6 = vcmp.eq.s32.totalorder %v8143_v4, %v8191_v0  ;;  %vm2022_vm8 = vcmp.eq.s32.totalorder %v8193_v14, %v8191_v0 }
 0x30d   : > { %v8145_v39 = vpop.permute.xlu1 %1984  ;;  %v1988_v59 = vpop.permute.xlu0 %1987 }
 0x30e   : > { %6315 = vmatpush3.bf16.xpose.msra.mxu0 %v2938_v12  ;;  %vm2023_vm5 = vcmp.eq.s32.totalorder %v8145_v39, %v8191_v0  ;;  %v2101_v39 = vld [vmem:[#allocation14 + $0x20] sm:$0xff]  ;;  %v6833_v12 = vld [vmem:[#allocation2 + $0x74] ss:$8 sps:$4 sm:$0xff]   ;;  %vm2024_vm7 = vcmp.eq.s32.totalorder %v1988_v59, %v8191_v0 }
 0x30f   : > { %6509 = vmatprep.subr.msk.bf16.mxu0 %vm2193_vm0, %v2895_v9  ;;  %v8213_v9 = vsel %vm2020_vm3, 0.0, %v7438_v58  ;;  %v8233_v24 = vsel %vm2023_vm5, 0.0, %v7438_v58  ;;  %v8250_v4 = vsel %vm2024_vm7, 0.0, %v7438_v58 }
 0x311   : > { %v8149_v32 = vpop.permute.xlu1 %1990 }
 0x312   : > { %vm2025_vm10 = vcmp.eq.s32.totalorder %v8149_v32, %v8191_v0 }
 0x315   : > { %v8151_v18 = vpop.permute.xlu1 %1996 }
 0x316   : > { %6317 = vmatpush3.bf16.xpose.msra.mxu0 %v2935_v41  ;;  %vm2027_vm9 = vcmp.eq.s32.totalorder %v8151_v18, %v8191_v0 }
 0x317   : > { %6510 = vmatprep.subr.msk.bf16.mxu0 %vm2193_vm0, %v6818_v36 }
 0x319   : > { %v8155_v26 = vpop.permute.xlu1 %2002 }
 0x31a   : > { %vm2029_vm14 = vcmp.eq.s32.totalorder %v8155_v26, %v8191_v0 }
 0x31d   : > { %6319 = vmatmul.mubr.msk.bf16.vlgmr.msra.gmra.mxu0 %vm2193_vm0, %v2841_v17  ;;  %v8158_v42 = vpop.permute.xlu1 %2008 }
 0x31e   : > { %6322 = vmatprep.mubr.msk.bf16.mxu0 %vm2193_vm0, %v2843_v34  ;;  %6367 = vmatpush3.bf16.xpose.msra.mxu0 %v3688_v37  ;;  %v2104_v34 = vld [vmem:[#allocation14 + $0x38] sm:$0xff]  ;;  %vm2031_vm13 = vcmp.eq.s32.totalorder %v8158_v42, %v8191_v0 }
 0x31f   : > { %6511 = vmatprep.subr.msk.bf16.mxu0 %vm2193_vm0, %v6819_v46  ;;  %v8303_v42 = vsel %vm2031_vm13, 0.0, %v7438_v58 }
 0x320   : > { %9312 = vst [vmem:[#allocation22_spill] sm:$0xff] %v8303_v42 }
 0x321   : > { %v8163_v33 = vpop.permute.xlu1 %3245 }
 0x322   : > { %6334 = vmatprep.subr.bf16.mxu1 %v8163_v33 }
 0x325   : > { %6323 = vmatmul.mubr.msk.bf16.gmra.mxu0 %vm2193_vm0, %v2845_v23  ;;  %v8223_v23 = vpop.permute.xlu0 %1993 }
 0x326   : > { %6326 = vmatprep.mubr.msk.bf16.mxu0 %vm2193_vm0, %v2847_v27  ;;  %6369 = vmatpush3.bf16.xpose.msra.mxu0 %v3685_v47  ;;  %v8247_v47 = vsel %vm2021_vm6, 0.0, %v7438_v58  ;;  %vm2026_vm12 = vcmp.eq.s32.totalorder %v8223_v23, %v8191_v0  ;;  %v2112_v23 = vld [vmem:[#allocation14 + $0x78] sm:$0xff] }
 0x327   : > { %6512 = vmatprep.subr.msk.bf16.mxu0 %vm2193_vm0, %v6820_v49 }
 0x329   : > { %v2000_v49 = vpop.permute.xlu0 %1999 }
 0x32a   : > { %vm2028_vm11 = vcmp.eq.s32.totalorder %v2000_v49, %v8191_v0 }
 0x32b   : > { %v8285_v32 = vsel %vm2028_vm11, 0.0, %v7438_v58 }
 0x32c   : > { %9310 = vst [vmem:[#allocation20_spill] sm:$0xff] %v8285_v32 }
 0x32d   : > { %6327 = vmatmul.mubr.msk.bf16.gmra.mxu0 %vm2193_vm0, %v2849_v25  ;;  %v2103_v25 = vld [vmem:[#allocation14 + $0x30] sm:$0xff] }
 0x32e   : > { %6330 = vmatprep.mubr.msk.bf16.mxu0 %vm2193_vm0, %v2851_v45  ;;  %6371 = vmatpush3.bf16.xpose.msra.mxu0 %v3682_v63  ;;  %v2102_v63 = vld [vmem:[#allocation14 + $0x28] sm:$0xff] }
 0x32f   : > { %6513 = vmatprep.subr.msk.bf16.mxu0 %vm2193_vm0, %v6821_v3 }
 0x335   : > { %6331 = vmatmul.mubr.msk.bf16.gmra.mxu0 %vm2193_vm0, %v2853_v2 }
 0x336   : > { %6373 = vmatpush3.bf16.xpose.msra.mxu0 %v3679_v54  ;;  %6382 = vmatprep.mubr.msk.bf16.mxu0 %vm2193_vm0, %v6822_v11  ;;  %v2107_v54 = vld [vmem:[#allocation14 + $0x50] sm:$0xff] }
 0x337   : > { %6514 = vmatprep.subr.msk.bf16.mxu0 %vm2193_vm0, %v6823_v57 }
 0x33e   : > { %6375 = vmatpush3.bf16.xpose.msra.mxu0 %v3676_v10 }
 0x33f   : > { %6515 = vmatprep.subr.msk.bf16.mxu0 %vm2193_vm0, %v6824_v22 }
 0x346   : > { %6377 = vmatpush3.bf16.xpose.msra.mxu0 %v3673_v38  ;;  %v8265_v38 = vsel %vm2022_vm8, 0.0, %v7438_v58 }
 0x347   : > { %6516 = vmatprep.subr.msk.bf16.mxu0 %vm2193_vm0, %v6825_v48  ;;  %v8268_v48 = vsel %vm2027_vm9, 0.0, %v7438_v58 }
 0x34e   : > { %6379 = vmatpush3.bf16.xpose.msra.mxu0 %v3670_v52  ;;  %v2105_v52 = vld [vmem:[#allocation14 + $0x40] sm:$0xff] }
 0x34f   : > { %6517 = vmatprep.subr.msk.bf16.mxu0 %vm2193_vm0, %v6826_v53 }
 0x356   : > { %6381 = vmatpush3.bf16.xpose.msra.mxu0 %v3667_v55  ;;  %v2006_v55 = vpop.permute.xlu0 %2005 }
 0x357   : > { %vm2030_vm1 = vcmp.eq.s32.totalorder %v2006_v55, %v8191_v0 }
 0x35d   : > { %6383 = vmatmul.mubr.msk.bf16.vlgmr.msra.gmra.mxu0 %vm2193_vm0, %v6827_v35  ;;  %v2108_v35 = vld [vmem:[#allocation14 + $0x58] sm:$0xff] }
 0x35e   : > { %6386 = vmatprep.mubr.msk.bf16.mxu0 %vm2193_vm0, %v6828_v56 }
 0x365   : > { %6387 = vmatmul.mubr.msk.bf16.gmra.mxu0 %vm2193_vm0, %v6829_v44 }
 0x366   : > { %6390 = vmatprep.mubr.msk.bf16.mxu0 %vm2193_vm0, %v6830_v51  ;;  %v8282_v51 = vsel %vm2025_vm10, 0.0, %v7438_v58 }
 0x36b   : > { %v6256_v61 = vpop.f32.mrf.mxu1 }
 0x36c   : > { %v2285_v62 = vadd.f32 %v6256_v61, %v2099_v19  ;;  %v2106_v19 = vld [vmem:[#allocation14 + $0x48] sm:$0xff] }
 0x36d   : > { %v2276_v50 = vpop.f32.mrf.mxu1  ;;  %6391 = vmatmul.mubr.msk.bf16.gmra.mxu0 %vm2193_vm0, %v6831_v31 }
 0x36e   : > { %v2277_v16 = vadd.f32 %v2276_v50, %v2097_v29  ;;  %6394 = vmatprep.mubr.msk.bf16.mxu0 %vm2193_vm0, %v6832_v43  ;;  %v8210_v6 = vadd.f32 %v2285_v62, %v8201_v5  ;;  %v2111_v29 = vld [vmem:[#allocation14 + $0x70] sm:$0xff]  ;;  %v8300_v50 = vsel %vm2026_vm12, 0.0, %v7438_v58 }
 0x36f   : > { %v6257_v13 = vpop.f32.mrf.mxu1  ;;  %9311 = vst [vmem:[#allocation21_spill] sm:$0xff] %v8300_v50 }
 0x370   : > { %v2288_v17 = vadd.f32 %v6257_v13, %v2100_v7  ;;  %2359 = vmax.xlane.f32.xlu0 %v8210_v6  ;;  %v8221_v21 = vadd.f32 %v2277_v16, %v8205_v8  ;;  %v2012_v7 = vpop.permute.xlu0 %2011  ;;  %v2109_v13 = vld [vmem:[#allocation14 + $0x60] sm:$0xff] }
 0x371   : > { %v2279_v20 = vpop.f32.mrf.mxu1  ;;  %vm2032_vm15 = vcmp.eq.s32.totalorder %v2012_v7, %v8191_v0 }
 0x372   : > { %v2280_v2 = vadd.f32 %v2279_v20, %v2098_v15  ;;  %2355 = vmax.xlane.f32.xlu1 %v8221_v21  ;;  %v8227_v28 = vadd.f32 %v2288_v17, %v8213_v9  ;;  %v8320_v26 = vsel %vm2032_vm15, 0.0, %v7438_v58 }
 0x373   : > { %v6260_v60 = vpop.f32.mrf.mxu1 }
 0x374   : > { %v2301_v41 = vadd.f32 %v6260_v60, %v2103_v25  ;;  %2361 = vmax.xlane.f32.xlu0 %v8227_v28  ;;  %v8241_v46 = vadd.f32 %v2280_v2, %v8230_v30  ;;  %v8317_v60 = vsel %vm2029_vm14, 0.0, %v7438_v58 }
 0x375   : > { %v2292_v36 = vpop.f32.mrf.mxu1  ;;  %6395 = vmatmul.mubr.msk.bf16.gmra.mxu0 %vm2193_vm0, %v6833_v12  ;;  %9313 = vst [vmem:[#allocation23_spill] sm:$0xff] %v8317_v60  ;;  %v2110_v12 = vld [vmem:[#allocation14 + $0x68] sm:$0xff] }
 0x376   : > { %v2293_v37 = vadd.f32 %v2292_v36, %v2101_v39  ;;  %v8244_v27 = vadd.f32 %v2301_v41, %v8233_v24 }
 0x377   : > { %v6261_v45 = vpop.f32.mrf.mxu1 }
 0x378   : > { %v2304_v3 = vadd.f32 %v6261_v45, %v2104_v34  ;;  %2357 = vmax.xlane.f32.xlu0 %v8241_v46  ;;  %2367 = vmax.xlane.f32.xlu1 %v8244_v27  ;;  %v8262_v22 = vadd.f32 %v2293_v37, %v8247_v47  ;;  %v8332_v45 = vsel %vm2030_vm1, 0.0, %v7438_v58 }
 0x379   : > { %v2295_v11 = vpop.f32.mrf.mxu1  ;;  %9314 = vst [vmem:[#allocation24_spill] sm:$0xff] %v8332_v45 }
 0x37a   : > { %v2296_v57 = vadd.f32 %v2295_v11, %v2102_v63  ;;  %v8259_v10 = vadd.f32 %v2304_v3, %v8250_v4  ;;  %v2784_v63 = vld [vmem:[#allocation14 + $0x90] sm:$0xff]  ;;  %v2782_v11 = vld [vmem:[#allocation14 + $0x80] sm:$0xff] }
 0x37b   : > { %v6264_v18 = vpop.f32.mrf.mxu1 }
 0x37c   : > { %v2317_v53 = vadd.f32 %v6264_v18, %v2107_v54  ;;  %2369 = vmax.xlane.f32.xlu0 %v8259_v10  ;;  %2363 = vmax.xlane.f32.xlu1 %v8262_v22  ;;  %v8276_v1 = vadd.f32 %v2296_v57, %v8265_v38  ;;  %v8340_v57 = vpop.permute.xlu1 %3241 }
 0x37d   : > { %v2308_v40 = vpop.f32.mrf.mxu1 }
 0x37e   : > { %v2309_v56 = vadd.f32 %v2308_v40, %v2105_v52  ;;  %v8279_v44 = vadd.f32 %v2317_v53, %v8268_v48  ;;  %v2785_v52 = vld [vmem:[#allocation14 + $0x98] sm:$0xff]  ;;  %v2783_v40 = vld [vmem:[#allocation14 + $0x88] sm:$0xff] }
 0x37f   : > { %v6265_v14 = vpop.f32.mrf.mxu1 }
 0x380   : > { %v2320_v59 = vadd.f32 %v6265_v14, %v2108_v35  ;;  %2365 = vmax.xlane.f32.xlu0 %v8276_v1  ;;  %2375 = vmax.xlane.f32.xlu1 %v8279_v44  ;;  %v8297_v43 = vadd.f32 %v2309_v56, %v8282_v51  ;;  %v8349_v14 = vpop.permute.xlu0 %3243 }
 0x381   : > { %v2311_v61 = vpop.f32.mrf.mxu1 }
 0x382   : > { %v2312_v31 = vadd.f32 %v2311_v61, %v2106_v19  ;;  %v8294_v62 = vadd.f32 %v2320_v59, %v8285_v32 }
 0x383   : > { %v6268_v16 = vpop.f32.mrf.mxu1 }
 0x384   : > { %v2333_v15 = vadd.f32 %v6268_v16, %v2111_v29  ;;  %2377 = vmax.xlane.f32.xlu0 %v8294_v62  ;;  %2371 = vmax.xlane.f32.xlu1 %v8297_v43  ;;  %v8311_v25 = vadd.f32 %v2312_v31, %v8300_v50  ;;  %v8355_v29 = vpop.permute.xlu1 %3239  ;;  %v2788_v31 = vld [vmem:[#allocation14 + $0xb0] sm:$0xff]  ;;  %v2786_v16 = vld [vmem:[#allocation14 + $0xa0] sm:$0xff] }
 0x385   : > { %v2324_v17 = vpop.f32.mrf.mxu1 }
 0x386   : > { %v2325_v20 = vadd.f32 %v2324_v17, %v2109_v13  ;;  %v8314_v2 = vadd.f32 %v2333_v15, %v8303_v42 }
 0x387   : > { %v6269_v39 = vpop.f32.mrf.mxu1 }
 0x388   : > { %v2336_v41 = vadd.f32 %v6269_v39, %v2112_v23  ;;  %2373 = vmax.xlane.f32.xlu0 %v8311_v25  ;;  %2383 = vmax.xlane.f32.xlu1 %v8314_v2  ;;  %v8329_v49 = vadd.f32 %v2325_v20, %v8317_v60  ;;  %v8361_v20 = vpop.permute.xlu0 %3237  ;;  %v2789_v39 = vld [vmem:[#allocation14 + $0xb8] sm:$0xff] }
 0x389   : > { %v2327_v36 = vpop.f32.mrf.mxu1 }
 0x38a   : > { %v2328_v34 = vadd.f32 %v2327_v36, %v2110_v12  ;;  %v8326_v37 = vadd.f32 %v2336_v41, %v8320_v26  ;;  %v8367_v36 = vpop.permute.xlu1 %3235 }
 0x38c   : > { %2385 = vmax.xlane.f32.xlu0 %v8326_v37  ;;  %2379 = vmax.xlane.f32.xlu1 %v8329_v49  ;;  %v8337_v0 = vadd.f32 %v2328_v34, %v8332_v45 }
 0x390   : > { %2381 = vmax.xlane.f32.xlu0 %v8337_v0 }
 0x3dd   : > { %v6320_v3 = vpop.f32.mrf.mxu0 }
 0x3de   : > { %v3001_v54 = vadd.f32 %v6320_v3, %v2784_v63 }
 0x3df   : > { %v2992_v18 = vpop.f32.mrf.mxu0 }
 0x3e0   : > { %v2993_v53 = vadd.f32 %v2992_v18, %v2782_v11  ;;  %v8343_v58 = vadd.f32 %v3001_v54, %v8201_v5  ;;  %v2787_v11 = vld [vmem:[#allocation14 + $0xa8] sm:$0xff]  ;;  %v8374_v18 = vpop.permute.xlu0 %3233 }
 0x3e1   : > { %v6321_v55 = vpop.f32.mrf.mxu0 }
 0x3e2   : > { %v3004_v35 = vadd.f32 %v6321_v55, %v2785_v52  ;;  %3075 = vmax.xlane.f32.xlu0 %v8343_v58  ;;  %v8347_v56 = vadd.f32 %v2993_v53, %v8205_v8  ;;  %v2793_v53 = vld [vmem:[#allocation14 + $0xd8] sm:$0xff] }
 0x3e3   : > { %v2995_v19 = vpop.f32.mrf.mxu0 }
 0x3e4   : > { %v2996_v59 = vadd.f32 %v2995_v19, %v2783_v40  ;;  %3071 = vmax.xlane.f32.xlu1 %v8347_v56  ;;  %v8353_v61 = vadd.f32 %v3004_v35, %v8213_v9  ;;  %v8379_v35 = vpop.permute.xlu1 %3231  ;;  %v2792_v19 = vld [vmem:[#allocation14 + $0xd0] sm:$0xff] }
 0x3e5   : > { %v6324_v7 = vpop.f32.mrf.mxu0 }
 0x3e6   : > { %3077 = vmax.xlane.f32.xlu0 %v8353_v61  ;;  %v3017_v15 = vadd.f32 %v6324_v7, %v2788_v31  ;;  %v8359_v23 = vadd.f32 %v2996_v59, %v8230_v30  ;;  %v2791_v31 = vld [vmem:[#allocation14 + $0xc8] sm:$0xff] }
 0x3e7   : > { %v3008_v13 = vpop.f32.mrf.mxu0 }
 0x3e8   : > { %v3009_v17 = vadd.f32 %v3008_v13, %v2786_v16  ;;  %v8371_v3 = vadd.f32 %v3017_v15, %v8233_v24  ;;  %v2790_v15 = vld [vmem:[#allocation14 + $0xc0] sm:$0xff] }
 0x3e9   : > { %v6325_v12 = vpop.f32.mrf.mxu0 }
 0x3ea   : > { %3073 = vmax.xlane.f32.xlu0 %v8359_v23  ;;  %v8365_v41 = vadd.f32 %v3009_v17, %v8247_v47  ;;  %v3020_v63 = vadd.f32 %v6325_v12, %v2789_v39  ;;  %9316 = vst [vmem:[#allocation26_spill] sm:$0xff] %v8371_v3 }
 0x3eb   : > { %v3011_v34 = vpop.f32.mrf.mxu0 }
 0x3ec   : > { %9315 = vst [vmem:[#allocation25_spill] sm:$0xff] %v8365_v41  ;;  %3079 = vmax.xlane.f32.xlu1 %v8365_v41  ;;  %v3012_v55 = vadd.f32 %v3011_v34, %v2787_v11  ;;  %v8377_v40 = vadd.f32 %v3020_v63, %v8250_v4  ;;  %v8388_v34 = vpop.permute.xlu0 %4355  ;;  %v8392_v11 = vpop.permute.xlu1 %4353 }
 0x3ed   : > { %v6328_v54 = vpop.f32.mrf.mxu0  ;;  %9320 = vst [vmem:[#allocation30_spill] sm:$0xff] %v8388_v34  ;;  %9321 = vst [vmem:[#allocation31_spill] sm:$0xff] %v8392_v11  ;;  %v2795_v34 = vld [vmem:[#allocation14 + $0xe8] sm:$0xff] }
 0x3ee   : > { %3083 = vmax.xlane.f32.xlu0 %v8371_v3  ;;  %9317 = vst [vmem:[#allocation27_spill] sm:$0xff] %v8377_v40  ;;  %v3033_v13 = vadd.f32 %v6328_v54, %v2792_v19  ;;  %v8383_v39 = vadd.f32 %v3012_v55, %v8265_v38  ;;  %v2797_v54 = vld [vmem:[#allocation14 + $0xf8] sm:$0xff] }
 0x3ef   : > { %v3024_v52 = vpop.f32.mrf.mxu0 }
 0x3f0   : > { %9318 = vst [vmem:[#allocation28_spill] sm:$0xff] %v8383_v39  ;;  %v8395_v19 = vadd.f32 %v3033_v13, %v8268_v48 }
 0x3f1   : > { %v6329_v59 = vpop.f32.mrf.mxu0 }
 0x3f2   : > { %v3036_v7 = vadd.f32 %v6329_v59, %v2793_v53  ;;  %3085 = vmax.xlane.f32.xlu0 %v8377_v40  ;;  %v3025_v53 = vadd.f32 %v3024_v52, %v2790_v15  ;;  %v2794_v40 = vld [vmem:[#allocation14 + $0xe0] sm:$0xff] }
 0x3f3   : > { %v3027_v16 = vpop.f32.mrf.mxu0 }
 0x3f4   : > { %v3028_v17 = vadd.f32 %v3027_v16, %v2791_v31  ;;  %v8386_v12 = vadd.f32 %v3036_v7, %v8285_v32  ;;  %v2796_v31 = vld [vmem:[#allocation14 + $0xf0] sm:$0xff]  ;;  %v8403_v52 = vadd.f32 %v3025_v53, %v8282_v51 }
 0x3f5   : > { %v6332_v63 = vpop.f32.mrf.mxu0 }
 0x3f6   : > { %9319 = vst [vmem:[#allocation29_spill] sm:$0xff] %v8386_v12  ;;  %3081 = vmax.xlane.f32.xlu0 %v8383_v39  ;;  %3093 = vmax.xlane.f32.xlu1 %v8386_v12  ;;  %v8398_v55 = vadd.f32 %v3028_v17, %v8300_v50  ;;  %v3049_v15 = vadd.f32 %v6332_v63, %v2796_v31 }
 0x3f7   : > { %v3040_v59 = vpop.f32.mrf.mxu0 }
 0x3f8   : > { %9322 = vst [vmem:[#allocation32_spill] sm:$0xff] %v8398_v55  ;;  %v8414_v63 = vadd.f32 %v3049_v15, %v8303_v42 }
 0x3f9   : > { %v2360_v7 = vpop.xlane.xlu0 %2359  ;;  %v6333_v16 = vpop.f32.mrf.mxu0 }
 0x3fa   : > { %v3052_v3 = vadd.f32 %v6333_v16, %v2797_v54  ;;  %3091 = vmax.xlane.f32.xlu0 %v8395_v19  ;;  %3089 = vmax.xlane.f32.xlu1 %v8398_v55  ;;  %v2389_v16 = vsub.f32 %v8210_v6, %v2360_v7  ;;  %v3041_v55 = vadd.f32 %v3040_v59, %v2794_v40 }
 0x3fb   : > { %v2356_v12 = vpop.xlane.xlu1 %2355  ;;  %v3043_v11 = vpop.f32.mrf.mxu0 }
 0x3fc   : > { %v2387_v13 = vsub.f32 %v8221_v21, %v2356_v12  ;;  %v3044_v39 = vadd.f32 %v3043_v11, %v2795_v34  ;;  %v8407_v17 = vadd.f32 %v3052_v3, %v8320_v26 }
 0x3fd   : > { %v2362_v41 = vpop.xlane.xlu0 %2361 }
 0x3fe   : > { %v2390_v54 = vsub.f32 %v8227_v28, %v2362_v41  ;;  %3087 = vmax.xlane.f32.xlu0 %v8403_v52  ;;  %3101 = vmax.xlane.f32.xlu1 %v8407_v17  ;;  %v2403_v53 = vmul.f32 1.442695, %v2387_v13  ;;  %v8417_v21 = vadd.f32 %v3044_v39, %v8332_v45  ;;  %v2407_v28 = vmul.f32 1.442695, %v2389_v16 }
 0x3ff   : > { %v8423_v41 = vadd.f32 %v3041_v55, %v8317_v60 }
 0x400   : > { %v2409_v3 = vmul.f32 1.442695, %v2390_v54  ;;  %6965 = vpow2.f32 %v2403_v53 }
 0x401   : > { %v2358_v12 = vpop.xlane.xlu0 %2357  ;;  %v2368_v34 = vpop.xlane.xlu1 %2367 }
 0x402   : > { %v2388_v11 = vsub.f32 %v8241_v46, %v2358_v12  ;;  %3099 = vmax.xlane.f32.xlu0 %v8414_v63  ;;  %3097 = vmax.xlane.f32.xlu1 %v8417_v21  ;;  %6967 = vpow2.f32 %v2409_v3  ;;  %v2393_v46 = vsub.f32 %v8244_v27, %v2368_v34 }
 0x404   : > { %v2405_v6 = vmul.f32 1.442695, %v2388_v11  ;;  %v2415_v16 = vmul.f32 1.442695, %v2393_v46 }
 0x405   : > { %v2370_v40 = vpop.xlane.xlu0 %2369  ;;  %v2364_v59 = vpop.xlane.xlu1 %2363 }
 0x406   : > { %6969 = vpow2.f32 %v2405_v6  ;;  %v2394_v39 = vsub.f32 %v8259_v10, %v2370_v40  ;;  %v2391_v31 = vsub.f32 %v8262_v22, %v2364_v59  ;;  %3095 = vmax.xlane.f32.xlu0 %v8423_v41  ;;  %v6834_v40 = vld [vmem:[#allocation3 + $0x44] ss:$8 sps:$4 sm:$0xff]  }
 0x407   : > { %6971 = vpow2.f32 %v2407_v28 }
 0x408   : > { %v2417_v7 = vmul.f32 1.442695, %v2394_v39  ;;  %v2411_v15 = vmul.f32 1.442695, %v2391_v31 }
 0x409   : > { %v2366_v13 = vpop.xlane.xlu0 %2365  ;;  %v2376_v54 = vpop.xlane.xlu1 %2375 }
 0x40a   : > { %v2392_v55 = vsub.f32 %v8276_v1, %v2366_v13  ;;  %6973 = vpow2.f32 %v2417_v7  ;;  %v2397_v27 = vsub.f32 %v8279_v44, %v2376_v54 }
 0x40b   : > { %6975 = vpow2.f32 %v2411_v15 }
 0x40c   : > { %v2413_v53 = vmul.f32 1.442695, %v2392_v55  ;;  %v2423_v46 = vmul.f32 1.442695, %v2397_v27  ;;  %v3548_v27 = vld [vmem:[#allocation14 + $0x110] sm:$0xff] }
 0x40d   : > { %v2378_v3 = vpop.xlane.xlu0 %2377  ;;  %v2372_v12 = vpop.xlane.xlu1 %2371 }
 0x40e   : > { %6977 = vpow2.f32 %v2413_v53  ;;  %v2398_v10 = vsub.f32 %v8294_v62, %v2378_v3  ;;  %v2395_v22 = vsub.f32 %v8297_v43, %v2372_v12  ;;  %v8433_v11 = vpop.eup %6965 }
 0x40f   : > { %6979 = vpow2.f32 %v2415_v16  ;;  %v8435_v59 = vpop.eup %6967 }
 0x410   : > { %v2425_v34 = vmul.f32 1.442695, %v2398_v10  ;;  %v2419_v28 = vmul.f32 1.442695, %v2395_v22 }
 0x411   : > { %v2374_v6 = vpop.xlane.xlu0 %2373  ;;  %v2384_v1 = vpop.xlane.xlu1 %2383 }
 0x412   : > { %v2396_v39 = vsub.f32 %v8311_v25, %v2374_v6  ;;  %6981 = vpow2.f32 %v2425_v34  ;;  %v2401_v55 = vsub.f32 %v8314_v2, %v2384_v1  ;;  %v3546_v6 = vld [vmem:[#allocation14 + $0x100] sm:$0xff] }
 0x413   : > { %v8438_v31 = vpop.eup %6969  ;;  %4349 = vrot.lane.b32.xlu1 %v6834_v40, %s7437_s24  ;;  %6983 = vpow2.f32 %v2419_v28 }
 0x414   : > { %v8441_v62 = vpop.eup %6971  ;;  %v2421_v44 = vmul.f32 1.442695, %v2396_v39  ;;  %v2467_v43 = vpack.c.bf16 %v8438_v31, %v8433_v11 }
 0x415   : > { %v2386_v7 = vpop.xlane.xlu0 %2385  ;;  %v2380_v15 = vpop.xlane.xlu1 %2379  ;;  %v2468_v13 = vpack.c.bf16 %v8435_v59, %v8441_v62 }
 0x416   : > { %6985 = vpow2.f32 %v2421_v44  ;;  %v2402_v25 = vsub.f32 %v8326_v37, %v2386_v7  ;;  %v2399_v54 = vsub.f32 %v8329_v49, %v2380_v15  ;;  %6286 = vmatprep.mubr.bf16.mxu1 %v2467_v43  ;;  %v2431_v49 = vmul.f32 1.442695, %v2401_v55  ;;  %v3549_v44 = vld [vmem:[#allocation14 + $0x118] sm:$0xff] }
 0x417   : > { %6987 = vpow2.f32 %v2423_v46  ;;  %6287 = vmatmul.mubr.bf16.vlgmr.msra.gmra.mxu1 %v2468_v13  ;;  %v8451_v53 = vpop.eup %6973 }
 0x418   : > { %v2433_v16 = vmul.f32 1.442695, %v2402_v25  ;;  %6335 = vmatpush3.bf16.msra.mxu1 %v8163_v33  ;;  %v2427_v3 = vmul.f32 1.442695, %v2399_v54  ;;  %v8454_v10 = vpop.eup %6975 }
 0x419   : > { %6336 = vmatprep.subr.bf16.mxu1 %v8349_v14  ;;  %v2382_v12 = vpop.xlane.xlu0 %2381 }
 0x41a   : > { %v2400_v37 = vsub.f32 %v8337_v0, %v2382_v12  ;;  %6989 = vpow2.f32 %v2433_v16 }
 0x41b   : > { %v8457_v22 = vpop.eup %6977  ;;  %6991 = vpow2.f32 %v2427_v3 }
 0x41c   : > { %v8459_v34 = vpop.eup %6979  ;;  %v2429_v2 = vmul.f32 1.442695, %v2400_v37  ;;  %6337 = vmatpush3.bf16.msra.mxu1 %v8349_v14  ;;  %v2469_v33 = vpack.c.bf16 %v8457_v22, %v8454_v10 }
 0x41d   : > { %6338 = vmatprep.subr.bf16.mxu1 %v8340_v57  ;;  %v6384_v28 = vpop.f32.mrf.mxu0  ;;  %v2470_v0 = vpack.c.bf16 %v8451_v53, %v8459_v34 }
 0x41e   : > { %6993 = vpow2.f32 %v2429_v2  ;;  %6290 = vmatprep.mubr.bf16.mxu1 %v2469_v33  ;;  %v3733_v1 = vadd.f32 %v6384_v28, %v3548_v27 }
 0x41f   : > { %6995 = vpow2.f32 %v2431_v49  ;;  %6291 = vmatmul.mubr.bf16.gmra.mxu1 %v2470_v0  ;;  %v3724_v40 = vpop.f32.mrf.mxu0  ;;  %v8471_v46 = vpop.eup %6981  ;;  %v3547_v0 = vld [vmem:[#allocation14 + $0x108] sm:$0xff] }
 0x420   : > { %6339 = vmatpush3.bf16.msra.mxu1 %v8340_v57  ;;  %v3725_v14 = vadd.f32 %v3724_v40, %v3546_v6  ;;  %v8469_v39 = vadd.f32 %v3733_v1, %v8201_v5  ;;  %9323 = vst [vmem:[#allocation33_spill] sm:$0xff] %v8471_v46  ;;  %v8474_v7 = vpop.eup %6983  ;;  %v3552_v40 = vld [vmem:[#allocation14 + $0x130] sm:$0xff] }
 0x421   : > { %6340 = vmatprep.subr.bf16.mxu1 %v8355_v29  ;;  %v6385_v43 = vpop.f32.mrf.mxu0  ;;  %9324 = vst [vmem:[#allocation34_spill] sm:$0xff] %v8474_v7 }
 0x422   : > { %3807 = vmax.xlane.f32.xlu0 %v8469_v39  ;;  %v3736_v57 = vadd.f32 %v6385_v43, %v3549_v44  ;;  %v8485_v55 = vadd.f32 %v3725_v14, %v8205_v8 }
 0x423   : > { %v8477_v15 = vpop.eup %6985  ;;  %v3727_v13 = vpop.f32.mrf.mxu0 }
 0x424   : > { %9325 = vst [vmem:[#allocation35_spill] sm:$0xff] %v8477_v15  ;;  %v8479_v25 = vpop.eup %6987  ;;  %6341 = vmatpush3.bf16.msra.mxu1 %v8355_v29  ;;  %v2471_v54 = vpack.c.bf16 %v8477_v15, %v8474_v7  ;;  %v8493_v29 = vadd.f32 %v3736_v57, %v8213_v9  ;;  %v3728_v1 = vadd.f32 %v3727_v13, %v3547_v0  ;;  %v3553_v57 = vld [vmem:[#allocation14 + $0x138] sm:$0xff]  ;;  %v3555_v0 = vld [vmem:[#allocation14 + $0x148] sm:$0xff] }
 0x425   : > { %9326 = vst [vmem:[#allocation36_spill] sm:$0xff] %v8479_v25  ;;  %6342 = vmatprep.subr.bf16.mxu1 %v8361_v20  ;;  %v6388_v16 = vpop.f32.mrf.mxu0  ;;  %v2472_v3 = vpack.c.bf16 %v8471_v46, %v8479_v25 }
 0x426   : > { %6294 = vmatprep.mubr.bf16.mxu1 %v2471_v54  ;;  %3803 = vmax.xlane.f32.xlu0 %v8485_v55  ;;  %v3749_v44 = vadd.f32 %v6388_v16, %v3552_v40  ;;  %v8518_v43 = vadd.f32 %v3728_v1, %v8230_v30  ;;  %v6836_v1 = vld [vmem:[#allocation3 + $0x54] ss:$8 sps:$4 sm:$0xff]  }
 0x427   : > { %6295 = vmatmul.mubr.bf16.gmra.mxu1 %v2472_v3  ;;  %v3740_v12 = vpop.f32.mrf.mxu0  ;;  %v8495_v37 = vpop.eup %6989  ;;  %v3551_v3 = vld [vmem:[#allocation14 + $0x128] sm:$0xff] }
 0x428   : > { %6343 = vmatpush3.bf16.msra.mxu1 %v8361_v20  ;;  %9327 = vst [vmem:[#allocation37_spill] sm:$0xff] %v8495_v37  ;;  %v8498_v49 = vpop.eup %6991  ;;  %v8522_v13 = vadd.f32 %v3749_v44, %v8233_v24  ;;  %v3560_v44 = vld [vmem:[#allocation14 + $0x170] sm:$0xff] }
 0x429   : > { %6344 = vmatprep.subr.bf16.mxu1 %v8367_v36  ;;  %9328 = vst [vmem:[#allocation38_spill] sm:$0xff] %v8498_v49  ;;  %v6389_v27 = vpop.f32.mrf.mxu0 }
 0x42a   : > { %3809 = vmax.xlane.f32.xlu0 %v8493_v29 }
 0x42b   : > { %v8501_v2 = vpop.eup %6993  ;;  %v3743_v6 = vpop.f32.mrf.mxu0 }
 0x42c   : > { %9329 = vst [vmem:[#allocation39_spill] sm:$0xff] %v8501_v2  ;;  %v8503_v33 = vpop.eup %6995  ;;  %6345 = vmatpush3.bf16.msra.mxu1 %v8367_v36  ;;  %v2473_v20 = vpack.c.bf16 %v8501_v2, %v8498_v49  ;;  %v8513_v36 = vld [vmem:[#allocation4 + $0x74] ss:$8 sps:$4 sm:$0xff]  }
 0x42d   : > { %9330 = vst [vmem:[#allocation40_spill] sm:$0xff] %v8503_v33  ;;  %6346 = vmatprep.subr.bf16.mxu1 %v8374_v18  ;;  %v2474_v28 = vpack.c.bf16 %v8495_v37, %v8503_v33  ;;  %v6392_v14 = vpop.f32.mrf.mxu0  ;;  %v6838_v2 = vld [vmem:[#allocation3 + $0x14] ss:$8 sps:$4 sm:$0xff]  }
 0x42e   : > { %6298 = vmatprep.mubr.bf16.mxu1 %v2473_v20 }
 0x42f   : > { %6299 = vmatmul.mubr.bf16.gmra.mxu1 %v2474_v28  ;;  %v3756_v54 = vpop.f32.mrf.mxu0  ;;  %v3744_v28 = vadd.f32 %v3743_v6, %v3551_v3 }
 0x430   : > { %6347 = vmatpush3.bf16.msra.mxu1 %v8374_v18  ;;  %v3752_v18 = vadd.f32 %v6389_v27, %v3553_v57 }
 0x431   : > { %6348 = vmatprep.subr.bf16.mxu1 %v8379_v35  ;;  %v6393_v20 = vpop.f32.mrf.mxu0  ;;  %v8531_v27 = vadd.f32 %v3744_v28, %v8265_v38  ;;  %v6837_v28 = vld [vmem:[#allocation3 + $0x24] ss:$8 sps:$4 sm:$0xff]  }
 0x433   : > { %v3759_v16 = vpop.f32.mrf.mxu0 }
 0x434   : > { %6349 = vmatpush3.bf16.msra.mxu1 %v8379_v35  ;;  %v8526_v35 = vadd.f32 %v3752_v18, %v8250_v4  ;;  %v3760_v40 = vadd.f32 %v3759_v16, %v3555_v0  ;;  %v3556_v0 = vld [vmem:[#allocation14 + $0x150] sm:$0xff] }
 0x435   : > { %6398 = vmatprep.subr.bf16.mxu1 %v8513_v36  ;;  %v6396_v57 = vpop.f32.mrf.mxu0  ;;  %v3765_v37 = vadd.f32 %v6392_v14, %v3556_v0 }
 0x436   : > { %v8535_v6 = vadd.f32 %v3760_v40, %v8300_v50  ;;  %v3781_v18 = vadd.f32 %v6396_v57, %v3560_v44  ;;  %v3554_v40 = vld [vmem:[#allocation14 + $0x140] sm:$0xff]  ;;  %v3561_v50 = vld [vmem:[#allocation14 + $0x178] sm:$0xff] }
 0x437   : > { %3805 = vmax.xlane.f32.xlu1 %v8518_v43  ;;  %v8549_v44 = vadd.f32 %v3765_v37, %v8268_v48  ;;  %v3757_v57 = vadd.f32 %v3756_v54, %v3554_v40 }
 0x438   : > { %v8539_v3 = vadd.f32 %v3781_v18, %v8303_v42  ;;  %v3557_v18 = vld [vmem:[#allocation14 + $0x158] sm:$0xff] }
 0x43b   : > { %3815 = vmax.xlane.f32.xlu1 %v8522_v13 }
 0x43f   : > { %3817 = vmax.xlane.f32.xlu1 %v8526_v35 }
 0x440   : > { %4351 = vrot.lane.b32.xlu0 %v6836_v1, %s7437_s24  ;;  %v3550_v1 = vld [vmem:[#allocation14 + $0x120] sm:$0xff] }
 0x441   : > { %v3741_v16 = vadd.f32 %v3740_v12, %v3550_v1  ;;  %v8553_v12 = vadd.f32 %v3757_v57, %v8282_v51  ;;  %v3768_v1 = vadd.f32 %v6393_v20, %v3557_v18 }
 0x443   : > { %3813 = vmax.xlane.f32.xlu1 %v8531_v27  ;;  %v8544_v33 = vadd.f32 %v3741_v16, %v8247_v47  ;;  %v3772_v16 = vpop.f32.mrf.mxu0  ;;  %v8557_v14 = vadd.f32 %v3768_v1, %v8285_v32 }
 0x447   : > { %3821 = vmax.xlane.f32.xlu1 %v8535_v6 }
 0x44b   : > { %3831 = vmax.xlane.f32.xlu1 %v8539_v3 }
 0x45c   : > { %4345 = vrot.lane.b32.xlu1 %v6837_v28, %s7437_s24  ;;  %v3558_v28 = vld [vmem:[#allocation14 + $0x160] sm:$0xff] }
 0x45d   : > { %v3773_v0 = vadd.f32 %v3772_v16, %v3558_v28 }
 0x45f   : > { %3811 = vmax.xlane.f32.xlu0 %v8544_v33 }
 0x460   : > { %4343 = vrot.lane.b32.xlu1 %v6838_v2, %s7437_s24  ;;  %v8561_v2 = vadd.f32 %v3773_v0, %v8317_v60 }
 0x463   : > { %3823 = vmax.xlane.f32.xlu0 %v8549_v44 }
 0x467   : > { %3819 = vmax.xlane.f32.xlu0 %v8553_v12 }
 0x46b   : > { %3825 = vmax.xlane.f32.xlu0 %v8557_v14  ;;  %v3076_v37 = vpop.xlane.xlu0 %3075 }
 0x46c   : > { %v3105_v18 = vsub.f32 %v8343_v58, %v3076_v37  ;;  %v9333_v37 = vld [vmem:[#allocation26_spill] sm:$0xff] }
 0x46d   : > { %v3072_v54 = vpop.xlane.xlu1 %3071 }
 0x46e   : > { %v3103_v40 = vsub.f32 %v8347_v56, %v3072_v54  ;;  %v3123_v28 = vmul.f32 1.442695, %v3105_v18  ;;  %v6397_v56 = vpop.f32.mrf.mxu0  ;;  %v9331_v54 = vld [vmem:[#allocation25_spill] sm:$0xff] }
 0x46f   : > { %3827 = vmax.xlane.f32.xlu0 %v8561_v2  ;;  %v3078_v20 = vpop.xlane.xlu0 %3077 }
 0x470   : > { %v3106_v57 = vsub.f32 %v8353_v61, %v3078_v20  ;;  %v3119_v46 = vmul.f32 1.442695, %v3103_v40  ;;  %v9332_v20 = vld [vmem:[#allocation27_spill] sm:$0xff]  ;;  %v3775_v60 = vpop.f32.mrf.mxu0 }
 0x472   : > { %v3125_v1 = vmul.f32 1.442695, %v3106_v57  ;;  %6997 = vpow2.f32 %v3119_v46  ;;  %v3784_v57 = vadd.f32 %v6397_v56, %v3561_v50  ;;  %v6839_v56 = vld [vmem:[#allocation3 + $0x34] ss:$8 sps:$4 sm:$0xff]  }
 0x473   : > { %v3074_v49 = vpop.xlane.xlu0 %3073 }
 0x474   : > { %v3104_v16 = vsub.f32 %v8359_v23, %v3074_v49  ;;  %6999 = vpow2.f32 %v3125_v1  ;;  %v3559_v49 = vld [vmem:[#allocation14 + $0x168] sm:$0xff] }
 0x475   : > { %v3080_v0 = vpop.xlane.xlu1 %3079 }
 0x476   : > { %v3121_v15 = vmul.f32 1.442695, %v3104_v16  ;;  %v3107_v7 = vsub.f32 %v9331_v54, %v3080_v0  ;;  %v9334_v16 = vld [vmem:[#allocation28_spill] sm:$0xff]  ;;  %v3776_v0 = vadd.f32 %v3775_v60, %v3559_v49  ;;  %v9336_v60 = vld [vmem:[#allocation29_spill] sm:$0xff] }
 0x477   : > { %v3084_v25 = vpop.xlane.xlu0 %3083 }
 0x478   : > { %7001 = vpow2.f32 %v3121_v15  ;;  %v3109_v40 = vsub.f32 %v9333_v37, %v3084_v25  ;;  %v3127_v23 = vmul.f32 1.442695, %v3107_v7 }
 0x479   : > { %7003 = vpow2.f32 %v3123_v28  ;;  %v8573_v28 = vadd.f32 %v3784_v57, %v8320_v26  ;;  %v8589_v57 = vadd.f32 %v3776_v0, %v8332_v45  ;;  %v6841_v0 = vld [vmem:[#allocation4 + $0x64] ss:$8 sps:$4 sm:$0xff]  }
 0x47a   : > { %v3131_v15 = vmul.f32 1.442695, %v3109_v40  ;;  %7005 = vpow2.f32 %v3127_v23 }
 0x47b   : > { %v3086_v61 = vpop.xlane.xlu0 %3085 }
 0x47c   : > { %v3110_v58 = vsub.f32 %v9332_v20, %v3086_v61  ;;  %v9335_v20 = vld [vmem:[#allocation32_spill] sm:$0xff] }
 0x47e   : > { %v3133_v46 = vmul.f32 1.442695, %v3110_v58 }
 0x47f   : > { %v3082_v18 = vpop.xlane.xlu0 %3081  ;;  %v3094_v1 = vpop.xlane.xlu1 %3093 }
 0x480   : > { %v3108_v32 = vsub.f32 %v9334_v16, %v3082_v18  ;;  %v8575_v42 = vpop.eup %6997  ;;  %7007 = vpow2.f32 %v3133_v46  ;;  %v6840_v16 = vld [vmem:[#allocation2 + $0x34] ss:$8 sps:$4 sm:$0xff]  }
 0x481   : > { %v8577_v7 = vpop.eup %6999 }
 0x482   : > { %v3129_v54 = vmul.f32 1.442695, %v3108_v32  ;;  %v3114_v32 = vsub.f32 %v9336_v60, %v3094_v1  ;;  %v6843_v60 = vld [vmem:[#allocation4 + $0x54] ss:$8 sps:$4 sm:$0xff]  }
 0x483   : > { %v3092_v25 = vpop.xlane.xlu0 %3091  ;;  %v3090_v50 = vpop.xlane.xlu1 %3089 }
 0x484   : > { %7009 = vpow2.f32 %v3129_v54  ;;  %v3113_v61 = vsub.f32 %v8395_v19, %v3092_v25  ;;  %v3112_v58 = vsub.f32 %v9335_v20, %v3090_v50  ;;  %3833 = vmax.xlane.f32.xlu1 %v8573_v28  ;;  %v3141_v54 = vmul.f32 1.442695, %v3114_v32 }
 0x485   : > { %v8582_v37 = vpop.eup %7001  ;;  %7011 = vpow2.f32 %v3131_v15  ;;  %4347 = vrot.lane.b32.xlu0 %v6839_v56, %s7437_s24 }
 0x486   : > { %v8586_v40 = vpop.eup %7003  ;;  %v3139_v23 = vmul.f32 1.442695, %v3113_v61  ;;  %v3183_v19 = vpack.c.bf16 %v8582_v37, %v8575_v42  ;;  %v3137_v49 = vmul.f32 1.442695, %v3112_v58  ;;  %v6842_v61 = vld [vmem:[#allocation2 + $0x54] ss:$8 sps:$4 sm:$0xff]  }
 0x487   : > { %v3088_v46 = vpop.xlane.xlu0 %3087  ;;  %v3102_v18 = vpop.xlane.xlu1 %3101  ;;  %v3184_v15 = vpack.c.bf16 %v8577_v7, %v8586_v40 }
 0x488   : > { %v3111_v1 = vsub.f32 %v8403_v52, %v3088_v46  ;;  %3829 = vmax.xlane.f32.xlu1 %v8589_v57  ;;  %6350 = vmatprep.mubr.bf16.mxu1 %v3183_v19  ;;  %7013 = vpow2.f32 %v3139_v23  ;;  %v3118_v58 = vsub.f32 %v8407_v17, %v3102_v18  ;;  %v8603_v23 = vpop.eup %7005  ;;  %v6845_v17 = vld [vmem:[#allocation4 + $0x44] ss:$8 sps:$4 sm:$0xff]  }
 0x489   : > { %4291 = vrot.lane.b32.xlu0 %v6840_v16, %s7437_s24  ;;  %6351 = vmatmul.mubr.bf16.vlgmr.msra.gmra.mxu1 %v3184_v15  ;;  %7015 = vpow2.f32 %v3137_v49  ;;  %v6844_v49 = vld [vmem:[#allocation2 + $0x74] ss:$8 sps:$4 sm:$0xff]  }
 0x48a   : > { %v3135_v25 = vmul.f32 1.442695, %v3111_v1  ;;  %6399 = vmatpush3.bf16.msra.mxu1 %v8513_v36 }
 0x48b   : > { %6400 = vmatprep.subr.bf16.mxu1 %v6841_v0  ;;  %v3100_v50 = vpop.xlane.xlu0 %3099  ;;  %v3098_v56 = vpop.xlane.xlu1 %3097 }
 0x48c   : > { %7017 = vpow2.f32 %v3135_v25  ;;  %v3117_v52 = vsub.f32 %v8414_v63, %v3100_v50  ;;  %v3116_v20 = vsub.f32 %v8417_v21, %v3098_v56  ;;  %v3149_v21 = vmul.f32 1.442695, %v3118_v58  ;;  %v6848_v50 = vld [vmem:[#allocation4 + $0x24] ss:$8 sps:$4 sm:$0xff]  }
 0x48d   : > { %7019 = vpow2.f32 %v3141_v54  ;;  %4295 = vrot.lane.b32.xlu0 %v6842_v61, %s7437_s24  ;;  %v8605_v46 = vpop.eup %7007  ;;  %v6846_v54 = vld [vmem:[#allocation4 + $0x64] ss:$8 sps:$4 sm:$0xff]  }
 0x48e   : > { %v3147_v32 = vmul.f32 1.442695, %v3117_v52  ;;  %6401 = vmatpush3.bf16.msra.mxu1 %v6841_v0  ;;  %v3145_v36 = vmul.f32 1.442695, %v3116_v20  ;;  %v6847_v0 = vld [vmem:[#allocation4 + $0x34] ss:$8 sps:$4 sm:$0xff]  }
 0x48f   : > { %6402 = vmatprep.subr.bf16.mxu1 %v6843_v60  ;;  %v3096_v19 = vpop.xlane.xlu0 %3095  ;;  %v6849_v56 = vld [vmem:[#allocation3 + $0x4] ss:$8 sps:$4 sm:$0xff]  }
 0x490   : > { %v3115_v63 = vsub.f32 %v8423_v41, %v3096_v19  ;;  %7021 = vpow2.f32 %v3147_v32  ;;  %v6850_v20 = vld [vmem:[#allocation4 + $0x24] ss:$8 sps:$4 sm:$0xff]   ;;  %v6852_v19 = vld [vmem:[#allocation4 + $0x14] ss:$8 sps:$4 sm:$0xff]  }
 0x491   : > { %v8608_v16 = vpop.eup %7009  ;;  %4299 = vrot.lane.b32.xlu0 %v6844_v49, %s7437_s24  ;;  %7023 = vpow2.f32 %v3145_v36  ;;  %v6851_v32 = vld [vmem:[#allocation2 + $0x4] ss:$8 sps:$4 sm:$0xff]  }
 0x492   : > { %v8611_v18 = vpop.eup %7011  ;;  %v3143_v15 = vmul.f32 1.442695, %v3115_v63  ;;  %6403 = vmatpush3.bf16.msra.mxu1 %v6843_v60  ;;  %v3185_v1 = vpack.c.bf16 %v8608_v16, %v8603_v23  ;;  %v6853_v63 = vld [vmem:[#allocation2 + $0x14] ss:$8 sps:$4 sm:$0xff]  }
 0x493   : > { %6404 = vmatprep.subr.bf16.mxu1 %v6845_v17  ;;  %v3186_v41 = vpack.c.bf16 %v8605_v46, %v8611_v18 }
 0x494   : > { %7025 = vpow2.f32 %v3143_v15  ;;  %6354 = vmatprep.mubr.bf16.mxu1 %v3185_v1  ;;  %v6854_v15 = vld [vmem:[#allocation4 + $0x4] ss:$8 sps:$4 sm:$0xff]  }
 0x495   : > { %7027 = vpow2.f32 %v3149_v21  ;;  %4690 = vrot.lane.b32.xlu0 %v6846_v54, %s7437_s24  ;;  %6355 = vmatmul.mubr.bf16.gmra.mxu1 %v3186_v41  ;;  %v8618_v25 = vpop.eup %7013  ;;  %v6855_v41 = vld [vmem:[#allocation2 + $0x24] ss:$8 sps:$4 sm:$0xff]  }
 0x496   : > { %6405 = vmatpush3.bf16.msra.mxu1 %v6845_v17  ;;  %v8620_v61 = vpop.eup %7015 }
 0x497   : > { %6406 = vmatprep.subr.bf16.mxu1 %v6847_v0 }
 0x499   : > { %v8622_v52 = vpop.eup %7017  ;;  %4682 = vrot.lane.b32.xlu0 %v6848_v50, %s7437_s24  ;;  %4341 = vrot.lane.b32.xlu1 %v6849_v56, %s7437_s24  ;;  %v9337_v50 = vld [vmem:[#allocation30_spill] sm:$0xff]  ;;  %v6856_v56 = vld [vmem:[#allocation2 + $0x44] ss:$8 sps:$4 sm:$0xff]  }
 0x49a   : > { %v8626_v58 = vpop.eup %7019  ;;  %6407 = vmatpush3.bf16.msra.mxu1 %v6847_v0  ;;  %v3187_v60 = vpack.c.bf16 %v8620_v61, %v8622_v52 }
 0x49b   : > { %6408 = vmatprep.subr.bf16.mxu1 %v6850_v20  ;;  %v3188_v36 = vpack.c.bf16 %v8626_v58, %v8618_v25 }
 0x49c   : > { %6358 = vmatprep.mubr.bf16.mxu1 %v3187_v60 }
 0x49d   : > { %4285 = vrot.lane.b32.xlu1 %v6851_v32, %s7437_s24  ;;  %6359 = vmatmul.mubr.bf16.gmra.mxu1 %v3188_v36  ;;  %v8633_v49 = vpop.eup %7021  ;;  %v6858_v32 = vld [vmem:[#allocation4 + $0x74] ss:$8 sps:$4 sm:$0xff]  }
 0x49e   : > { %6409 = vmatpush3.bf16.msra.mxu1 %v6850_v20  ;;  %v8635_v21 = vpop.eup %7023  ;;  %v6857_v20 = vld [vmem:[#allocation2 + $0x64] ss:$8 sps:$4 sm:$0xff]  }
 0x49f   : > { %6410 = vmatprep.subr.bf16.mxu1 %v6852_v19 }
 0x4a1   : > { %v8637_v17 = vpop.eup %7025  ;;  %4287 = vrot.lane.b32.xlu1 %v6853_v63, %s7437_s24  ;;  %v6860_v63 = vld [vmem:[#allocation4 + $0x44] ss:$8 sps:$4 sm:$0xff]  }
 0x4a2   : > { %v8640_v1 = vpop.eup %7027  ;;  %6411 = vmatpush3.bf16.msra.mxu1 %v6852_v19  ;;  %v3189_v54 = vpack.c.bf16 %v8635_v21, %v8637_v17  ;;  %v6859_v19 = vld [vmem:[#allocation4 + $0x54] ss:$8 sps:$4 sm:$0xff]  }
 0x4a3   : > { %6412 = vmatprep.subr.bf16.mxu1 %v6854_v15  ;;  %v3190_v0 = vpack.c.bf16 %v8640_v1, %v8633_v49 }
 0x4a4   : > { %6362 = vmatprep.mubr.bf16.mxu1 %v3189_v54 }
 0x4a5   : > { %4289 = vrot.lane.b32.xlu1 %v6855_v41, %s7437_s24  ;;  %6363 = vmatmul.mubr.bf16.gmra.mxu1 %v3190_v0  ;;  %v6861_v41 = vld [vmem:[#allocation4 + $0x34] ss:$8 sps:$4 sm:$0xff]   ;;  %v8656_v0 = vpop.permute.xlu1 %4349 }
 0x4a6   : > { %6413 = vmatpush3.bf16.msra.mxu1 %v6854_v15 }
 0x4a7   : > { %6518 = vmatprep.subr.msk.bf16.mxu1 %vm2193_vm0, %v9337_v50 }
 0x4a9   : > { %4293 = vrot.lane.b32.xlu1 %v6856_v56, %s7437_s24 }
 0x4ab   : > { %v3808_v60 = vpop.xlane.xlu0 %3807 }
 0x4ad   : > { %4297 = vrot.lane.b32.xlu1 %v6857_v20, %s7437_s24  ;;  %v3837_v20 = vsub.f32 %v8469_v39, %v3808_v60 }
 0x4af   : > { %v3804_v36 = vpop.xlane.xlu0 %3803 }
 0x4b0   : > { %v3835_v54 = vsub.f32 %v8485_v55, %v3804_v36  ;;  %v3855_v55 = vmul.f32 1.442695, %v3837_v20 }
 0x4b1   : > { %4692 = vrot.lane.b32.xlu1 %v6858_v32, %s7437_s24 }
 0x4b2   : > { %v3851_v32 = vmul.f32 1.442695, %v3835_v54 }
 0x4b3   : > { %v3810_v15 = vpop.xlane.xlu0 %3809 }
 0x4b4   : > { %v3838_v56 = vsub.f32 %v8493_v29, %v3810_v15  ;;  %7029 = vpow2.f32 %v3851_v32  ;;  %v6863_v29 = vld [vmem:[#allocation4 + $0x4] ss:$8 sps:$4 sm:$0xff]  }
 0x4b5   : > { %4688 = vrot.lane.b32.xlu1 %v6859_v19, %s7437_s24  ;;  %v6862_v19 = vld [vmem:[#allocation4 + $0x14] ss:$8 sps:$4 sm:$0xff]  }
 0x4b6   : > { %v3857_v45 = vmul.f32 1.442695, %v3838_v56 }
 0x4b7   : > { %v4352_v20 = vpop.permute.xlu0 %4351 }
 0x4b8   : > { %2437 = vadd.xlane.f32.xlu0 %v8438_v31  ;;  %7031 = vpow2.f32 %v3857_v45 }
 0x4b9   : > { %4686 = vrot.lane.b32.xlu1 %v6860_v63, %s7437_s24 }
 0x4bc   : > { %2441 = vadd.xlane.f32.xlu0 %v8435_v59 }
 0x4bd   : > { %4684 = vrot.lane.b32.xlu1 %v6861_v41, %s7437_s24 }
 0x4c0   : > { %2445 = vadd.xlane.f32.xlu0 %v8457_v22  ;;  %v3806_v31 = vpop.xlane.xlu1 %3805 }
 0x4c1   : > { %v3836_v63 = vsub.f32 %v8518_v43, %v3806_v31  ;;  %4680 = vrot.lane.b32.xlu1 %v6862_v19, %s7437_s24  ;;  %v8669_v22 = vpop.eup %7029 }
 0x4c3   : > { %v3853_v36 = vmul.f32 1.442695, %v3836_v63 }
 0x4c4   : > { %2449 = vadd.xlane.f32.xlu0 %v8451_v53  ;;  %v3816_v59 = vpop.xlane.xlu1 %3815 }
 0x4c5   : > { %7033 = vpow2.f32 %v3853_v36  ;;  %4678 = vrot.lane.b32.xlu1 %v6863_v29, %s7437_s24  ;;  %v7032_v39 = vpop.eup %7031 }
 0x4c6   : > { %7035 = vpow2.f32 %v3855_v55 }
 0x4c8   : > { %3157 = vadd.xlane.f32.xlu0 %v8577_v7  ;;  %v3818_v15 = vpop.xlane.xlu1 %3817  ;;  %v4403_v7 = vsel %vm2193_vm0, %v9337_v50, 0 }
 0x4cc   : > { %3153 = vadd.xlane.f32.xlu0 %v8582_v37  ;;  %v9338_v37 = vld [vmem:[#allocation31_spill] sm:$0xff]  ;;  %v3814_v54 = vpop.xlane.xlu1 %3813 }
 0x4cd   : > { %v4400_v56 = vsel %vm2193_vm0, %v9338_v37, 0 }
 0x4d0   : > { %3165 = vadd.xlane.f32.xlu0 %v8605_v46  ;;  %v3842_v46 = vsub.f32 %v8526_v35, %v3818_v15  ;;  %v3841_v35 = vsub.f32 %v8522_v13, %v3816_v59  ;;  %v4394_v13 = vsel %vm2193_vm0, %v8656_v0, 0 }
 0x4d2   : > { %v7034_v43 = vpop.eup %7033  ;;  %v3865_v41 = vmul.f32 1.442695, %v3842_v46 }
 0x4d3   : > { %v8672_v60 = vpop.eup %7035  ;;  %v3915_v45 = vpack.c.bf16 %v7034_v43, %v8669_v22 }
 0x4d4   : > { %v3916_v53 = vpack.c.bf16 %v7032_v39, %v8672_v60  ;;  %3161 = vadd.xlane.f32.xlu0 %v8608_v16  ;;  %v3840_v16 = vsub.f32 %v8531_v27, %v3814_v54  ;;  %7037 = vpow2.f32 %v3865_v41 }
 0x4d5   : > { %6414 = vmatprep.mubr.bf16.mxu1 %v3915_v45 }
 0x4d6   : > { %6415 = vmatmul.mubr.bf16.vlgmr.msra.gmra.mxu1 %v3916_v53  ;;  %v3861_v50 = vmul.f32 1.442695, %v3840_v16 }
 0x4d7   : > { %6431 = vmatpush3.bf16.xpose.msra.mxu1 %v4403_v7 }
 0x4d8   : > { %6519 = vmatprep.subr.msk.bf16.mxu1 %vm2193_vm0, %v9338_v37  ;;  %3173 = vadd.xlane.f32.xlu0 %v8626_v58  ;;  %7039 = vpow2.f32 %v3861_v50  ;;  %v3822_v58 = vpop.xlane.xlu1 %3821 }
 0x4dc   : > { %3169 = vadd.xlane.f32.xlu0 %v8620_v61  ;;  %v4397_v61 = vsel %vm2193_vm0, %v4352_v20, 0 }
 0x4df   : > { %6433 = vmatpush3.bf16.xpose.msra.mxu1 %v4400_v56 }
 0x4e0   : > { %6520 = vmatprep.subr.msk.bf16.mxu1 %vm2193_vm0, %v4352_v20  ;;  %3181 = vadd.xlane.f32.xlu0 %v8640_v1  ;;  %v3863_v1 = vmul.f32 1.442695, %v3841_v35 }
 0x4e1   : > { %v7038_v63 = vpop.eup %7037 }
 0x4e4   : > { %3177 = vadd.xlane.f32.xlu0 %v8635_v21  ;;  %v3844_v21 = vsub.f32 %v8535_v6, %v3822_v58 }
 0x4e5   : > { %v7040_v6 = vpop.eup %7039 }
 0x4e6   : > { %v3869_v55 = vmul.f32 1.442695, %v3844_v21 }
 0x4e7   : > { %6435 = vmatpush3.bf16.xpose.msra.mxu1 %v4397_v61 }
 0x4e8   : > { %6521 = vmatprep.subr.msk.bf16.mxu1 %vm2193_vm0, %v8656_v0  ;;  %v3812_v27 = vpop.xlane.xlu0 %3811  ;;  %3889 = vadd.xlane.f32.xlu0 %v7032_v39 }
 0x4e9   : > { %v3839_v32 = vsub.f32 %v8544_v33, %v3812_v27  ;;  %2435 = vadd.xlane.f32.xlu1 %v8433_v11 }
 0x4eb   : > { %v3859_v19 = vmul.f32 1.442695, %v3839_v32 }
 0x4ec   : > { %v3824_v31 = vpop.xlane.xlu0 %3823  ;;  %3885 = vadd.xlane.f32.xlu0 %v7034_v43  ;;  %v3832_v43 = vpop.xlane.xlu1 %3831 }
 0x4ed   : > { %7041 = vpow2.f32 %v3859_v19  ;;  %2439 = vadd.xlane.f32.xlu1 %v8441_v62  ;;  %v3845_v33 = vsub.f32 %v8549_v44, %v3824_v31  ;;  %v3849_v35 = vsub.f32 %v8539_v3, %v3832_v43 }
 0x4ee   : > { %7043 = vpow2.f32 %v3863_v1 }
 0x4ef   : > { %6437 = vmatpush3.bf16.xpose.msra.mxu1 %v4394_v13  ;;  %7045 = vpow2.f32 %v3869_v55  ;;  %v3871_v59 = vmul.f32 1.442695, %v3845_v33 }
 0x4f0   : > { %v3820_v36 = vpop.xlane.xlu0 %3819  ;;  %3897 = vadd.xlane.f32.xlu0 %v7038_v63 }
 0x4f1   : > { %v3843_v11 = vsub.f32 %v8553_v12, %v3820_v36  ;;  %2443 = vadd.xlane.f32.xlu1 %v8454_v10 }
 0x4f3   : > { %v3867_v29 = vmul.f32 1.442695, %v3843_v11 }
 0x4f4   : > { %v3826_v62 = vpop.xlane.xlu0 %3825  ;;  %3893 = vadd.xlane.f32.xlu0 %v7040_v6 }
 0x4f5   : > { %7047 = vpow2.f32 %v3867_v29  ;;  %v3846_v0 = vsub.f32 %v8557_v14, %v3826_v62  ;;  %2447 = vadd.xlane.f32.xlu1 %v8459_v34  ;;  %v4346_v34 = vpop.permute.xlu1 %4345 }
 0x4f6   : > { %7049 = vpow2.f32 %v3871_v59  ;;  %v4388_v54 = vsel %vm2193_vm0, %v4346_v34, 0 }
 0x4f7   : > { %v3873_v39 = vmul.f32 1.442695, %v3846_v0 }
 0x4f8   : > { %v3828_v44 = vpop.xlane.xlu0 %3827 }
 0x4f9   : > { %7051 = vpow2.f32 %v3873_v39  ;;  %3155 = vadd.xlane.f32.xlu1 %v8586_v40  ;;  %v4344_v41 = vpop.permute.xlu1 %4343  ;;  %v3847_v56 = vsub.f32 %v8561_v2, %v3828_v44  ;;  %v3879_v2 = vmul.f32 1.442695, %v3849_v35 }
 0x4fa   : > { %v8706_v12 = vpop.eup %7041  ;;  %v4385_v50 = vsel %vm2193_vm0, %v4344_v41, 0 }
 0x4fb   : > { %v7044_v10 = vpop.eup %7043  ;;  %v3917_v45 = vpack.c.bf16 %v7040_v6, %v8706_v12  ;;  %v3875_v27 = vmul.f32 1.442695, %v3847_v56 }
 0x4fc   : > { %v4348_v53 = vpop.permute.xlu0 %4347  ;;  %v3918_v15 = vpack.c.bf16 %v7038_v63, %v7044_v10  ;;  %v8713_v40 = vpop.eup %7045 }
 0x4fd   : > { %3151 = vadd.xlane.f32.xlu1 %v8575_v42  ;;  %6418 = vmatprep.mubr.bf16.mxu1 %v3917_v45  ;;  %v4391_v14 = vsel %vm2193_vm0, %v4348_v53, 0  ;;  %7053 = vpow2.f32 %v3875_v27 }
 0x4fe   : > { %6522 = vmatprep.subr.msk.bf16.mxu1 %vm2193_vm0, %v4348_v53  ;;  %6419 = vmatmul.mubr.bf16.gmra.mxu1 %v3918_v15 }
 0x4ff   : > { %6439 = vmatpush3.bf16.xpose.msra.mxu1 %v4391_v14 }
 0x500   : > { %6523 = vmatprep.subr.msk.bf16.mxu1 %vm2193_vm0, %v4346_v34  ;;  %v4292_v21 = vpop.permute.xlu0 %4291 }
 0x501   : > { %3163 = vadd.xlane.f32.xlu1 %v8611_v18  ;;  %v8730_v18 = vpop.f32.mrf.mxu1 }
 0x502   : > { %v8716_v7 = vpop.eup %7047 }
 0x503   : > { %v3919_v37 = vpack.c.bf16 %v8713_v40, %v8716_v7  ;;  %v8720_v42 = vpop.eup %7049  ;;  %v8737_v61 = vpop.f32.mrf.mxu1 }
 0x505   : > { %3159 = vadd.xlane.f32.xlu1 %v8603_v23  ;;  %6422 = vmatprep.mubr.bf16.mxu1 %v3919_v37  ;;  %v8741_v1 = vpop.f32.mrf.mxu1 }
 0x506   : > { %v8723_v46 = vpop.eup %7051 }
 0x507   : > { %6441 = vmatpush3.bf16.xpose.msra.mxu1 %v4388_v54  ;;  %v3920_v16 = vpack.c.bf16 %v8723_v46, %v8720_v42  ;;  %v8746_v19 = vpop.f32.mrf.mxu1 }
 0x508   : > { %6524 = vmatprep.subr.msk.bf16.mxu1 %vm2193_vm0, %v4344_v41 }
 0x509   : > { %3171 = vadd.xlane.f32.xlu1 %v8618_v25  ;;  %6423 = vmatmul.mubr.bf16.gmra.mxu1 %v3920_v16 }
 0x50a   : > { %v8754_v13 = vpop.eup %7053 }
 0x50d   : > { %3167 = vadd.xlane.f32.xlu1 %v8622_v52  ;;  %v3834_v23 = vpop.xlane.xlu1 %3833 }
 0x50e   : > { %v3850_v20 = vsub.f32 %v8573_v28, %v3834_v23 }
 0x50f   : > { %6443 = vmatpush3.bf16.xpose.msra.mxu1 %v4385_v50 }
 0x510   : > { %v3881_v58 = vmul.f32 1.442695, %v3850_v20 }
 0x511   : > { %3179 = vadd.xlane.f32.xlu1 %v8633_v49  ;;  %v3830_v25 = vpop.xlane.xlu1 %3829  ;;  %v8749_v49 = vpop.f32.mrf.mxu1 }
 0x512   : > { %v3848_v32 = vsub.f32 %v8589_v57, %v3830_v25  ;;  %7055 = vpow2.f32 %v3881_v58 }
 0x514   : > { %v3877_v52 = vmul.f32 1.442695, %v3848_v32 }
 0x515   : > { %3175 = vadd.xlane.f32.xlu1 %v8637_v17  ;;  %v4342_v28 = vpop.permute.xlu1 %4341  ;;  %v8752_v17 = vpop.f32.mrf.mxu1 }
 0x516   : > { %7057 = vpow2.f32 %v3877_v52  ;;  %6525 = vmatprep.subr.msk.bf16.mxu1 %vm2193_vm0, %v4342_v28  ;;  %v4382_v3 = vsel %vm2193_vm0, %v4342_v28, 0 }
 0x517   : > { %7059 = vpow2.f32 %v3879_v2  ;;  %6445 = vmatpush3.bf16.xpose.msra.mxu1 %v4382_v3  ;;  %v8760_v36 = vpop.f32.mrf.mxu1 }
 0x519   : > { %3887 = vadd.xlane.f32.xlu1 %v8672_v60  ;;  %v4286_v57 = vpop.permute.xlu1 %4285  ;;  %v4296_v60 = vpop.permute.xlu0 %4295 }
 0x51a   : > { %v8769_v59 = vpop.f32.mrf.mxu1 }
 0x51c   : > { %v8772_v39 = vpop.f32.mrf.mxu1 }
 0x51d   : > { %3883 = vadd.xlane.f32.xlu1 %v8669_v22  ;;  %v4288_v31 = vpop.permute.xlu1 %4287  ;;  %v4300_v62 = vpop.permute.xlu0 %4299 }
 0x51e   : > { %v8774_v43 = vpop.f32.mrf.mxu1 }
 0x51f   : > { %v8756_v55 = vpop.eup %7055 }
 0x520   : > { %v8778_v45 = vpop.f32.mrf.mxu1 }
 0x521   : > { %3895 = vadd.xlane.f32.xlu1 %v7044_v10  ;;  %v4290_v63 = vpop.permute.xlu1 %4289  ;;  %v4691_v10 = vpop.permute.xlu0 %4690 }
 0x522   : > { %v8780_v15 = vpop.f32.mrf.mxu1 }
 0x523   : > { %v8758_v33 = vpop.eup %7057 }
 0x524   : > { %v8762_v11 = vpop.eup %7059  ;;  %v3921_v6 = vpack.c.bf16 %v8758_v33, %v8754_v13  ;;  %v8784_v14 = vpop.f32.mrf.mxu1 }
 0x525   : > { %3891 = vadd.xlane.f32.xlu1 %v8706_v12  ;;  %v4294_v22 = vpop.permute.xlu1 %4293  ;;  %v3922_v29 = vpack.c.bf16 %v8756_v55, %v8762_v11  ;;  %9339 = vst [vmem:[#allocation25_spill] sm:$0xff] %v8784_v14  ;;  %v4683_v37 = vpop.permute.xlu0 %4682 }
 0x526   : > { %6426 = vmatprep.mubr.bf16.mxu1 %v3921_v6  ;;  %v8786_v54 = vpop.f32.mrf.mxu1 }
 0x527   : > { %6427 = vmatmul.mubr.bf16.gmra.mxu1 %v3922_v29 }
 0x528   : > { %6446 = vmatprep.mubr.msk.bf16.mxu1 %vm2193_vm0, %v4286_v57  ;;  %v8790_v56 = vpop.f32.mrf.mxu1 }
 0x529   : > { %v4298_v0 = vpop.permute.xlu1 %4297  ;;  %9340 = vst [vmem:[#allocation27_spill] sm:$0xff] %v8790_v56 }
 0x52a   : > { %v8792_v20 = vpop.f32.mrf.mxu1 }
 0x52d   : > { %v4693_v44 = vpop.permute.xlu1 %4692 }
 0x52e   : > { %6462 = vmatprep.subr.bf16.mxu0 %v4693_v44 }
 0x52f   : > { %6447 = vmatmul.mubr.msk.bf16.vlgmr.msra.gmra.mxu1 %vm2193_vm0, %v4288_v31  ;;  %6463 = vmatpush3.bf16.msra.mxu0 %v4693_v44 }
 0x530   : > { %6450 = vmatprep.mubr.msk.bf16.mxu1 %vm2193_vm0, %v4290_v63  ;;  %6464 = vmatprep.subr.bf16.mxu0 %v4691_v10 }
 0x531   : > { %v4689_v12 = vpop.permute.xlu1 %4688 }
 0x533   : > { %6465 = vmatpush3.bf16.msra.mxu0 %v4691_v10 }
 0x534   : > { %6466 = vmatprep.subr.bf16.mxu0 %v4689_v12 }
 0x535   : > { %v4687_v53 = vpop.permute.xlu1 %4686 }
 0x537   : > { %6451 = vmatmul.mubr.msk.bf16.gmra.mxu1 %vm2193_vm0, %v4292_v21  ;;  %6467 = vmatpush3.bf16.msra.mxu0 %v4689_v12 }
 0x538   : > { %6454 = vmatprep.mubr.msk.bf16.mxu1 %vm2193_vm0, %v4294_v22  ;;  %6468 = vmatprep.subr.bf16.mxu0 %v4687_v53 }
 0x539   : > { %v4685_v34 = vpop.permute.xlu1 %4684 }
 0x53b   : > { %6469 = vmatpush3.bf16.msra.mxu0 %v4687_v53 }
 0x53c   : > { %6470 = vmatprep.subr.bf16.mxu0 %v4685_v34 }
 0x53d   : > { %v4681_v41 = vpop.permute.xlu1 %4680 }
 0x53f   : > { %6455 = vmatmul.mubr.msk.bf16.gmra.mxu1 %vm2193_vm0, %v4296_v60  ;;  %6471 = vmatpush3.bf16.msra.mxu0 %v4685_v34 }
 0x540   : > { %6458 = vmatprep.mubr.msk.bf16.mxu1 %vm2193_vm0, %v4298_v0  ;;  %6472 = vmatprep.subr.bf16.mxu0 %v4683_v37 }
 0x541   : > { %v2438_v16 = vpop.xlane.xlu0 %2437  ;;  %v4679_v50 = vpop.permute.xlu1 %4678 }
 0x542   : > { %7061 = vrcp.f32 %v2438_v16 }
 0x543   : > { %6473 = vmatpush3.bf16.msra.mxu0 %v4683_v37 }
 0x544   : > { %6474 = vmatprep.subr.bf16.mxu0 %v4681_v41 }
 0x545   : > { %v2442_v23 = vpop.xlane.xlu0 %2441 }
 0x546   : > { %7063 = vrcp.f32 %v2442_v23 }
 0x547   : > { %6459 = vmatmul.mubr.msk.bf16.gmra.mxu1 %vm2193_vm0, %v4300_v62  ;;  %6475 = vmatpush3.bf16.msra.mxu0 %v4681_v41  ;;  %vm3480_vm0 = vcmask 1043968  }
 0x548   : > { %6476 = vmatprep.subr.bf16.mxu0 %v4679_v50 }
 0x549   : > { %v2446_v35 = vpop.xlane.xlu0 %2445  ;;  %v8795_v27 = vpop.f32.mrf.mxu1 }
 0x54a   : > { %7065 = vrcp.f32 %v2446_v35 }
 0x54b   : > { %v8797_v58 = vpop.f32.mrf.mxu1  ;;  %6477 = vmatpush3.bf16.msra.mxu0 %v4679_v50 }
 0x54d   : > { %v2450_v25 = vpop.xlane.xlu0 %2449  ;;  %v8799_v2 = vpop.f32.mrf.mxu1 }
 0x54e   : > { %7067 = vrcp.f32 %v2450_v25 }
 0x54f   : > { %v7062_v32 = vpop.eup %7061  ;;  %v8804_v21 = vpop.f32.mrf.mxu1 }
 0x550   : > { %v2637_v52 = vmul.f32 %v7062_v32, %v8746_v19 }
 0x551   : > { %v8802_v28 = vpop.xlane.xlu0 %3157 }
 0x552   : > { %v6046_v3 = vpack.c.bf16 %v2637_v52, %v2637_v52 }
 0x553   : > { %v7064_v57 = vpop.eup %7063 }
 0x554   : > { %2718 = vst.msk [vmem:[#allocation5 + $0x8] sm:$0xf] %vm2716_vm2, %v6046_v3  ;;  %v2639_v31 = vmul.f32 %v7064_v57, %v8741_v1 }
 0x555   : > { %v8808_v63 = vpop.xlane.xlu0 %3153  ;;  %v8810_v60 = vpop.f32.mrf.mxu1 }
 0x556   : > { %v6048_v6 = vpack.c.bf16 %v2639_v31, %v2639_v31 }
 0x557   : > { %v7066_v22 = vpop.eup %7065  ;;  %v8812_v29 = vpop.f32.mrf.mxu1 }
 0x558   : > { %2720 = vst.msk [vmem:[#allocation5 + $0x18] sm:$0xf] %vm2716_vm2, %v6048_v6  ;;  %v2641_v19 = vmul.f32 %v7066_v22, %v8769_v59 }
 0x559   : > { %v8816_v62 = vpop.xlane.xlu0 %3165  ;;  %v8818_v0 = vpop.f32.mrf.mxu1 }
 0x55a   : > { %v6050_v44 = vpack.c.bf16 %v2641_v19, %v2641_v19 }
 0x55b   : > { %v7068_v10 = vpop.eup %7067  ;;  %v8820_v12 = vpop.f32.mrf.mxu1 }
 0x55c   : > { %2722 = vst.msk [vmem:[#allocation5 + $0x28] sm:$0xf] %vm2716_vm2, %v6050_v44  ;;  %v2643_v1 = vmul.f32 %v7068_v10, %v8760_v36 }
 0x55d   : > { %v8824_v53 = vpop.xlane.xlu0 %3161  ;;  %v8826_v37 = vpop.f32.mrf.mxu1 }
 0x55e   : > { %v6052_v34 = vpack.c.bf16 %v2643_v1, %v2643_v1  ;;  %9341 = vst [vmem:[#allocation26_spill] sm:$0xff] %v8826_v37 }
 0x55f   : > { %v8831_v41 = vpop.f32.mrf.mxu1 }
 0x560   : > { %2724 = vst.msk [vmem:[#allocation5 + $0x38] sm:$0xf] %vm2716_vm2, %v6052_v34  ;;  %9342 = vst [vmem:[#allocation28_spill] sm:$0xff] %v8831_v41 }
 0x561   : > { %v8829_v59 = vpop.xlane.xlu0 %3173  ;;  %v8833_v23 = vpop.f32.mrf.mxu1 }
 0x563   : > { %v3324_v35 = vpop.f32.mrf.mxu1 }
 0x565   : > { %v3170_v16 = vpop.xlane.xlu0 %3169  ;;  %v8835_v36 = vpop.f32.mrf.mxu1 }
 0x566   : > { %7069 = vrcp.f32 %v3170_v16  ;;  %9343 = vst [vmem:[#allocation32_spill] sm:$0xff] %v8835_v36 }
 0x567   : > { %v8837_v3 = vpop.f32.mrf.mxu1 }
 0x568   : > { %9344 = vst [vmem:[#allocation29_spill] sm:$0xff] %v8837_v3 }
 0x569   : > { %v3182_v50 = vpop.xlane.xlu0 %3181  ;;  %v6365_v22 = vpop.f32.mrf.mxu1 }
 0x56a   : > { %7071 = vrcp.f32 %v3182_v50 }
 0x56b   : > { %v3340_v1 = vpop.f32.mrf.mxu1 }
 0x56d   : > { %v3178_v25 = vpop.xlane.xlu0 %3177 }
 0x56e   : > { %7073 = vrcp.f32 %v3178_v25 }
 0x572   : > { %v2436_v32 = vpop.xlane.xlu1 %2435 }
 0x573   : > { %v7070_v52 = vpop.eup %7069  ;;  %7075 = vrcp.f32 %v2436_v32 }
 0x574   : > { %v8839_v57 = vmul.f32 %v7070_v52, %v3324_v35 }
 0x576   : > { %v2440_v31 = vpop.xlane.xlu1 %2439 }
 0x577   : > { %v7072_v6 = vpop.eup %7071  ;;  %7077 = vrcp.f32 %v2440_v31 }
 0x578   : > { %v8841_v19 = vmul.f32 %v7072_v6, %v6365_v22  ;;  %v3890_v6 = vpop.xlane.xlu0 %3889 }
 0x57a   : > { %9345 = vst [vmem:[#allocation30_spill] sm:$0xff] %v8841_v19  ;;  %v2444_v44 = vpop.xlane.xlu1 %2443 }
 0x57b   : > { %v7074_v10 = vpop.eup %7073  ;;  %7079 = vrcp.f32 %v2444_v44 }
 0x57c   : > { %v8843_v34 = vmul.f32 %v7074_v10, %v3340_v1 }
 0x57e   : > { %9346 = vst [vmem:[#allocation31_spill] sm:$0xff] %v8843_v34  ;;  %v2448_v16 = vpop.xlane.xlu1 %2447 }
 0x57f   : > { %7081 = vrcp.f32 %v2448_v16 }
 0x580   : > { %v7076_v50 = vpop.eup %7075 }
 0x581   : > { %v2636_v25 = vmul.f32 %v7076_v50, %v8737_v61  ;;  %v3886_v50 = vpop.xlane.xlu0 %3885 }
 0x582   : > { %v8846_v32 = vpop.xlane.xlu1 %3155 }
 0x583   : > { %v6045_v35 = vpack.c.bf16 %v2636_v25, %v2636_v25 }
 0x584   : > { %v7078_v52 = vpop.eup %7077 }
 0x585   : > { %2717 = vst.msk [vmem:[#allocation5] sm:$0xf] %vm2716_vm2, %v6045_v35  ;;  %v2638_v31 = vmul.f32 %v7078_v52, %v8730_v18  ;;  %v3898_v56 = vpop.xlane.xlu0 %3897 }
 0x586   : > { %v3152_v22 = vpop.xlane.xlu1 %3151 }
 0x587   : > { %7083 = vrcp.f32 %v3152_v22  ;;  %v6047_v14 = vpack.c.bf16 %v2638_v31, %v2638_v31 }
 0x588   : > { %v7080_v44 = vpop.eup %7079  ;;  %7085 = vrcp.f32 %v3890_v6 }
 0x589   : > { %2719 = vst.msk [vmem:[#allocation5 + $0x10] sm:$0xf] %vm2716_vm2, %v6047_v14  ;;  %v2640_v10 = vmul.f32 %v7080_v44, %v8752_v17  ;;  %7087 = vrcp.f32 %v3886_v50 }
 0x58a   : > { %v8852_v1 = vpop.xlane.xlu1 %3163 }
 0x58b   : > { %v6049_v61 = vpack.c.bf16 %v2640_v10, %v2640_v10 }
 0x58c   : > { %v7082_v16 = vpop.eup %7081 }
 0x58d   : > { %2721 = vst.msk [vmem:[#allocation5 + $0x20] sm:$0xf] %vm2716_vm2, %v6049_v61  ;;  %v2642_v25 = vmul.f32 %v7082_v16, %v8749_v49 }
 0x58e   : > { %v8856_v18 = vpop.xlane.xlu1 %3159 }
 0x58f   : > { %v6051_v35 = vpack.c.bf16 %v2642_v25, %v2642_v25 }
 0x591   : > { %2723 = vst.msk [vmem:[#allocation5 + $0x30] sm:$0xf] %vm2716_vm2, %v6051_v35 }
 0x592   : > { %v8859_v52 = vpop.xlane.xlu1 %3171 }
 0x593   : > { %9347 = vst [vmem:[#allocation41_spill] sm:$0xff] %v8859_v52 }
 0x594   : > { %v7084_v14 = vpop.eup %7083 }
 0x595   : > { %v3368_v17 = vmul.f32 %v7084_v14, %v8797_v58  ;;  %v7086_v10 = vpop.eup %7085 }
 0x596   : > { %v6416_v31 = vpop.f32.mrf.mxu1  ;;  %v8862_v22 = vpop.xlane.xlu1 %3167 }
 0x597   : > { %9348 = vst [vmem:[#allocation42_spill] sm:$0xff] %v8862_v22  ;;  %v6061_v44 = vpack.c.bf16 %v3368_v17, %v3368_v17  ;;  %v7088_v50 = vpop.eup %7087 }
 0x598   : > { %v4005_v6 = vpop.f32.mrf.mxu1 }
 0x599   : > { %3432 = vrot.lane.b32.xlu1 %v6061_v44, %s7437_s24 }
 0x59a   : > { %v6417_v49 = vpop.f32.mrf.mxu1  ;;  %v8865_v61 = vpop.xlane.xlu1 %3179 }
 0x59b   : > { %9349 = vst [vmem:[#allocation43_spill] sm:$0xff] %v8865_v61  ;;  %v4087_v16 = vmul.f32 %v7086_v10, %v6417_v49 }
 0x59c   : > { %v4008_v25 = vpop.f32.mrf.mxu1 }
 0x59d   : > { %v6080_v35 = vpack.c.bf16 %v4087_v16, %v4087_v16  ;;  %v4085_v36 = vmul.f32 %v7088_v50, %v4008_v25  ;;  %v3894_v50 = vpop.xlane.xlu0 %3893 }
 0x59e   : > { %v8867_v3 = vpop.xlane.xlu1 %3175 }
 0x59f   : > { %9350 = vst [vmem:[#allocation44_spill] sm:$0xff] %v8867_v3  ;;  %4167 = vst.msk [vmem:[#allocation5 + $0x1c] sm:$0xf] %vm2716_vm2, %v6080_v35  ;;  %v6078_v58 = vpack.c.bf16 %v4085_v36, %v4085_v36 }
 0x5a1   : > { %4165 = vst.msk [vmem:[#allocation5 + $0xc] sm:$0xf] %vm2716_vm2, %v6078_v58 }
 0x5a2   : > { %v3888_v14 = vpop.xlane.xlu1 %3887 }
 0x5a3   : > { %7089 = vrcp.f32 %v3888_v14 }
 0x5a6   : > { %v3884_v17 = vpop.xlane.xlu1 %3883 }
 0x5a7   : > { %7091 = vrcp.f32 %v3884_v17 }
 0x5aa   : > { %v3896_v44 = vpop.xlane.xlu1 %3895 }
 0x5ab   : > { %7093 = vrcp.f32 %v3896_v44 }
 0x5ae   : > { %v3892_v61 = vpop.xlane.xlu1 %3891 }
 0x5af   : > { %7095 = vrcp.f32 %v3892_v61 }
 0x5b0   : > { %v7090_v37 = vpop.eup %7089  ;;  %7097 = vrcp.f32 %v3898_v56 }
 0x5b1   : > { %v4086_v10 = vmul.f32 %v7090_v37, %v6416_v31  ;;  %7099 = vrcp.f32 %v3894_v50 }
 0x5b2   : > { %7101 = vrcp.f32 %v8846_v32 }
 0x5b3   : > { %v6079_v49 = vpack.c.bf16 %v4086_v10, %v4086_v10  ;;  %7103 = vrcp.f32 %v8808_v63 }
 0x5b4   : > { %v7092_v16 = vpop.eup %7091  ;;  %7105 = vrcp.f32 %v8856_v18 }
 0x5b5   : > { %4166 = vst.msk [vmem:[#allocation5 + $0x14] sm:$0xf] %vm2716_vm2, %v6079_v49  ;;  %v4084_v36 = vmul.f32 %v7092_v16, %v4005_v6  ;;  %7107 = vrcp.f32 %v8802_v28 }
 0x5b7   : > { %v6077_v25 = vpack.c.bf16 %v4084_v36, %v4084_v36 }
 0x5b8   : > { %v7094_v35 = vpop.eup %7093 }
 0x5b9   : > { %4164 = vst.msk [vmem:[#allocation5 + $0x4] sm:$0xf] %vm2716_vm2, %v6077_v25 }
 0x5bc   : > { %v7096_v17 = vpop.eup %7095 }
 0x5bd   : > { %v7098_v37 = vpop.eup %7097 }
 0x5be   : > { %v6420_v58 = vpop.f32.mrf.mxu1  ;;  %v7100_v10 = vpop.eup %7099 }
 0x5bf   : > { %v4090_v14 = vmul.f32 %v7094_v35, %v6420_v58 }
 0x5c0   : > { %v4021_v3 = vpop.f32.mrf.mxu1 }
 0x5c1   : > { %v6083_v41 = vpack.c.bf16 %v4090_v14, %v4090_v14  ;;  %v4088_v44 = vmul.f32 %v7096_v17, %v4021_v3 }
 0x5c2   : > { %v6421_v31 = vpop.f32.mrf.mxu1 }
 0x5c3   : > { %4170 = vst.msk [vmem:[#allocation5 + $0x34] sm:$0xf] %vm2716_vm2, %v6083_v41  ;;  %v6081_v61 = vpack.c.bf16 %v4088_v44, %v4088_v44  ;;  %v4091_v56 = vmul.f32 %v7098_v37, %v6421_v31  ;;  %v4231_v44 = vld [vmem:[#allocation14 + $0x190] sm:$0xff]  ;;  %v4229_v31 = vld [vmem:[#allocation14 + $0x180] sm:$0xff] }
 0x5c4   : > { %v4024_v49 = vpop.f32.mrf.mxu1 }
 0x5c5   : > { %4168 = vst.msk [vmem:[#allocation5 + $0x24] sm:$0xf] %vm2716_vm2, %v6081_v61  ;;  %v6084_v6 = vpack.c.bf16 %v4091_v56, %v4091_v56  ;;  %v4089_v16 = vmul.f32 %v7100_v10, %v4024_v49  ;;  %v4232_v10 = vld [vmem:[#allocation14 + $0x198] sm:$0xff] }
 0x5c7   : > { %4171 = vst.msk [vmem:[#allocation5 + $0x3c] sm:$0xf] %vm2716_vm2, %v6084_v6  ;;  %v6082_v50 = vpack.c.bf16 %v4089_v16, %v4089_v16 }
 0x5c9   : > { %4169 = vst.msk [vmem:[#allocation5 + $0x2c] sm:$0xf] %vm2716_vm2, %v6082_v50  ;;  %v8877_v36 = vpop.f32.mrf.mxu1  ;;  %v4230_v50 = vld [vmem:[#allocation14 + $0x188] sm:$0xff] }
 0x5cb   : > { %v8879_v3 = vpop.f32.mrf.mxu1 }
 0x5cd   : > { %v8881_v25 = vpop.f32.mrf.mxu1 }
 0x5cf   : > { %v8883_v41 = vpop.f32.mrf.mxu1 }
 0x5e7   : > { %v8885_v35 = vpop.f32.mrf.mxu1 }
 0x5e8   : > { %9351 = vst [vmem:[#allocation45_spill] sm:$0xff] %v8885_v35 }
 0x5e9   : > { %v8887_v58 = vpop.f32.mrf.mxu1 }
 0x5ea   : > { %9352 = vst [vmem:[#allocation46_spill] sm:$0xff] %v8887_v58  ;;  %v9357_v58 = vld [vmem:[#allocation23_spill] sm:$0xff] }
 0x5eb   : > { %v8889_v14 = vpop.f32.mrf.mxu1 }
 0x5ec   : > { %9353 = vst [vmem:[#allocation47_spill] sm:$0xff] %v8889_v14 }
 0x5ed   : > { %v8891_v17 = vpop.f32.mrf.mxu1 }
 0x5ee   : > { %9354 = vst [vmem:[#allocation48_spill] sm:$0xff] %v8891_v17  ;;  %v4240_v17 = vld [vmem:[#allocation14 + $0x1d8] sm:$0xff] }
 0x5ef   : > { %v6448_v37 = vpop.f32.mrf.mxu1 }
 0x5f0   : > { %v4448_v61 = vadd.f32 %v6448_v37, %v4231_v44  ;;  %v4235_v44 = vld [vmem:[#allocation14 + $0x1b0] sm:$0xff] }
 0x5f1   : > { %v4439_v56 = vpop.f32.mrf.mxu1 }
 0x5f2   : > { %v8894_v49 = vadd.f32 %v4448_v61, %v8201_v5  ;;  %v4440_v6 = vadd.f32 %v4439_v56, %v4229_v31  ;;  %v4233_v5 = vld [vmem:[#allocation14 + $0x1a0] sm:$0xff] }
 0x5f3   : > { %v6449_v16 = vpop.f32.mrf.mxu1 }
 0x5f4   : > { %v8897_v35 = vadd.f32 %v4440_v6, %v8205_v8  ;;  %v4451_v52 = vadd.f32 %v6449_v16, %v4232_v10  ;;  %4522 = vmax.xlane.f32.xlu0 %v8894_v49  ;;  %v4236_v10 = vld [vmem:[#allocation14 + $0x1b8] sm:$0xff] }
 0x5f5   : > { %v4442_v14 = vpop.f32.mrf.mxu1 }
 0x5f6   : > { %v8901_v22 = vadd.f32 %v4451_v52, %v8213_v9  ;;  %v4443_v19 = vadd.f32 %v4442_v14, %v4230_v50  ;;  %4518 = vmax.xlane.f32.xlu1 %v8897_v35  ;;  %v4234_v50 = vld [vmem:[#allocation14 + $0x1a8] sm:$0xff] }
 0x5f7   : > { %v6452_v37 = vpop.f32.mrf.mxu1 }
 0x5f8   : > { %4524 = vmax.xlane.f32.xlu0 %v8901_v22  ;;  %v8906_v61 = vadd.f32 %v4443_v19, %v8230_v30  ;;  %v4464_v8 = vadd.f32 %v6452_v37, %v4235_v44  ;;  %v4237_v30 = vld [vmem:[#allocation14 + $0x1c0] sm:$0xff] }
 0x5f9   : > { %v4455_v31 = vpop.f32.mrf.mxu1 }
 0x5fa   : > { %v4456_v56 = vadd.f32 %v4455_v31, %v4233_v5  ;;  %v8913_v52 = vadd.f32 %v4464_v8, %v8233_v24  ;;  %v4239_v5 = vld [vmem:[#allocation14 + $0x1d0] sm:$0xff] }
 0x5fb   : > { %v6453_v6 = vpop.f32.mrf.mxu1  ;;  %v4243_v8 = vld [vmem:[#allocation14 + $0x1f0] sm:$0xff] }
 0x5fc   : > { %v8909_v16 = vadd.f32 %v4456_v56, %v8247_v47  ;;  %4520 = vmax.xlane.f32.xlu0 %v8906_v61  ;;  %v4467_v14 = vadd.f32 %v6453_v6, %v4236_v10 }
 0x5fd   : > { %v4458_v9 = vpop.f32.mrf.mxu1 }
 0x5fe   : > { %4526 = vmax.xlane.f32.xlu1 %v8909_v16  ;;  %v8918_v44 = vadd.f32 %v4467_v14, %v8250_v4  ;;  %v4459_v47 = vadd.f32 %v4458_v9, %v4234_v50  ;;  %v4241_v14 = vld [vmem:[#allocation14 + $0x1e0] sm:$0xff] }
 0x5ff   : > { %v6456_v34 = vpop.f32.mrf.mxu1 }
 0x600   : > { %4530 = vmax.xlane.f32.xlu0 %v8913_v52  ;;  %v8925_v10 = vadd.f32 %v4459_v47, %v8265_v38  ;;  %v4480_v6 = vadd.f32 %v6456_v34, %v4239_v5  ;;  %v4238_v47 = vld [vmem:[#allocation14 + $0x1c8] sm:$0xff]  ;;  %v9356_v5 = vld [vmem:[#allocation20_spill] sm:$0xff] }
 0x601   : > { %v4471_v19 = vpop.f32.mrf.mxu1 }
 0x602   : > { %v4472_v37 = vadd.f32 %v4471_v19, %v4237_v30  ;;  %v9355_v19 = vld [vmem:[#allocation22_spill] sm:$0xff] }
 0x603   : > { %v6457_v31 = vpop.f32.mrf.mxu1 }
 0x604   : > { %v8921_v56 = vadd.f32 %v4472_v37, %v8282_v51  ;;  %4532 = vmax.xlane.f32.xlu0 %v8918_v44  ;;  %v8930_v51 = vadd.f32 %v4480_v6, %v8268_v48  ;;  %v4483_v30 = vadd.f32 %v6457_v31, %v4240_v17  ;;  %v4244_v17 = vld [vmem:[#allocation14 + $0x1f8] sm:$0xff]  ;;  %v9358_v6 = vld [vmem:[#allocation21_spill] sm:$0xff] }
 0x605   : > { %v4474_v24 = vpop.f32.mrf.mxu1 }
 0x606   : > { %4534 = vmax.xlane.f32.xlu1 %v8921_v56 }
 0x607   : > { %v6460_v4 = vpop.f32.mrf.mxu1 }
 0x608   : > { %v4496_v9 = vadd.f32 %v6460_v4, %v4243_v8  ;;  %4528 = vmax.xlane.f32.xlu0 %v8925_v10  ;;  %v8939_v8 = vadd.f32 %v4483_v30, %v9356_v5  ;;  %v4475_v4 = vadd.f32 %v4474_v24, %v4238_v47  ;;  %v9359_v24 = vld [vmem:[#allocation34_spill] sm:$0xff]  ;;  %v9360_v30 = vld [vmem:[#allocation24_spill] sm:$0xff]  ;;  %v7102_v47 = vpop.eup %7101 }
 0x609   : > { %v4487_v50 = vpop.f32.mrf.mxu1 }
 0x60a   : > { %v8933_v37 = vadd.f32 %v4496_v9, %v9355_v19  ;;  %v4488_v38 = vadd.f32 %v4487_v50, %v4241_v14  ;;  %v8948_v14 = vadd.f32 %v4475_v4, %v9358_v6  ;;  %v4242_v19 = vld [vmem:[#allocation14 + $0x1e8] sm:$0xff]  ;;  %v7104_v4 = vpop.eup %7103 }
 0x60b   : > { %v3433_v34 = vpop.permute.xlu1 %3432  ;;  %v6461_v31 = vpop.f32.mrf.mxu1 }
 0x60c   : > { %3481 = vst.msk [vmem:[#allocation5] sm:$0xf] %vm3480_vm0, %v3433_v34  ;;  %4538 = vmax.xlane.f32.xlu0 %v8930_v51  ;;  %4546 = vmax.xlane.f32.xlu1 %v8933_v37  ;;  %v8942_v48 = vadd.f32 %v4488_v38, %v9357_v58  ;;  %v4499_v9 = vadd.f32 %v6461_v31, %v4244_v17  ;;  %v9361_v31 = vld [vmem:[#allocation36_spill] sm:$0xff]  ;;  %v7106_v6 = vpop.eup %7105 }
 0x60d   : > { %v4490_v50 = vpop.f32.mrf.mxu1  ;;  %v3370_v34 = vmul.f32 %v7102_v47, %v8795_v27  ;;  %v3372_v63 = vmul.f32 %v7106_v6, %v8812_v29  ;;  %v9364_v6 = vld [vmem:[#allocation33_spill] sm:$0xff] }
 0x60e   : > { %v8953_v58 = vadd.f32 %v4499_v9, %v8320_v26  ;;  %v4491_v32 = vadd.f32 %v4490_v50, %v4242_v19  ;;  %v3369_v26 = vmul.f32 %v7104_v4, %v8804_v21  ;;  %v9362_v9 = vld [vmem:[#allocation35_spill] sm:$0xff]  ;;  %v7108_v21 = vpop.eup %7107 }
 0x60f   : > { %v6063_v5 = vpack.c.bf16 %v3370_v34, %v3370_v34  ;;  %v6065_v27 = vpack.c.bf16 %v3372_v63, %v3372_v63  ;;  %v3371_v50 = vmul.f32 %v7108_v21, %v8799_v2 }
 0x610   : > { %4540 = vmax.xlane.f32.xlu0 %v8939_v8  ;;  %4542 = vmax.xlane.f32.xlu1 %v8942_v48  ;;  %v8957_v38 = vadd.f32 %v4491_v32, %v9360_v30  ;;  %v6062_v17 = vpack.c.bf16 %v3369_v26, %v3369_v26  ;;  %v9363_v32 = vld [vmem:[#allocation38_spill] sm:$0xff] }
 0x611   : > { %v6064_v18 = vpack.c.bf16 %v3371_v50, %v3371_v50 }
 0x614   : > { %4536 = vmax.xlane.f32.xlu0 %v8948_v14  ;;  %2451 = vadd.xlane.f32.xlu1 %v9359_v24 }
 0x618   : > { %4548 = vmax.xlane.f32.xlu0 %v8953_v58 }
 0x61c   : > { %4544 = vmax.xlane.f32.xlu0 %v8957_v38 }
 0x625   : > { %3436 = vrot.lane.b32.xlu1 %v6063_v5, %s7437_s24 }
 0x632   : > { %3434 = vrot.lane.b32.xlu0 %v6062_v17, %s7437_s24 }
 0x649   : > { %2455 = vadd.xlane.f32.xlu1 %v9361_v31 }
 0x651   : > { %2453 = vadd.xlane.f32.xlu0 %v9362_v9 }
 0x655   : > { %3899 = vadd.xlane.f32.xlu0 %v8716_v7 }
 0x659   : > { %3901 = vadd.xlane.f32.xlu0 %v8713_v40 }
 0x65a   : > { %3440 = vrot.lane.b32.xlu1 %v6065_v27, %s7437_s24 }
 0x66f   : > { %3438 = vrot.lane.b32.xlu0 %v6064_v18, %s7437_s24 }
 0x67d   : > { %v4523_v19 = vpop.xlane.xlu0 %4522 }
 0x67e   : > { %v4552_v24 = vsub.f32 %v8894_v49, %v4523_v19  ;;  %2459 = vadd.xlane.f32.xlu1 %v9363_v32 }
 0x67f   : > { %v4519_v29 = vpop.xlane.xlu1 %4518 }
 0x680   : > { %v4570_v7 = vmul.f32 1.442695, %v4552_v24  ;;  %v4550_v30 = vsub.f32 %v8897_v35, %v4519_v29 }
 0x681   : > { %v4525_v28 = vpop.xlane.xlu0 %4524 }
 0x682   : > { %7109 = vpow2.f32 %v4570_v7  ;;  %v4566_v40 = vmul.f32 1.442695, %v4550_v30  ;;  %v4553_v47 = vsub.f32 %v8901_v22, %v4525_v28 }
 0x684   : > { %v4572_v34 = vmul.f32 1.442695, %v4553_v47  ;;  %7111 = vpow2.f32 %v4566_v40 }
 0x685   : > { %v4521_v5 = vpop.xlane.xlu0 %4520 }
 0x686   : > { %v4551_v2 = vsub.f32 %v8906_v61, %v4521_v5  ;;  %7113 = vpow2.f32 %v4572_v34 }
 0x687   : > { %v4527_v26 = vpop.xlane.xlu1 %4526 }
 0x688   : > { %v4568_v4 = vmul.f32 1.442695, %v4551_v2  ;;  %v4554_v17 = vsub.f32 %v8909_v16, %v4527_v26 }
 0x689   : > { %v4531_v49 = vpop.xlane.xlu0 %4530 }
 0x68a   : > { %7115 = vpow2.f32 %v4568_v4  ;;  %v4556_v22 = vsub.f32 %v8913_v52, %v4531_v49  ;;  %v4574_v63 = vmul.f32 1.442695, %v4554_v17 }
 0x68b   : > { %7117 = vrcp.f32 %v8852_v1 }
 0x68c   : > { %7119 = vrcp.f32 %v8824_v53 }
 0x68d   : > { %v4533_v31 = vpop.xlane.xlu0 %4532  ;;  %7121 = vpow2.f32 %v4574_v63 }
 0x68e   : > { %v4557_v35 = vsub.f32 %v8918_v44, %v4533_v31  ;;  %2457 = vadd.xlane.f32.xlu0 %v9364_v6  ;;  %v4578_v44 = vmul.f32 1.442695, %v4556_v22 }
 0x68f   : > { %v7110_v9 = vpop.eup %7109  ;;  %v4535_v27 = vpop.xlane.xlu1 %4534 }
 0x690   : > { %4602 = vadd.xlane.f32.xlu1 %v7110_v9  ;;  %v4580_v61 = vmul.f32 1.442695, %v4557_v35 }
 0x691   : > { %v4529_v21 = vpop.xlane.xlu0 %4528  ;;  %v7112_v16 = vpop.eup %7111 }
 0x692   : > { %v4555_v50 = vsub.f32 %v8925_v10, %v4529_v21  ;;  %3903 = vadd.xlane.f32.xlu0 %v8720_v42  ;;  %7123 = vpow2.f32 %v4580_v61  ;;  %v4558_v42 = vsub.f32 %v8921_v56, %v4535_v27 }
 0x693   : > { %v8988_v52 = vpop.eup %7113 }
 0x694   : > { %v4576_v18 = vmul.f32 1.442695, %v4555_v50  ;;  %4598 = vadd.xlane.f32.xlu1 %v7112_v16  ;;  %v4631_v29 = vpack.c.bf16 %v8988_v52, %v7110_v9  ;;  %v4582_v30 = vmul.f32 1.442695, %v4558_v42 }
 0x695   : > { %v4539_v1 = vpop.xlane.xlu0 %4538  ;;  %v4547_v19 = vpop.xlane.xlu1 %4546 }
 0x696   : > { %7125 = vpow2.f32 %v4576_v18  ;;  %3905 = vadd.xlane.f32.xlu0 %v8723_v46  ;;  %v4560_v28 = vsub.f32 %v8930_v51, %v4539_v1 }
 0x697   : > { %v8991_v24 = vpop.eup %7115  ;;  %7127 = vpow2.f32 %v4578_v44 }
 0x698   : > { %v4630_v10 = vpack.c.bf16 %v8991_v24, %v7112_v16  ;;  %v7118_v40 = vpop.eup %7117  ;;  %7129 = vpow2.f32 %v4582_v30  ;;  %v4586_v56 = vmul.f32 1.442695, %v4560_v28 }
 0x699   : > { %v4541_v53 = vpop.xlane.xlu0 %4540  ;;  %v4543_v32 = vpop.xlane.xlu1 %4542  ;;  %v3374_v2 = vmul.f32 %v7118_v40, %v8810_v60  ;;  %v4564_v60 = vsub.f32 %v8933_v37, %v4547_v19 }
 0x69a   : > { %v4561_v7 = vsub.f32 %v8939_v8, %v4541_v53  ;;  %6478 = vmatprep.mubr.bf16.mxu0 %v4630_v10  ;;  %v7120_v4 = vpop.eup %7119  ;;  %v4562_v26 = vsub.f32 %v8942_v48, %v4543_v32 }
 0x69b   : > { %6479 = vmatmul.mubr.bf16.vlgmr.msra.gmra.mxu0 %v4631_v29  ;;  %v7122_v8 = vpop.eup %7121  ;;  %v6067_v6 = vpack.c.bf16 %v3374_v2, %v3374_v2  ;;  %v3373_v21 = vmul.f32 %v7120_v4, %v8820_v12  ;;  %v4594_v50 = vmul.f32 1.442695, %v4564_v60 }
 0x69c   : > { %v4588_v46 = vmul.f32 1.442695, %v4561_v7  ;;  %v4590_v9 = vmul.f32 1.442695, %v4562_v26 }
 0x69d   : > { %v4537_v47 = vpop.xlane.xlu0 %4536  ;;  %v2452_v34 = vpop.xlane.xlu1 %2451  ;;  %v6066_v44 = vpack.c.bf16 %v3373_v21, %v3373_v21  ;;  %v9366_v21 = vld [vmem:[#allocation37_spill] sm:$0xff] }
 0x69e   : > { %v4559_v5 = vsub.f32 %v8948_v14, %v4537_v47  ;;  %7131 = vrcp.f32 %v2452_v34  ;;  %v9365_v47 = vld [vmem:[#allocation39_spill] sm:$0xff] }
 0x69f   : > { %7133 = vpow2.f32 %v4588_v46  ;;  %v9001_v31 = vpop.eup %7123 }
 0x6a0   : > { %v4584_v49 = vmul.f32 1.442695, %v4559_v5 }
 0x6a1   : > { %v4549_v17 = vpop.xlane.xlu0 %4548  ;;  %v3437_v51 = vpop.permute.xlu1 %3436 }
 0x6a2   : > { %7135 = vpow2.f32 %v4584_v49  ;;  %v4565_v35 = vsub.f32 %v8953_v58, %v4549_v17  ;;  %3483 = vst.msk [vmem:[#allocation5 + $0x10] sm:$0xf] %vm3480_vm0, %v3437_v51 }
 0x6a3   : > { %v9005_v14 = vpop.eup %7125  ;;  %7137 = vpow2.f32 %v4586_v56 }
 0x6a4   : > { %v7128_v48 = vpop.eup %7127  ;;  %v4632_v22 = vpack.c.bf16 %v9005_v14, %v7122_v8  ;;  %v4596_v63 = vmul.f32 1.442695, %v4565_v35  ;;  %7139 = vpow2.f32 %v4590_v9 }
 0x6a5   : > { %v4545_v61 = vpop.xlane.xlu0 %4544  ;;  %3444 = vrot.lane.b32.xlu1 %v6067_v6, %s7437_s24  ;;  %v4633_v27 = vpack.c.bf16 %v9001_v31, %v7128_v48  ;;  %v7130_v18 = vpop.eup %7129 }
 0x6a6   : > { %v4563_v58 = vsub.f32 %v8957_v38, %v4545_v61  ;;  %6482 = vmatprep.mubr.bf16.mxu0 %v4632_v22  ;;  %7141 = vpow2.f32 %v4596_v63 }
 0x6a7   : > { %6483 = vmatmul.mubr.bf16.gmra.mxu0 %v4633_v27 }
 0x6a8   : > { %v4592_v37 = vmul.f32 1.442695, %v4563_v58 }
 0x6a9   : > { %v3435_v16 = vpop.permute.xlu0 %3434 }
 0x6aa   : > { %7143 = vpow2.f32 %v4592_v37  ;;  %3482 = vst.msk [vmem:[#allocation5 + $0x8] sm:$0xf] %vm3480_vm0, %v3435_v16 }
 0x6ab   : > { %7145 = vpow2.f32 %v4594_v50  ;;  %v7132_v1 = vpop.eup %7131 }
 0x6ac   : > { %3442 = vrot.lane.b32.xlu0 %v6066_v44, %s7437_s24  ;;  %v7134_v19 = vpop.eup %7133  ;;  %v2644_v38 = vmul.f32 %v7132_v1, %v8774_v43 }
 0x6ae   : > { %v6053_v53 = vpack.c.bf16 %v2644_v38, %v2644_v38  ;;  %v6866_v38 = vld [vmem:[#allocation12 + $0x74] ss:$8 sps:$4 sm:$0xff]  }
 0x6af   : > { %v7136_v42 = vpop.eup %7135  ;;  %5231 = vmatprep.subr.bf16.mxu0 %v6866_v38 }
 0x6b0   : > { %v7138_v12 = vpop.eup %7137  ;;  %v4634_v10 = vpack.c.bf16 %v7136_v42, %v7130_v18  ;;  %2725 = vst.msk [vmem:[#allocation5 + $0x40] sm:$0xf] %vm2716_vm2, %v6053_v53  ;;  %v6876_v53 = vld [vmem:[#allocation12 + $0x30] ss:$8 sps:$4 sm:$0xff]  }
 0x6b1   : > { %v4635_v32 = vpack.c.bf16 %v7134_v19, %v7138_v12  ;;  %v7140_v29 = vpop.eup %7139 }
 0x6b2   : > { %6486 = vmatprep.mubr.bf16.mxu0 %v4634_v10  ;;  %v6875_v10 = vld [vmem:[#allocation12 + $0x44] ss:$8 sps:$4 sm:$0xff]  }
 0x6b3   : > { %6487 = vmatmul.mubr.bf16.gmra.mxu0 %v4635_v32  ;;  %v7142_v7 = vpop.eup %7141  ;;  %v6878_v32 = vld [vmem:[#allocation12 + $0x34] ss:$8 sps:$4 sm:$0xff]  }
 0x6b7   : > { %v7144_v30 = vpop.eup %7143 }
 0x6b8   : > { %v7146_v28 = vpop.eup %7145  ;;  %v4636_v40 = vpack.c.bf16 %v7144_v30, %v7140_v29 }
 0x6b9   : > { %v4637_v46 = vpack.c.bf16 %v7142_v7, %v7146_v28 }
 0x6ba   : > { %6490 = vmatprep.mubr.bf16.mxu0 %v4636_v40  ;;  %v6884_v40 = vld [vmem:[#allocation12 + $0x14] ss:$8 sps:$4 sm:$0xff]  }
 0x6bb   : > { %6491 = vmatmul.mubr.bf16.gmra.mxu0 %v4637_v46  ;;  %v6882_v46 = vld [vmem:[#allocation12 + $0x10] ss:$8 sps:$4 sm:$0xff]  }
 0x6c9   : > { %4610 = vadd.xlane.f32.xlu1 %v7128_v48 }
 0x6cb   : > { %2461 = vadd.xlane.f32.xlu0 %v9365_v47  ;;  %v6887_v47 = vld [vmem:[#allocation12 + $0x4] ss:$8 sps:$4 sm:$0xff]  }
 0x6cd   : > { %4606 = vadd.xlane.f32.xlu1 %v7122_v8 }
 0x6cf   : > { %3907 = vadd.xlane.f32.xlu0 %v8754_v13 }
 0x6d1   : > { %4618 = vadd.xlane.f32.xlu1 %v7138_v12  ;;  %v6872_v12 = vld [vmem:[#allocation12 + $0x54] ss:$8 sps:$4 sm:$0xff]  }
 0x6d2   : > { %v2456_v43 = vpop.xlane.xlu1 %2455 }
 0x6d3   : > { %7147 = vrcp.f32 %v2456_v43  ;;  %4604 = vadd.xlane.f32.xlu0 %v8988_v52  ;;  %v6888_v43 = vld [vmem:[#allocation12 + $0xf0] ss:$8 sps:$4 sm:$0xff]  }
 0x6d5   : > { %4614 = vadd.xlane.f32.xlu1 %v7130_v18 }
 0x6d6   : > { %v3441_v34 = vpop.permute.xlu1 %3440 }
 0x6d7   : > { %3485 = vst.msk [vmem:[#allocation5 + $0x20] sm:$0xf] %vm3480_vm0, %v3441_v34  ;;  %4600 = vadd.xlane.f32.xlu0 %v8991_v24 }
 0x6d9   : > { %4626 = vadd.xlane.f32.xlu1 %v7146_v28 }
 0x6da   : > { %v2454_v5 = vpop.xlane.xlu0 %2453 }
 0x6db   : > { %7149 = vrcp.f32 %v2454_v5  ;;  %3909 = vadd.xlane.f32.xlu0 %v8758_v33  ;;  %v6893_v5 = vld [vmem:[#allocation12 + $0xe4] ss:$8 sps:$4 sm:$0xff]  }
 0x6dd   : > { %4622 = vadd.xlane.f32.xlu1 %v7140_v29 }
 0x6de   : > { %v3900_v56 = vpop.xlane.xlu0 %3899 }
 0x6df   : > { %7151 = vrcp.f32 %v3900_v56  ;;  %4612 = vadd.xlane.f32.xlu0 %v9001_v31  ;;  %v6891_v56 = vld [vmem:[#allocation12 + $0xe0] ss:$8 sps:$4 sm:$0xff]  }
 0x6e0   : > { %v7148_v13 = vpop.eup %7147 }
 0x6e1   : > { %v2646_v2 = vmul.f32 %v7148_v13, %v8772_v39 }
 0x6e2   : > { %v3902_v52 = vpop.xlane.xlu0 %3901 }
 0x6e3   : > { %7153 = vrcp.f32 %v3902_v52  ;;  %4608 = vadd.xlane.f32.xlu0 %v9005_v14  ;;  %v6055_v4 = vpack.c.bf16 %v2646_v2, %v2646_v2  ;;  %v6896_v2 = vld [vmem:[#allocation12 + $0xd4] ss:$8 sps:$4 sm:$0xff]   ;;  %v6894_v52 = vld [vmem:[#allocation12 + $0xd0] ss:$8 sps:$4 sm:$0xff]  }
 0x6e4   : > { %7155 = vrcp.f32 %v8816_v62 }
 0x6e5   : > { %2727 = vst.msk [vmem:[#allocation5 + $0x50] sm:$0xf] %vm2716_vm2, %v6055_v4  ;;  %v6899_v4 = vld [vmem:[#allocation12 + $0xc4] ss:$8 sps:$4 sm:$0xff]  }
 0x6e6   : > { %v3439_v24 = vpop.permute.xlu0 %3438 }
 0x6e7   : > { %3484 = vst.msk [vmem:[#allocation5 + $0x18] sm:$0xf] %vm3480_vm0, %v3439_v24  ;;  %4620 = vadd.xlane.f32.xlu0 %v7134_v19 }
 0x6e8   : > { %v7150_v33 = vpop.eup %7149 }
 0x6e9   : > { %v2645_v26 = vmul.f32 %v7150_v33, %v8780_v15 }
 0x6eb   : > { %4616 = vadd.xlane.f32.xlu0 %v7136_v42  ;;  %v6054_v49 = vpack.c.bf16 %v2645_v26, %v2645_v26  ;;  %v6869_v42 = vld [vmem:[#allocation12 + $0x64] ss:$8 sps:$4 sm:$0xff]  }
 0x6ec   : > { %v7152_v8 = vpop.eup %7151 }
 0x6ed   : > { %2726 = vst.msk [vmem:[#allocation5 + $0x48] sm:$0xf] %vm2716_vm2, %v6054_v49  ;;  %v4092_v39 = vmul.f32 %v7152_v8, %v8879_v3 }
 0x6ef   : > { %4628 = vadd.xlane.f32.xlu0 %v7142_v7  ;;  %v6085_v17 = vpack.c.bf16 %v4092_v39, %v4092_v39  ;;  %v6881_v7 = vld [vmem:[#allocation12 + $0x24] ss:$8 sps:$4 sm:$0xff]  }
 0x6f0   : > { %v7154_v51 = vpop.eup %7153 }
 0x6f1   : > { %4172 = vst.msk [vmem:[#allocation5 + $0x44] sm:$0xf] %vm2716_vm2, %v6085_v17  ;;  %v4093_v31 = vmul.f32 %v7154_v51, %v8883_v41  ;;  %v7156_v15 = vpop.eup %7155  ;;  %v6897_v17 = vld [vmem:[#allocation12 + $0xc0] ss:$8 sps:$4 sm:$0xff]  }
 0x6f2   : > { %v3375_v14 = vmul.f32 %v7156_v15, %v8818_v0  ;;  %v6902_v15 = vld [vmem:[#allocation12 + $0xb4] ss:$8 sps:$4 sm:$0xff]  }
 0x6f3   : > { %4624 = vadd.xlane.f32.xlu0 %v7144_v30  ;;  %v6086_v35 = vpack.c.bf16 %v4093_v31, %v4093_v31  ;;  %v6879_v30 = vld [vmem:[#allocation12 + $0x20] ss:$8 sps:$4 sm:$0xff]  }
 0x6f4   : > { %v6068_v60 = vpack.c.bf16 %v3375_v14, %v3375_v14 }
 0x6f5   : > { %4173 = vst.msk [vmem:[#allocation5 + $0x4c] sm:$0xf] %vm2716_vm2, %v6086_v35 }
 0x707   : > { %v2460_v6 = vpop.xlane.xlu1 %2459 }
 0x708   : > { %7157 = vrcp.f32 %v2460_v6  ;;  %v6900_v6 = vld [vmem:[#allocation12 + $0xb0] ss:$8 sps:$4 sm:$0xff]  }
 0x709   : > { %3446 = vrot.lane.b32.xlu0 %v6068_v60, %s7437_s24 }
 0x715   : > { %v7158_v3 = vpop.eup %7157 }
 0x716   : > { %v2648_v48 = vmul.f32 %v7158_v3, %v8786_v54 }
 0x717   : > { %v2458_v9 = vpop.xlane.xlu0 %2457 }
 0x718   : > { %7159 = vrcp.f32 %v2458_v9  ;;  %v6057_v41 = vpack.c.bf16 %v2648_v48, %v2648_v48  ;;  %v6905_v9 = vld [vmem:[#allocation12 + $0xa4] ss:$8 sps:$4 sm:$0xff]  }
 0x719   : > { %v4603_v22 = vpop.xlane.xlu1 %4602 }
 0x71a   : > { %2729 = vst.msk [vmem:[#allocation5 + $0x60] sm:$0xf] %vm2716_vm2, %v6057_v41 }
 0x71b   : > { %v3904_v62 = vpop.xlane.xlu0 %3903 }
 0x71c   : > { %7161 = vrcp.f32 %v3904_v62 }
 0x71d   : > { %v4599_v63 = vpop.xlane.xlu1 %4598 }
 0x71f   : > { %v3906_v61 = vpop.xlane.xlu0 %3905 }
 0x720   : > { %7163 = vrcp.f32 %v3906_v61  ;;  %v6903_v61 = vld [vmem:[#allocation12 + $0xa0] ss:$8 sps:$4 sm:$0xff]  }
 0x721   : > { %v3445_v0 = vpop.permute.xlu1 %3444  ;;  %7165 = vrcp.f32 %v8829_v59  ;;  %v6070_v59 = vpack.c.bf16 %v8839_v57, %v8839_v57  ;;  %v6890_v57 = vld [vmem:[#allocation12 + $0xf4] ss:$8 sps:$4 sm:$0xff]  }
 0x722   : > { %3487 = vst.msk [vmem:[#allocation5 + $0x30] sm:$0xf] %vm3480_vm0, %v3445_v0  ;;  %7167 = vrcp.f32 %v4603_v22 }
 0x723   : > { %v3443_v27 = vpop.permute.xlu0 %3442  ;;  %7169 = vrcp.f32 %v4599_v63 }
 0x724   : > { %3486 = vst.msk [vmem:[#allocation5 + $0x28] sm:$0xf] %vm3480_vm0, %v3443_v27 }
 0x725   : > { %v7160_v58 = vpop.eup %7159 }
 0x726   : > { %v2647_v54 = vmul.f32 %v7160_v58, %v8778_v45  ;;  %v6864_v45 = vld [vmem:[#allocation12 + $0x70] ss:$8 sps:$4 sm:$0xff]   ;;  %v6908_v58 = vld [vmem:[#allocation12 + $0x94] ss:$8 sps:$4 sm:$0xff]  }
 0x727   : > { %5232 = vmatpush1.bf16.msra.mxu0 %v6864_v45 }
 0x728   : > { %2465 = vadd.xlane.f32.xlu0 %v9366_v21  ;;  %v6056_v50 = vpack.c.bf16 %v2647_v54, %v2647_v54  ;;  %5233 = vmatprep.subr.bf16.mxu0 %v6869_v42  ;;  %v9367_v21 = vld [vmem:[#allocation46_spill] sm:$0xff]  ;;  %v6909_v42 = vld [vmem:[#allocation12 + $0x80] ss:$8 sps:$4 sm:$0xff]  }
 0x729   : > { %v7162_v37 = vpop.eup %7161 }
 0x72a   : > { %2728 = vst.msk [vmem:[#allocation5 + $0x58] sm:$0xf] %vm2716_vm2, %v6056_v50  ;;  %v4094_v16 = vmul.f32 %v7162_v37, %v8877_v36  ;;  %v6867_v36 = vld [vmem:[#allocation12 + $0x60] ss:$8 sps:$4 sm:$0xff]  }
 0x72b   : > { %5234 = vmatpush1.bf16.msra.mxu0 %v6867_v36 }
 0x72c   : > { %3911 = vadd.xlane.f32.xlu0 %v8762_v11  ;;  %v6087_v44 = vpack.c.bf16 %v4094_v16, %v4094_v16  ;;  %v6870_v11 = vld [vmem:[#allocation12 + $0x50] ss:$8 sps:$4 sm:$0xff]   ;;  %5235 = vmatprep.subr.bf16.mxu0 %v6872_v12 }
 0x72d   : > { %v7164_v18 = vpop.eup %7163  ;;  %v6906_v16 = vld [vmem:[#allocation12 + $0x90] ss:$8 sps:$4 sm:$0xff]  }
 0x72e   : > { %v4095_v1 = vmul.f32 %v7164_v18, %v8881_v25  ;;  %4174 = vst.msk [vmem:[#allocation5 + $0x54] sm:$0xf] %vm2716_vm2, %v6087_v44  ;;  %v6873_v25 = vld [vmem:[#allocation12 + $0x40] ss:$8 sps:$4 sm:$0xff]  }
 0x72f   : > { %5236 = vmatpush1.bf16.msra.mxu0 %v6870_v11 }
 0x730   : > { %3913 = vadd.xlane.f32.xlu0 %v8756_v55  ;;  %v6088_v19 = vpack.c.bf16 %v4095_v1, %v4095_v1  ;;  %5237 = vmatprep.subr.bf16.mxu0 %v6875_v10  ;;  %v7166_v55 = vpop.eup %7165  ;;  %v6911_v1 = vld [vmem:[#allocation12 + $0x84] ss:$8 sps:$4 sm:$0xff]  }
 0x731   : > { %v3379_v29 = vmul.f32 %v7166_v55, %v8833_v23  ;;  %v6885_v23 = vld [vmem:[#allocation12] ss:$8 sps:$4 sm:$0xff]   ;;  %v7168_v24 = vpop.eup %7167 }
 0x732   : > { %4175 = vst.msk [vmem:[#allocation5 + $0x5c] sm:$0xf] %vm2716_vm2, %v6088_v19  ;;  %v7170_v8 = vpop.eup %7169 }
 0x733   : > { %5238 = vmatpush1.bf16.msra.mxu0 %v6873_v25  ;;  %v6072_v28 = vpack.c.bf16 %v3379_v29, %v3379_v29 }
 0x734   : > { %5239 = vmatprep.subr.bf16.mxu0 %v6878_v32 }
 0x737   : > { %5240 = vmatpush1.bf16.msra.mxu0 %v6876_v53 }
 0x738   : > { %5241 = vmatprep.subr.bf16.mxu0 %v6881_v7  ;;  %v9368_v7 = vld [vmem:[#allocation48_spill] sm:$0xff] }
 0x73b   : > { %5242 = vmatpush1.bf16.msra.mxu0 %v6879_v30 }
 0x73c   : > { %5243 = vmatprep.subr.bf16.mxu0 %v6884_v40 }
 0x73f   : > { %5244 = vmatpush1.bf16.msra.mxu0 %v6882_v46 }
 0x740   : > { %5245 = vmatprep.subr.bf16.mxu0 %v6887_v47 }
 0x743   : > { %5246 = vmatpush1.bf16.msra.mxu0 %v6885_v23 }
 0x744   : > { %5247 = vmatprep.subr.bf16.mxu0 %v6890_v57 }
 0x746   : > { %3450 = vrot.lane.b32.xlu0 %v6070_v59, %s7437_s24 }
 0x747   : > { %5248 = vmatpush2.bf16.msra.mxu0 %v6888_v43 }
 0x748   : > { %5249 = vmatprep.subr.bf16.mxu0 %v6893_v5 }
 0x74a   : > { %3454 = vrot.lane.b32.xlu0 %v6072_v28, %s7437_s24 }
 0x74b   : > { %5250 = vmatpush2.bf16.msra.mxu0 %v6891_v56 }
 0x74c   : > { %5251 = vmatprep.subr.bf16.mxu0 %v6896_v2 }
 0x74f   : > { %5252 = vmatpush2.bf16.msra.mxu0 %v6894_v52 }
 0x750   : > { %5253 = vmatprep.subr.bf16.mxu0 %v6899_v4 }
 0x752   : > { %v4611_v51 = vpop.xlane.xlu1 %4610 }
 0x753   : > { %5254 = vmatpush2.bf16.msra.mxu0 %v6897_v17 }
 0x754   : > { %v2462_v34 = vpop.xlane.xlu0 %2461  ;;  %5255 = vmatprep.subr.bf16.mxu0 %v6902_v15 }
 0x755   : > { %7171 = vrcp.f32 %v2462_v34 }
 0x756   : > { %v4607_v22 = vpop.xlane.xlu1 %4606 }
 0x757   : > { %5256 = vmatpush2.bf16.msra.mxu0 %v6900_v6 }
 0x758   : > { %v3908_v13 = vpop.xlane.xlu0 %3907  ;;  %5257 = vmatprep.subr.bf16.mxu0 %v6905_v9 }
 0x759   : > { %7173 = vrcp.f32 %v3908_v13 }
 0x75b   : > { %v6480_v33 = vpop.f32.mrf.mxu0  ;;  %5258 = vmatpush2.bf16.msra.mxu0 %v6903_v61  ;;  %v4619_v61 = vpop.xlane.xlu1 %4618 }
 0x75c   : > { %v4817_v26 = vmul.f32 %v7168_v24, %v6480_v33  ;;  %v4605_v49 = vpop.xlane.xlu0 %4604  ;;  %5259 = vmatprep.subr.bf16.mxu0 %v6908_v58  ;;  %v9372_v58 = vld [vmem:[#allocation40_spill] sm:$0xff] }
 0x75d   : > { %7175 = vrcp.f32 %v4605_v49  ;;  %v4736_v39 = vpop.f32.mrf.mxu0 }
 0x75e   : > { %v6095_v31 = vpack.c.bf16 %v4817_v26, %v4817_v26  ;;  %v4815_v35 = vmul.f32 %v7170_v8, %v4736_v39 }
 0x75f   : > { %v6481_v60 = vpop.f32.mrf.mxu0  ;;  %5260 = vmatpush2.bf16.msra.mxu0 %v6906_v16 }
 0x760   : > { %v4601_v14 = vpop.xlane.xlu0 %4600  ;;  %4883 = vrot.lane.b32.xlu1 %v6095_v31, %s7437_s24  ;;  %v6093_v48 = vpack.c.bf16 %v4815_v35, %v4815_v35  ;;  %5261 = vmatprep.subr.bf16.mxu0 %v6911_v1  ;;  %v9369_v35 = vld [vmem:[#allocation31_spill] sm:$0xff] }
 0x761   : > { %7177 = vrcp.f32 %v4601_v14  ;;  %v4739_v63 = vpop.f32.mrf.mxu0  ;;  %v6074_v15 = vpack.c.bf16 %v9369_v35, %v9369_v35 }
 0x762   : > { %v7172_v3 = vpop.eup %7171  ;;  %7179 = vrcp.f32 %v4611_v51 }
 0x763   : > { %v2649_v41 = vmul.f32 %v7172_v3, %v8792_v20  ;;  %5262 = vmatpush2.bf16.msra.mxu0 %v6909_v42 }
 0x764   : > { %v3910_v62 = vpop.xlane.xlu0 %3909  ;;  %4879 = vrot.lane.b32.xlu1 %v6093_v48, %s7437_s24 }
 0x765   : > { %7181 = vrcp.f32 %v3910_v62  ;;  %v6058_v0 = vpack.c.bf16 %v2649_v41, %v2649_v41  ;;  %v9370_v41 = vld [vmem:[#allocation30_spill] sm:$0xff] }
 0x766   : > { %v7174_v27 = vpop.eup %7173  ;;  %7183 = vrcp.f32 %v4607_v22  ;;  %v6076_v22 = vpack.c.bf16 %v9370_v41, %v9370_v41 }
 0x767   : > { %v6484_v54 = vpop.f32.mrf.mxu0  ;;  %2730 = vst.msk [vmem:[#allocation5 + $0x68] sm:$0xf] %vm2716_vm2, %v6058_v0  ;;  %v4096_v50 = vmul.f32 %v7174_v27, %v9367_v21  ;;  %v9371_v0 = vld [vmem:[#allocation42_spill] sm:$0xff]  ;;  %v4615_v27 = vpop.xlane.xlu1 %4614 }
 0x768   : > { %v4613_v37 = vpop.xlane.xlu0 %4612 }
 0x769   : > { %7185 = vrcp.f32 %v4613_v37  ;;  %v4752_v20 = vpop.f32.mrf.mxu0  ;;  %v6089_v44 = vpack.c.bf16 %v4096_v50, %v4096_v50  ;;  %v9374_v37 = vld [vmem:[#allocation28_spill] sm:$0xff] }
 0x76a   : > { %v7176_v18 = vpop.eup %7175 }
 0x76b   : > { %v4818_v19 = vmul.f32 %v7176_v18, %v6481_v60  ;;  %4176 = vst.msk [vmem:[#allocation5 + $0x64] sm:$0xf] %vm2716_vm2, %v6089_v44  ;;  %v6485_v36 = vpop.f32.mrf.mxu0  ;;  %v4627_v16 = vpop.xlane.xlu1 %4626  ;;  %v9375_v18 = vld [vmem:[#allocation44_spill] sm:$0xff] }
 0x76c   : > { %v4609_v45 = vpop.xlane.xlu0 %4608 }
 0x76d   : > { %v6096_v38 = vpack.c.bf16 %v4818_v19, %v4818_v19  ;;  %7187 = vrcp.f32 %v4609_v45  ;;  %v4755_v32 = vpop.f32.mrf.mxu0 }
 0x76e   : > { %v7178_v11 = vpop.eup %7177 }
 0x76f   : > { %v4816_v12 = vmul.f32 %v7178_v11, %v4739_v63  ;;  %4885 = vrot.lane.b32.xlu1 %v6096_v38, %s7437_s24  ;;  %v7180_v25 = vpop.eup %7179 }
 0x770   : > { %v4621_v10 = vpop.xlane.xlu0 %4620  ;;  %v4821_v53 = vmul.f32 %v7180_v25, %v6484_v54  ;;  %v9373_v54 = vld [vmem:[#allocation41_spill] sm:$0xff] }
 0x771   : > { %v6094_v55 = vpack.c.bf16 %v4816_v12, %v4816_v12  ;;  %7189 = vrcp.f32 %v4621_v10 }
 0x772   : > { %v7182_v29 = vpop.eup %7181  ;;  %v6099_v46 = vpack.c.bf16 %v4821_v53, %v4821_v53 }
 0x773   : > { %v9063_v59 = vpop.f32.mrf.mxu0  ;;  %4881 = vrot.lane.b32.xlu1 %v6094_v55, %s7437_s24  ;;  %v4097_v30 = vmul.f32 %v7182_v29, %v9368_v7  ;;  %v7184_v28 = vpop.eup %7183  ;;  %v9376_v55 = vld [vmem:[#allocation43_spill] sm:$0xff] }
 0x774   : > { %v4617_v40 = vpop.xlane.xlu0 %4616  ;;  %v4819_v47 = vmul.f32 %v7184_v28, %v4752_v20 }
 0x775   : > { %v4768_v23 = vpop.f32.mrf.mxu0  ;;  %v6090_v57 = vpack.c.bf16 %v4097_v30, %v4097_v30  ;;  %v9378_v30 = vld [vmem:[#allocation27_spill] sm:$0xff] }
 0x776   : > { %v7186_v43 = vpop.eup %7185  ;;  %v6097_v56 = vpack.c.bf16 %v4819_v47, %v4819_v47 }
 0x777   : > { %v6489_v34 = vpop.f32.mrf.mxu0  ;;  %4891 = vrot.lane.b32.xlu1 %v6099_v46, %s7437_s24  ;;  %4177 = vst.msk [vmem:[#allocation5 + $0x6c] sm:$0xf] %vm2716_vm2, %v6090_v57  ;;  %v4822_v13 = vmul.f32 %v7186_v43, %v6485_v36  ;;  %v4623_v36 = vpop.xlane.xlu1 %4622 }
 0x778   : > { %v4629_v5 = vpop.xlane.xlu0 %4628 }
 0x779   : > { %v4771_v52 = vpop.f32.mrf.mxu0  ;;  %v6100_v24 = vpack.c.bf16 %v4822_v13, %v4822_v13 }
 0x77a   : > { %v7188_v2 = vpop.eup %7187 }
 0x77b   : > { %4887 = vrot.lane.b32.xlu1 %v6097_v56, %s7437_s24  ;;  %v4820_v33 = vmul.f32 %v7188_v2, %v4755_v32  ;;  %v9070_v49 = vpop.f32.mrf.mxu0  ;;  %v9377_v32 = vld [vmem:[#allocation26_spill] sm:$0xff]  ;;  %v9380_v2 = vld [vmem:[#allocation29_spill] sm:$0xff] }
 0x77c   : > { %v4625_v4 = vpop.xlane.xlu0 %4624 }
 0x77d   : > { %7191 = vrcp.f32 %v4625_v4  ;;  %v6098_v17 = vpack.c.bf16 %v4820_v33, %v4820_v33  ;;  %v9074_v31 = vpop.f32.mrf.mxu0 }
 0x77e   : > { %v7190_v26 = vpop.eup %7189  ;;  %7193 = vrcp.f32 %v4629_v5  ;;  %v9379_v5 = vld [vmem:[#allocation45_spill] sm:$0xff] }
 0x77f   : > { %v4826_v8 = vmul.f32 %v7190_v26, %v6489_v34  ;;  %4893 = vrot.lane.b32.xlu1 %v6100_v24, %s7437_s24  ;;  %v6493_v14 = vpop.f32.mrf.mxu0  ;;  %7195 = vrcp.f32 %v9371_v0 }
 0x780   : > { %v3447_v39 = vpop.permute.xlu0 %3446  ;;  %7197 = vrcp.f32 %v4615_v27 }
 0x781   : > { %v6104_v51 = vpack.c.bf16 %v4826_v8, %v4826_v8  ;;  %3488 = vst.msk [vmem:[#allocation5 + $0x38] sm:$0xf] %vm3480_vm0, %v3447_v39  ;;  %v4787_v6 = vpop.f32.mrf.mxu0  ;;  %7199 = vrcp.f32 %v4617_v40 }
 0x782   : > { %7201 = vrcp.f32 %v9373_v54 }
 0x783   : > { %4901 = vrot.lane.b32.xlu0 %v6104_v51, %s7437_s24  ;;  %4889 = vrot.lane.b32.xlu1 %v6098_v17, %s7437_s24 }
 0x787   : > { %3458 = vrot.lane.b32.xlu0 %v6074_v15, %s7437_s24  ;;  %v9382_v15 = vld [vmem:[#allocation32_spill] sm:$0xff] }
 0x78a   : > { %v7192_v60 = vpop.eup %7191 }
 0x78b   : > { %v4828_v3 = vmul.f32 %v7192_v60, %v4787_v6  ;;  %v7194_v9 = vpop.eup %7193 }
 0x78c   : > { %v4830_v62 = vmul.f32 %v7194_v9, %v6493_v14  ;;  %v7196_v21 = vpop.eup %7195 }
 0x78d   : > { %v6106_v48 = vpack.c.bf16 %v4828_v3, %v4828_v3  ;;  %v3376_v20 = vmul.f32 %v7196_v21, %v9374_v37  ;;  %v7198_v44 = vpop.eup %7197 }
 0x78e   : > { %v6108_v63 = vpack.c.bf16 %v4830_v62, %v4830_v62  ;;  %v4823_v19 = vmul.f32 %v7198_v44, %v4768_v23  ;;  %v7200_v38 = vpop.eup %7199 }
 0x78f   : > { %4905 = vrot.lane.b32.xlu0 %v6106_v48, %s7437_s24  ;;  %v6069_v45 = vpack.c.bf16 %v3376_v20, %v3376_v20  ;;  %v4824_v12 = vmul.f32 %v7200_v38, %v4771_v52  ;;  %v7202_v25 = vpop.eup %7201 }
 0x790   : > { %v6101_v11 = vpack.c.bf16 %v4823_v19, %v4823_v19  ;;  %v3378_v29 = vmul.f32 %v7202_v25, %v9377_v32 }
 0x791   : > { %v6102_v53 = vpack.c.bf16 %v4824_v12, %v4824_v12 }
 0x792   : > { %v6071_v57 = vpack.c.bf16 %v3378_v29, %v3378_v29  ;;  %v9383_v29 = vld [vmem:[#allocation25_spill] sm:$0xff] }
 0x793   : > { %3462 = vrot.lane.b32.xlu0 %v6076_v22, %s7437_s24 }
 0x797   : > { %4909 = vrot.lane.b32.xlu0 %v6108_v63, %s7437_s24  ;;  %v6912_v63 = vld [vmem:[#allocation5] ss:$8 sps:$4 sm:$0xff]  }
 0x7a7   : > { %2463 = vadd.xlane.f32.xlu1 %v9372_v58 }
 0x7b1   : > { %v2466_v50 = vpop.xlane.xlu0 %2465 }
 0x7b2   : > { %7203 = vrcp.f32 %v2466_v50 }
 0x7b3   : > { %7205 = vrcp.f32 %v4619_v61 }
 0x7b4   : > { %7207 = vrcp.f32 %v9375_v18 }
 0x7b5   : > { %v3912_v1 = vpop.xlane.xlu0 %3911 }
 0x7b6   : > { %7209 = vrcp.f32 %v3912_v1 }
 0x7b8   : > { %3448 = vrot.lane.b32.xlu1 %v6069_v45, %s7437_s24 }
 0x7b9   : > { %v3914_v42 = vpop.xlane.xlu0 %3913 }
 0x7ba   : > { %7211 = vrcp.f32 %v3914_v42 }
 0x7bb   : > { %7213 = vrcp.f32 %v4623_v36 }
 0x7bc   : > { %4895 = vrot.lane.b32.xlu1 %v6101_v11, %s7437_s24  ;;  %7215 = vrcp.f32 %v9376_v55 }
 0x7bd   : > { %v3451_v10 = vpop.permute.xlu0 %3450  ;;  %7217 = vrcp.f32 %v4627_v16 }
 0x7be   : > { %3490 = vst.msk [vmem:[#allocation5 + $0x48] sm:$0xf] %vm3480_vm0, %v3451_v10 }
 0x7bf   : > { %v7204_v7 = vpop.eup %7203 }
 0x7c0   : > { %4897 = vrot.lane.b32.xlu1 %v6102_v53, %s7437_s24  ;;  %v2651_v28 = vmul.f32 %v7204_v7, %v9378_v30  ;;  %v7206_v40 = vpop.eup %7205 }
 0x7c1   : > { %v3455_v46 = vpop.permute.xlu0 %3454  ;;  %v7208_v47 = vpop.eup %7207  ;;  %v4825_v23 = vmul.f32 %v7206_v40, %v9063_v59  ;;  %v9381_v59 = vld [vmem:[#allocation47_spill] sm:$0xff] }
 0x7c2   : > { %3492 = vst.msk [vmem:[#allocation5 + $0x58] sm:$0xf] %vm3480_vm0, %v3455_v46  ;;  %v6060_v43 = vpack.c.bf16 %v2651_v28, %v2651_v28  ;;  %v3380_v52 = vmul.f32 %v7208_v47, %v9380_v2 }
 0x7c3   : > { %v7210_v34 = vpop.eup %7209  ;;  %v6103_v13 = vpack.c.bf16 %v4825_v23, %v4825_v23 }
 0x7c4   : > { %3452 = vrot.lane.b32.xlu1 %v6071_v57, %s7437_s24  ;;  %2732 = vst.msk [vmem:[#allocation5 + $0x78] sm:$0xf] %vm2716_vm2, %v6060_v43  ;;  %v4098_v56 = vmul.f32 %v7210_v34, %v9379_v5  ;;  %v6073_v39 = vpack.c.bf16 %v3380_v52, %v3380_v52 }
 0x7c6   : > { %v6091_v4 = vpack.c.bf16 %v4098_v56, %v4098_v56 }
 0x7c7   : > { %v7212_v24 = vpop.eup %7211 }
 0x7c8   : > { %4899 = vrot.lane.b32.xlu1 %v6103_v13, %s7437_s24  ;;  %v4099_v33 = vmul.f32 %v7212_v24, %v9381_v59  ;;  %4178 = vst.msk [vmem:[#allocation5 + $0x74] sm:$0xf] %vm2716_vm2, %v6091_v4  ;;  %v7214_v26 = vpop.eup %7213  ;;  %v5344_v24 = vld [vmem:[%s7653_s28] sm:$0xff] }
 0x7c9   : > { %v4827_v8 = vmul.f32 %v7214_v26, %v9074_v31  ;;  %v7216_v51 = vpop.eup %7215 }
 0x7ca   : > { %v6092_v17 = vpack.c.bf16 %v4099_v33, %v4099_v33  ;;  %v3382_v14 = vmul.f32 %v7216_v51, %v9382_v15  ;;  %v7218_v60 = vpop.eup %7217  ;;  %v5345_v33 = vld [vmem:[%s7653_s28 + $0x8] sm:$0xff] }
 0x7cb   : > { %v6105_v35 = vpack.c.bf16 %v4827_v8, %v4827_v8  ;;  %v4829_v6 = vmul.f32 %v7218_v60, %v9070_v49  ;;  %v5348_v60 = vld [vmem:[%s7653_s28 + $0x20] sm:$0xff] }
 0x7cc   : > { %3456 = vrot.lane.b32.xlu1 %v6073_v39, %s7437_s24  ;;  %4179 = vst.msk [vmem:[#allocation5 + $0x7c] sm:$0xf] %vm2716_vm2, %v6092_v17  ;;  %v6075_v48 = vpack.c.bf16 %v3382_v14, %v3382_v14  ;;  %v5346_v39 = vld [vmem:[%s7653_s28 + $0x10] sm:$0xff] }
 0x7cd   : > { %v6107_v31 = vpack.c.bf16 %v4829_v6, %v4829_v6 }
 0x7d0   : > { %4903 = vrot.lane.b32.xlu1 %v6105_v35, %s7437_s24  ;;  %v5347_v35 = vld [vmem:[%s7653_s28 + $0x18] sm:$0xff] }
 0x7d2   : > { %v4884_v3 = vpop.permute.xlu1 %4883 }
 0x7d3   : > { %4929 = vst.msk [vmem:[#allocation5 + $0x14] sm:$0xf] %vm3480_vm0, %v4884_v3 }
 0x7d4   : > { %3460 = vrot.lane.b32.xlu1 %v6075_v48, %s7437_s24  ;;  %v5349_v48 = vld [vmem:[%s7653_s28 + $0x28] sm:$0xff] }
 0x7d6   : > { %v4880_v9 = vpop.permute.xlu1 %4879 }
 0x7d7   : > { %4927 = vst.msk [vmem:[#allocation5 + $0x4] sm:$0xf] %vm3480_vm0, %v4880_v9 }
 0x7d8   : > { %4907 = vrot.lane.b32.xlu1 %v6107_v31, %s7437_s24 }
 0x7da   : > { %v4945_v54 = vld [vmem:[#allocation5 + $0x10] sm:$0xff] }
 0x7e1   : > { %v4886_v41 = vpop.permute.xlu1 %4885 }
 0x7e2   : > { %4930 = vst.msk [vmem:[#allocation5 + $0x1c] sm:$0xf] %vm3480_vm0, %v4886_v41  ;;  %v5350_v41 = vld [vmem:[%s7653_s28 + $0x30] sm:$0xff] }
 0x7e5   : > { %v4882_v22 = vpop.permute.xlu1 %4881 }
 0x7e6   : > { %4928 = vst.msk [vmem:[#allocation5 + $0xc] sm:$0xf] %vm3480_vm0, %v4882_v22 }
 0x7e9   : > { %v4892_v62 = vpop.permute.xlu1 %4891  ;;  %v6915_v0 = vld [vmem:[#allocation5 + $0x14] ss:$8 sps:$4 sm:$0xff]  }
 0x7ea   : > { %4933 = vst.msk [vmem:[#allocation5 + $0x34] sm:$0xf] %vm3480_vm0, %v4892_v62  ;;  %v4946_v58 = vld [vmem:[#allocation5 + $0x18] sm:$0xff] }
 0x7eb   : > { %v5944_v37 = vcombine.low %v4945_v54, %v4946_v58  ;;  %v5353_v54 = vld [vmem:[%s7653_s28 + $0x48] sm:$0xff] }
 0x7ed   : > { %v4888_v49 = vpop.permute.xlu1 %4887  ;;  %v6914_v61 = vld [vmem:[#allocation5 + $0x4] ss:$8 sps:$4 sm:$0xff]  }
 0x7ee   : > { %4931 = vst.msk [vmem:[#allocation5 + $0x24] sm:$0xf] %vm3480_vm0, %v4888_v49  ;;  %5263 = vmatprep.mubr.bf16.mxu0 %v6914_v61  ;;  %v5351_v49 = vld [vmem:[%s7653_s28 + $0x38] sm:$0xff] }
 0x7ef   : > { %5264 = vmatmul.mubr.bf16.vlgmr.msra.gmra.mxu0 %v6912_v63 }
 0x7f0   : > { %5273 = vmatprep.mubr.bf16.mxu0 %v6915_v0  ;;  %v5352_v0 = vld [vmem:[%s7653_s28 + $0x40] sm:$0xff] }
 0x7f1   : > { %v4894_v27 = vpop.permute.xlu1 %4893  ;;  %v4949_v36 = vld [vmem:[#allocation5 + $0x30] sm:$0xff] }
 0x7f2   : > { %4934 = vst.msk [vmem:[#allocation5 + $0x3c] sm:$0xf] %vm3480_vm0, %v4894_v27 }
 0x7f5   : > { %v4902_v21 = vpop.permute.xlu0 %4901  ;;  %v4890_v50 = vpop.permute.xlu1 %4889  ;;  %v4947_v16 = vld [vmem:[#allocation5 + $0x20] sm:$0xff] }
 0x7f6   : > { %4938 = vst.msk [vmem:[#allocation5 + $0x5c] sm:$0xf] %vm3480_vm0, %v4902_v21  ;;  %4932 = vst.msk [vmem:[#allocation5 + $0x2c] sm:$0xf] %vm3480_vm0, %v4890_v50 }
 0x7f7   : > { %5274 = vmatmul.mubr.bf16.gmra.mxu0 %v5944_v37  ;;  %v5354_v37 = vld [vmem:[%s7653_s28 + $0x50] sm:$0xff] }
 0x7f9   : > { %v3459_v20 = vpop.permute.xlu0 %3458  ;;  %v6919_v19 = vld [vmem:[#allocation5 + $0x34] ss:$8 sps:$4 sm:$0xff]  }
 0x7fa   : > { %3494 = vst.msk [vmem:[#allocation5 + $0x68] sm:$0xf] %vm3480_vm0, %v3459_v20  ;;  %v4950_v38 = vld [vmem:[#allocation5 + $0x38] sm:$0xff] }
 0x7fb   : > { %v5948_v11 = vcombine.low %v4949_v36, %v4950_v38  ;;  %v5357_v36 = vld [vmem:[%s7653_s28 + $0x68] sm:$0xff] }
 0x7fd   : > { %v4948_v44 = vld [vmem:[#allocation5 + $0x28] sm:$0xff] }
 0x7fe   : > { %v6917_v18 = vld [vmem:[#allocation5 + $0x24] ss:$8 sps:$4 sm:$0xff]   ;;  %v5946_v1 = vcombine.low %v4947_v16, %v4948_v44  ;;  %v5355_v44 = vld [vmem:[%s7653_s28 + $0x58] sm:$0xff] }
 0x7ff   : > { %5283 = vmatprep.mubr.bf16.mxu0 %v6917_v18 }
 0x800   : > { %5284 = vmatmul.mubr.bf16.gmra.mxu0 %v5946_v1 }
 0x801   : > { %v4906_v45 = vpop.permute.xlu0 %4905  ;;  %5293 = vmatprep.mubr.bf16.mxu0 %v6919_v19  ;;  %v5356_v19 = vld [vmem:[%s7653_s28 + $0x60] sm:$0xff] }
 0x802   : > { %4940 = vst.msk [vmem:[#allocation5 + $0x6c] sm:$0xf] %vm3480_vm0, %v4906_v45 }
 0x805   : > { %v3463_v42 = vpop.permute.xlu0 %3462 }
 0x806   : > { %3496 = vst.msk [vmem:[#allocation5 + $0x78] sm:$0xf] %vm3480_vm0, %v3463_v42 }
 0x808   : > { %5294 = vmatmul.mubr.bf16.gmra.mxu0 %v5948_v11 }
 0x809   : > { %v4910_v12 = vpop.permute.xlu0 %4909 }
 0x80a   : > { %4942 = vst.msk [vmem:[#allocation5 + $0x7c] sm:$0xf] %vm3480_vm0, %v4910_v12  ;;  %v5358_v12 = vld [vmem:[%s7653_s28 + $0x70] sm:$0xff] }
 0x830   : > { %v2464_v25 = vpop.xlane.xlu1 %2463 }
 0x831   : > { %7219 = vrcp.f32 %v2464_v25 }
 0x834   : > { %v3449_v10 = vpop.permute.xlu1 %3448 }
 0x835   : > { %3489 = vst.msk [vmem:[#allocation5 + $0x40] sm:$0xf] %vm3480_vm0, %v3449_v10 }
 0x838   : > { %v4896_v55 = vpop.permute.xlu1 %4895 }
 0x839   : > { %4935 = vst.msk [vmem:[#allocation5 + $0x44] sm:$0xf] %vm3480_vm0, %v4896_v55  ;;  %v5359_v55 = vld [vmem:[%s7653_s28 + $0x78] sm:$0xff] }
 0x83c   : > { %v4898_v53 = vpop.permute.xlu1 %4897  ;;  %v6923_v47 = vld [vmem:[#allocation5 + $0x40] ss:$8 sps:$4 sm:$0xff]  }
 0x83d   : > { %4936 = vst.msk [vmem:[#allocation5 + $0x4c] sm:$0xf] %vm3480_vm0, %v4898_v53 }
 0x83e   : > { %v7220_v32 = vpop.eup %7219 }
 0x83f   : > { %v2650_v7 = vmul.f32 %v7220_v32, %v9383_v29 }
 0x840   : > { %v3453_v30 = vpop.permute.xlu1 %3452 }
 0x841   : > { %3491 = vst.msk [vmem:[#allocation5 + $0x50] sm:$0xf] %vm3480_vm0, %v3453_v30  ;;  %v6059_v28 = vpack.c.bf16 %v2650_v7, %v2650_v7  ;;  %v5360_v7 = vld [vmem:[%s7653_s28 + $0x80] sm:$0xff] }
 0x843   : > { %2731 = vst.msk [vmem:[#allocation5 + $0x70] sm:$0xf] %vm2716_vm2, %v6059_v28  ;;  %v5361_v28 = vld [vmem:[%s7653_s28 + $0x88] sm:$0xff] }
 0x844   : > { %v4900_v40 = vpop.permute.xlu1 %4899  ;;  %v6921_v46 = vld [vmem:[#allocation5 + $0x44] ss:$8 sps:$4 sm:$0xff]  }
 0x845   : > { %4937 = vst.msk [vmem:[#allocation5 + $0x54] sm:$0xf] %vm3480_vm0, %v4900_v40  ;;  %5303 = vmatprep.mubr.bf16.mxu0 %v6921_v46 }
 0x846   : > { %5304 = vmatmul.mubr.bf16.gmra.mxu0 %v6923_v47  ;;  %v5362_v47 = vld [vmem:[%s7653_s28 + $0x90] sm:$0xff] }
 0x848   : > { %v3457_v23 = vpop.permute.xlu1 %3456  ;;  %v6926_v34 = vld [vmem:[#allocation5 + $0x50] ss:$8 sps:$4 sm:$0xff]  }
 0x849   : > { %3493 = vst.msk [vmem:[#allocation5 + $0x60] sm:$0xf] %vm3480_vm0, %v3457_v23 }
 0x84c   : > { %v4904_v57 = vpop.permute.xlu1 %4903  ;;  %v6924_v43 = vld [vmem:[#allocation5 + $0x54] ss:$8 sps:$4 sm:$0xff]  }
 0x84d   : > { %4939 = vst.msk [vmem:[#allocation5 + $0x64] sm:$0xf] %vm3480_vm0, %v4904_v57  ;;  %5313 = vmatprep.mubr.bf16.mxu0 %v6924_v43  ;;  %v5363_v43 = vld [vmem:[%s7653_s28 + $0x98] sm:$0xff] }
 0x84e   : > { %5314 = vmatmul.mubr.bf16.gmra.mxu0 %v6926_v34 }
 0x850   : > { %v3461_v5 = vpop.permute.xlu1 %3460  ;;  %v6929_v2 = vld [vmem:[#allocation5 + $0x60] ss:$8 sps:$4 sm:$0xff]  }
 0x851   : > { %3495 = vst.msk [vmem:[#allocation5 + $0x70] sm:$0xf] %vm3480_vm0, %v3461_v5 }
 0x854   : > { %v4908_v56 = vpop.permute.xlu1 %4907  ;;  %v6927_v13 = vld [vmem:[#allocation5 + $0x64] ss:$8 sps:$4 sm:$0xff]  }
 0x855   : > { %4941 = vst.msk [vmem:[#allocation5 + $0x74] sm:$0xf] %vm3480_vm0, %v4908_v56  ;;  %5323 = vmatprep.mubr.bf16.mxu0 %v6927_v13  ;;  %v5364_v56 = vld [vmem:[%s7653_s28 + $0xa0] sm:$0xff] }
 0x856   : > { %5324 = vmatmul.mubr.bf16.gmra.mxu0 %v6929_v2 }
 0x858   : > { %v6932_v4 = vld [vmem:[#allocation5 + $0x70] ss:$8 sps:$4 sm:$0xff]  }
 0x85c   : > { %v6930_v52 = vld [vmem:[#allocation5 + $0x74] ss:$8 sps:$4 sm:$0xff]  }
 0x85d   : > { %5333 = vmatprep.mubr.bf16.mxu0 %v6930_v52  ;;  %v5365_v52 = vld [vmem:[%s7653_s28 + $0xa8] sm:$0xff] }
 0x85e   : > { %5334 = vmatmul.mubr.bf16.gmra.mxu0 %v6932_v4 }
 0x8af   : > { %v5265_v59 = vpop.f32.mrf.mxu0 }
 0x8b0   : > { %v5376_v26 = vadd.f32 %v5344_v24, %v5265_v59  ;;  %v5366_v59 = vld [vmem:[%s7653_s28 + $0xb0] sm:$0xff] }
 0x8b1   : > { %v5267_v8 = vpop.f32.mrf.mxu0 }
 0x8b2   : > { %5408 = vst [vmem:[%s9144_s14] sm:$0xff] %v5376_v26  ;;  %v5377_v17 = vadd.f32 %v5345_v33, %v5267_v8  ;;  %v5367_v8 = vld [vmem:[%s7653_s28 + $0xb8] sm:$0xff] }
 0x8b3   : > { %v5269_v51 = vpop.f32.mrf.mxu0 }
 0x8b4   : > { %5409 = vst [vmem:[%s9144_s14 + $0x8] sm:$0xff] %v5377_v17  ;;  %v5378_v15 = vadd.f32 %v5346_v39, %v5269_v51  ;;  %v5368_v51 = vld [vmem:[%s7653_s28 + $0xc0] sm:$0xff] }
 0x8b5   : > { %v5271_v14 = vpop.f32.mrf.mxu0 }
 0x8b6   : > { %5410 = vst [vmem:[%s9144_s14 + $0x10] sm:$0xff] %v5378_v15  ;;  %v5379_v6 = vadd.f32 %v5347_v35, %v5271_v14  ;;  %v5369_v14 = vld [vmem:[%s7653_s28 + $0xc8] sm:$0xff] }
 0x8b7   : > { %v5275_v3 = vpop.f32.mrf.mxu0 }
 0x8b8   : > { %5411 = vst [vmem:[%s9144_s14 + $0x18] sm:$0xff] %v5379_v6  ;;  %v5380_v31 = vadd.f32 %v5348_v60, %v5275_v3  ;;  %v5370_v3 = vld [vmem:[%s7653_s28 + $0xd0] sm:$0xff] }
 0x8b9   : > { %v5277_v9 = vpop.f32.mrf.mxu0 }
 0x8ba   : > { %5412 = vst [vmem:[%s9144_s14 + $0x20] sm:$0xff] %v5380_v31  ;;  %v5381_v22 = vadd.f32 %v5349_v48, %v5277_v9  ;;  %v5371_v9 = vld [vmem:[%s7653_s28 + $0xd8] sm:$0xff] }
 0x8bb   : > { %v5279_v62 = vpop.f32.mrf.mxu0 }
 0x8bc   : > { %5413 = vst [vmem:[%s9144_s14 + $0x28] sm:$0xff] %v5381_v22  ;;  %v5382_v63 = vadd.f32 %v5350_v41, %v5279_v62  ;;  %v5372_v62 = vld [vmem:[%s7653_s28 + $0xe0] sm:$0xff] }
 0x8bd   : > { %v5281_v61 = vpop.f32.mrf.mxu0 }
 0x8be   : > { %5414 = vst [vmem:[%s9144_s14 + $0x30] sm:$0xff] %v5382_v63  ;;  %v5383_v27 = vadd.f32 %v5351_v49, %v5281_v61  ;;  %v5373_v61 = vld [vmem:[%s7653_s28 + $0xe8] sm:$0xff] }
 0x8c0   : > { %v5285_v58 = vpop.f32.mrf.mxu0  ;;  %5415 = vst [vmem:[%s9144_s14 + $0x38] sm:$0xff] %v5383_v27 }
 0x8c1   : > { %v5384_v21 = vadd.f32 %v5352_v0, %v5285_v58  ;;  %v5374_v58 = vld [vmem:[%s7653_s28 + $0xf0] sm:$0xff] }
 0x8c2   : > { %v5287_v50 = vpop.f32.mrf.mxu0 }
 0x8c3   : > { %5416 = vst [vmem:[%s9144_s14 + $0x40] sm:$0xff] %v5384_v21  ;;  %v5385_v20 = vadd.f32 %v5353_v54, %v5287_v50  ;;  %v5375_v50 = vld [vmem:[%s7653_s28 + $0xf8] sm:$0xff]  ;;  %s7439_s28 = smov [#allocation15]  }
 0x8c4   : > { %v5289_v16 = vpop.f32.mrf.mxu0  ;;  %s7357_s3 = sshll.u32 %s7439_s28, 4  ;;  %s7358_s3 = int_to_ptr.vmem [resolvable:$false] %s7357_s3 }
 0x8c5   : > { %5417 = vst [vmem:[%s9144_s14 + $0x48] sm:$0xff] %v5385_v20  ;;  %v5386_v18 = vadd.f32 %v5354_v37, %v5289_v16  ;;  %s7359_s27 = scalar_lea.vmem %s7358_s3, 8192  ;;  %p7360_p0 = scmp.lt.s32.totalorder %s9212_s21, %s7358_s3 }
 0x8c6   : > { %v5291_v1 = vpop.f32.mrf.mxu0  ;;  %p7361_p11 = scmp.lt.s32.totalorder %s7359_s27, %s7353_s26 }
 0x8c7   : > { %5418 = vst [vmem:[%s9144_s14 + $0x50] sm:$0xff] %v5386_v18  ;;  %v5387_v45 = vadd.f32 %v5355_v44, %v5291_v1 }
 0x8c8   : > { %v5295_v38 = vpop.f32.mrf.mxu0  ;;  %p7362_p5 = por %p7361_p11, %p7360_p0 }
 0x8c9   : > { %5419 = vst [vmem:[%s9144_s14 + $0x58] sm:$0xff] %v5387_v45  ;;  %v5388_v42 = vadd.f32 %v5356_v19, %v5295_v38 }
 0x8ca   : > { %v5297_v11 = vpop.f32.mrf.mxu0  ;;  %p7363_p3 = pnand %p7362_p5, %p7356_p13 }
 0x8cb   : > { %5420 = vst [vmem:[%s9144_s14 + $0x60] sm:$0xff] %v5388_v42  ;;  %v5389_v25 = vadd.f32 %v5357_v36, %v5297_v11 }
 0x8cc   : > { %v5299_v10 = vpop.f32.mrf.mxu0 }
 0x8cd   : > { %5421 = vst [vmem:[%s9144_s14 + $0x68] sm:$0xff] %v5389_v25  ;;  %v5390_v53 = vadd.f32 %v5358_v12, %v5299_v10 }
 0x8ce   : > { %v5301_v32 = vpop.f32.mrf.mxu0 }
 0x8cf   : > { %5422 = vst [vmem:[%s9144_s14 + $0x70] sm:$0xff] %v5390_v53  ;;  %v5391_v29 = vadd.f32 %v5359_v55, %v5301_v32 }
 0x8d1   : > { %5423 = vst [vmem:[%s9144_s14 + $0x78] sm:$0xff] %v5391_v29 }
 0x906   : > { %v5305_v30 = vpop.f32.mrf.mxu0 }
 0x907   : > { %v5392_v40 = vadd.f32 %v5360_v7, %v5305_v30 }
 0x908   : > { %v5307_v46 = vpop.f32.mrf.mxu0 }
 0x909   : > { %5424 = vst [vmem:[%s9144_s14 + $0x80] sm:$0xff] %v5392_v40  ;;  %v5393_v23 = vadd.f32 %v5361_v28, %v5307_v46 }
 0x90a   : > { %v5309_v57 = vpop.f32.mrf.mxu0 }
 0x90b   : > { %5425 = vst [vmem:[%s9144_s14 + $0x88] sm:$0xff] %v5393_v23  ;;  %v5394_v34 = vadd.f32 %v5362_v47, %v5309_v57 }
 0x90c   : > { %v5311_v5 = vpop.f32.mrf.mxu0 }
 0x90d   : > { %5426 = vst [vmem:[%s9144_s14 + $0x90] sm:$0xff] %v5394_v34  ;;  %v5395_v13 = vadd.f32 %v5363_v43, %v5311_v5 }
 0x90e   : > { %v5315_v2 = vpop.f32.mrf.mxu0 }
 0x90f   : > { %5427 = vst [vmem:[%s9144_s14 + $0x98] sm:$0xff] %v5395_v13  ;;  %v5396_v4 = vadd.f32 %v5364_v56, %v5315_v2 }
 0x910   : > { %v5317_v24 = vpop.f32.mrf.mxu0 }
 0x911   : > { %5428 = vst [vmem:[%s9144_s14 + $0xa0] sm:$0xff] %v5396_v4  ;;  %v5397_v33 = vadd.f32 %v5365_v52, %v5317_v24 }
 0x912   : > { %v5319_v26 = vpop.f32.mrf.mxu0 }
 0x913   : > { %5429 = vst [vmem:[%s9144_s14 + $0xa8] sm:$0xff] %v5397_v33  ;;  %v5398_v39 = vadd.f32 %v5366_v59, %v5319_v26 }
 0x914   : > { %v5321_v17 = vpop.f32.mrf.mxu0 }
 0x915   : > { %5430 = vst [vmem:[%s9144_s14 + $0xb0] sm:$0xff] %v5398_v39  ;;  %v5399_v35 = vadd.f32 %v5367_v8, %v5321_v17 }
 0x916   : > { %v5325_v15 = vpop.f32.mrf.mxu0 }
 0x917   : > { %5431 = vst [vmem:[%s9144_s14 + $0xb8] sm:$0xff] %v5399_v35  ;;  %v5400_v60 = vadd.f32 %v5368_v51, %v5325_v15 }
 0x918   : > { %v5327_v6 = vpop.f32.mrf.mxu0 }
 0x919   : > { %5432 = vst [vmem:[%s9144_s14 + $0xc0] sm:$0xff] %v5400_v60  ;;  %v5401_v48 = vadd.f32 %v5369_v14, %v5327_v6 }
 0x91a   : > { %v5329_v31 = vpop.f32.mrf.mxu0 }
 0x91b   : > { %5433 = vst [vmem:[%s9144_s14 + $0xc8] sm:$0xff] %v5401_v48  ;;  %v5402_v41 = vadd.f32 %v5370_v3, %v5329_v31 }
 0x91c   : > { %v5331_v22 = vpop.f32.mrf.mxu0 }
 0x91d   : > { %5434 = vst [vmem:[%s9144_s14 + $0xd0] sm:$0xff] %v5402_v41  ;;  %v5403_v49 = vadd.f32 %v5371_v9, %v5331_v22 }
 0x91e   : > { %v5335_v63 = vpop.f32.mrf.mxu0 }
 0x91f   : > { %5435 = vst [vmem:[%s9144_s14 + $0xd8] sm:$0xff] %v5403_v49  ;;  %v5404_v0 = vadd.f32 %v5372_v62, %v5335_v63 }
 0x920   : > { %v5337_v27 = vpop.f32.mrf.mxu0 }
 0x921   : > { %5436 = vst [vmem:[%s9144_s14 + $0xe0] sm:$0xff] %v5404_v0  ;;  %v5405_v54 = vadd.f32 %v5373_v61, %v5337_v27 }
 0x922   : > { %v5339_v21 = vpop.f32.mrf.mxu0 }
 0x923   : > { %5437 = vst [vmem:[%s9144_s14 + $0xe8] sm:$0xff] %v5405_v54  ;;  %v5406_v37 = vadd.f32 %v5374_v58, %v5339_v21 }
 0x924   : > { %v5341_v20 = vpop.f32.mrf.mxu0 }
 0x925   : > { %5438 = vst [vmem:[%s9144_s14 + $0xf0] sm:$0xff] %v5406_v37  ;;  %v5407_v16 = vadd.f32 %v5375_v50, %v5341_v20 }
 0x927   : > { %5439 = vst [vmem:[%s9144_s14 + $0xf8] sm:$0xff] %v5407_v16 }
 0x928   : > { %7366 = shalt.err (!%p7363_p3)
}
 0x929   : > { %s7367_s22 = scalar_lea.hbm %s9210_s25, 4096  ;;  %s7371_s29 = scalar_lea.hbm %s9266_s9, 8192 }
 0x92a   : > { %p7368_p4 = scmp.ne.s32.totalorder %s9210_s25, %s7367_s22  ;;  %p7372_p9 = scmp.lt.s32.totalorder %s9210_s25, %s9266_s9 }
 0x92b   : > { %p7373_p2 = scmp.lt.s32.totalorder %s7371_s29, %s7367_s22 }
 0x92c   : > { %p7369_p6 = pnand %p7368_p4, %p9384_p7 }
 0x92d   : > { %p7374_p10 = por %p7373_p2, %p7372_p9 }
 0x92e   : > { %p7370_p8 = pneg %p7369_p6 }
 0x930   : > { %p7375_p12 = pnand %p7374_p10, %p7370_p8 }
 0x932   : > { %7378 = shalt.err (!%p7375_p12)
}
 0x933   : > { %s7440_s20 = smov 256   ;;  %s7441_s24 = smov 16  }
 0x934   : > { %6544 = dma.vmem_to_hbm [thread:$0]  (%p9384_p7), %s9212_s21, 4096, %s9210_s25, %s5441_s13, %s7440_s20, %s7440_s20, %s7441_s24  }
 0x935 PF: > { %s5469_s26 = sand.u32 1, %s7413_s30   ;;  %p9385_p1 = scmp.ne.s32.totalorder %s9296_s16, 0 }
 0x936   : > { %p9386_p13 = scmp.ge.s32.totalorder %s7425_s12, 2  ;;  %s5470_s28 = scalar_lea.sflag [#allocation8], %s5469_s26 }
 0x938   : > { %p6564_p0 = pnand %p9386_p13, %p9385_p1 }
 0x93a   : > { %p6565_p11 = pneg %p6564_p0 }
 0x93c   : > { %7408 = dma.done.wait (%p6565_p11), %s5470_s28, 4096  }
 0x93d   : > { %7410 = vsyncadd (%p6565_p11), %s5470_s28, 4294963200  ;;  %p24_p5 = scmp.ge.s32.totalorder %s7592_s18, 4   ;;  %s9387_s30 = smov %s7417_s10 }
 0x93e   : > { %s9388_s10 = smov %s7421_s11  ;;  %s9389_s11 = smov %s7608_s23 }
 0x93f   : > { %s9390_s12 = smov %s7592_s18  ;;  %26 = sbr.rel (!%p24_p5) target bundleno = 11 (0xb), region = 126 }
 0x944   :  { %5475 = vsyncpa [#allocation7], 1 }
 0x945   :  { %5477 = vsyncpa [#allocation7 + $0x1], 1 }
 0x946   :  { %5478 = vsyncpa [#allocation10], 1 }
 0x947   :  { %5479 = vsyncpa [#allocation13], 1 }
 0x948   :  { %5480 = vsyncpa [#allocation8], 1 }
 0x949   :  { %5482 = vsyncpa [#allocation8 + $0x1], 1 }

</bundles_post_ra>
